<compile_context>
chip_gen: v7x
topology: tpu7x:2x2x1
jax: 0.10.0
libtpu: 0.0.40
codegen_flags: <defaults>
</compile_context>

<pallas_src>
import numpy as np
import jax
import jax.numpy as jnp
from jax.experimental import pallas as pl
from jax.experimental.pallas import tpu as pltpu

# ----------------------------- configuration (small synthetic sizes) ----------------
HIDDEN_NF = 32
IN_NODE_NF = 8
IN_EDGE_NF = 0          # forward() uses edge_attr=None -> edges_in_d must be 0
NODE_ATTR = 1           # EGNN default: node_attr=1 -> nodes_att_dim = in_node_nf
N_LAYERS = 4
N_NODES = 8
BATCH = 2
E_PER = N_NODES * (N_NODES - 1)      # fully connected per graph, no self-loops (56)
N_TOTAL = BATCH * N_NODES
E_TOTAL = BATCH * E_PER
OUT_PAD = 128                        # lane-dense padded width of the final output
LH = N_LAYERS * HIDDEN_NF            # 128 (lane-dense hoisted precompute width)


def _silu(x):
    return x * jax.nn.sigmoid(x)


# ----------------------------- fused per-graph Pallas kernel ------------------------
def _egnn_graph_kernel(
    # per-graph data (leading graph dim squeezed by BlockSpec)
    h0_ref, radial_ref, grow_ref, gcol_ref, growt_ref, nmask_ref,
    # weights (whole-array blocks, shared across grid steps)
    emb_w_ref, emb_b_ref,
    wha_ref, radw_ref, radb_ref, w2_ref, b2_ref, w3b_ref, w3c_ref, b3_ref,
    w4_ref, b4_ref,
    nd1_w_ref, nd1_b_ref, nd2_w_ref, nd2_b_ref,
    gd1_w_ref, gd1_b_ref, gd2_w_ref, gd2_b_ref,
    # output
    o_ref,
):
    H = HIDDEN_NF
    dot = lambda a, b: jnp.dot(a, b, preferred_element_type=jnp.float32)

    h0 = h0_ref[...]          # [N_NODES, F0]
    grow = grow_ref[...]      # [E_PER, N_NODES]   one-hot row gather
    gcol = gcol_ref[...]      # [E_PER, N_NODES]   one-hot col gather
    growt = growt_ref[...]    # [N_NODES, E_PER]   Grow^T with edge mask pre-folded

    # embedding: Linear(F0 -> H)
    h = dot(h0, emb_w_ref[...]) + emb_b_ref[...]

    # Layer-invariant, lane-dense (L*H = 128 wide) precomputes, hoisted off the
    # per-layer critical path:
    #   rad_all[:, li*H:(li+1)*H]  = radial * W1c[li] + b1[li]
    #   node_all[:, li*H:(li+1)*H] = h0 @ W3c[li] + b3[li]
    rad_all = radial_ref[...] * radw_ref[...] + radb_ref[...]     # [E_PER, 128]
    node_all = dot(h0, w3c_ref[...]) + b3_ref[...]                # [N_NODES, 128]

    # Unrolled layer loop; everything stays in VMEM/vregs between layers.
    for li in range(N_LAYERS):
        lo = li * H
        # merged h-side matmul: [h@W1a | h@W1b | h@W3a]   (one 96-lane MXU pass)
        hw = dot(h, wha_ref[li])                                  # [N_NODES, 3H]

        # edge_mlp Linear0 (reassociated gather):
        #   concat([h[row], h[col], radial]) @ W1 + b1
        # = Grow @ (h@W1a) + Gcol @ (h@W1b) + radial*W1c + b1
        e1 = dot(grow, hw[:, :H]) + dot(gcol, hw[:, H:2 * H]) + rad_all[:, lo:lo + H]
        e1 = _silu(e1)
        e2 = _silu(dot(e1, w2_ref[li]) + b2_ref[li])              # [E_PER, H]

        # unsorted_segment_sum(edge_feat * edge_mask, row, N) == (Grow^T * mask) @ e2
        agg = dot(growt, e2)                                      # [N_NODES, H]

        # node_mlp: concat([h, agg, h0]) @ W3 + b3 = h@W3a + agg@W3b + h0@W3c + b3
        n1 = _silu(hw[:, 2 * H:] + dot(agg, w3b_ref[li]) + node_all[:, lo:lo + H])
        h = dot(n1, w4_ref[li]) + b4_ref[li]

    # node_dec -> (node mask pre-folded into pooling row) -> sum pool -> graph_dec
    hd = _silu(dot(h, nd1_w_ref[...]) + nd1_b_ref[...])
    hd = dot(hd, nd2_w_ref[...]) + nd2_b_ref[...]                 # [N_NODES, H]
    pooled = dot(nmask_ref[...], hd)                              # [1, H]
    g = _silu(dot(pooled, gd1_w_ref[...]) + gd1_b_ref[...])
    # gd2 weight/bias zero-padded to 128 lanes -> unmasked, lane-dense store.
    o_ref[...] = dot(g, gd2_w_ref[...]) + gd2_b_ref[...]          # [1, 128]


# ----------------------------- cost estimate (static) --------------------------------
def _static_cost():
    H, F0, Ng, Eg, B, L = HIDDEN_NF, IN_NODE_NF, N_NODES, E_PER, BATCH, N_LAYERS
    macs = Ng * F0 * H + Eg * LH + Ng * F0 * LH                   # embedding + precomputes
    macs += L * (Ng * H * 3 * H          # merged h-side matmul
                 + 2 * Eg * Ng * H       # Grow/Gcol gather matmuls
                 + Eg * H * H            # edge_mlp Linear1
                 + Ng * Eg * H           # scatter-add (Grow^T @ e2)
                 + Ng * H * H            # agg @ W3b
                 + Ng * H * H)           # node_mlp Linear1
    macs += 2 * Ng * H * H + Ng * H + H * H + H * OUT_PAD         # decoders + pool
    trans = L * (2 * Eg * H + Ng * H) + Ng * H + H                # sigmoids (SiLU)
    return B * 2 * macs, B * trans


# ----------------------------- Pallas wrapper (full forward) -------------------------
def egnn_forward_pallas(weights, topo, h0, coord, row, col, node_mask, edge_mask):
    # radial is layer-invariant (coordinates never updated in this invariant variant)
    diff = coord[row] - coord[col]
    radial = jnp.sum(diff * diff, axis=1, keepdims=True).reshape(BATCH, E_PER, 1)

    h0_g = h0.reshape(BATCH, N_NODES, IN_NODE_NF)
    # fold 0/1 masks into the structural matrices once per call (exact for binary masks)
    growt_m = topo["growt"] * edge_mask.reshape(BATCH, 1, E_PER)   # [B, N, E]
    nmask_row = node_mask.reshape(BATCH, 1, N_NODES)               # [B, 1, N] pooling row

    data = (h0_g, radial, topo["grow"], topo["gcol"], growt_m, nmask_row)

    def _graph_spec(shape):
        nd = len(shape)
        return pl.BlockSpec((None,) + tuple(shape[1:]),
                            lambda b, _nd=nd: (b,) + (0,) * (_nd - 1))

    data_specs = [_graph_spec(a.shape) for a in data]
    weight_specs = [pl.BlockSpec(w.shape, lambda b, _nd=w.ndim: (0,) * _nd)
                    for w in weights]

    flops, trans = _static_cost()
    bytes_accessed = (sum(int(a.size) * 4 for a in data)
                      + sum(int(w.size) * 4 for w in weights)
                      + BATCH * OUT_PAD * 4)

    out = pl.pallas_call(
        _egnn_graph_kernel,
        grid=(BATCH,),
        out_shape=jax.ShapeDtypeStruct((BATCH, 1, OUT_PAD), jnp.float32),
        in_specs=data_specs + weight_specs,
        out_specs=pl.BlockSpec((None, 1, OUT_PAD), lambda b: (b, 0, 0)),
        compiler_params=pltpu.CompilerParams(
            dimension_semantics=("parallel",),          # graphs are independent -> 2 TCs on v7x
            vmem_limit_bytes=4 * 1024 * 1024,           # realistic limit (working set < 1 MiB)
        ),
        cost_estimate=pl.CostEstimate(
            flops=flops, transcendentals=trans, bytes_accessed=bytes_accessed),
    )(*data, *weights)
    return out[:, 0, 0]       # padded columns 1..127 carry zero weights -> slice


# ----------------------------- host-side static topology -----------------------------
def build_topology(rows, cols):
    """One-hot gather/scatter matrices, built ONCE on the host (static row/col)."""
    rows = np.asarray(rows)
    cols = np.asarray(cols)
    grow = np.zeros((BATCH, E_PER, N_NODES), np.float32)
    gcol = np.zeros((BATCH, E_PER, N_NODES), np.float32)
    for b in range(BATCH):
        for e in range(E_PER):
            r = int(rows[b * E_PER + e])
            c = int(cols[b * E_PER + e])
            assert r // N_NODES == b and c // N_NODES == b, "edges must be graph-local, graph-major"
            grow[b, e, r - b * N_NODES] = 1.0
            gcol[b, e, c - b * N_NODES] = 1.0
    growt = np.ascontiguousarray(np.transpose(grow, (0, 2, 1)))
    return dict(grow=jnp.asarray(grow), gcol=jnp.asarray(gcol), growt=jnp.asarray(growt))


# ----------------------------- parameter construction --------------------------------
def _linear_params(key, fan_in, fan_out):
    k1, k2 = jax.random.split(key)
    bound = 1.0 / (fan_in ** 0.5)
    w = jax.random.uniform(k1, (fan_in, fan_out), jnp.float32, -bound, bound)
    b = jax.random.uniform(k2, (1, fan_out), jnp.float32, -bound, bound)
    return w, b


def init_params(key):
    H, F0 = HIDDEN_NF, IN_NODE_NF
    nodes_att_dim = F0 if NODE_ATTR else 0
    keys = jax.random.split(key, 5 + N_LAYERS)
    params = {"layers": []}
    params["emb_w"], params["emb_b"] = _linear_params(keys[0], F0, H)
    for li in range(N_LAYERS):
        lk = jax.random.split(keys[1 + li], 4)
        w1, b1 = _linear_params(lk[0], 2 * H + 1 + IN_EDGE_NF, H)   # edge_mlp.Linear0
        w2, b2 = _linear_params(lk[1], H, H)                        # edge_mlp.Linear1
        w3, b3 = _linear_params(lk[2], 2 * H + nodes_att_dim, H)    # node_mlp.Linear0
        w4, b4 = _linear_params(lk[3], H, H)                        # node_mlp.Linear1
        params["layers"].append(dict(w1=w1, b1=b1, w2=w2, b2=b2, w3=w3, b3=b3, w4=w4, b4=b4))
    params["nd1_w"], params["nd1_b"] = _linear_params(keys[1 + N_LAYERS], H, H)
    params["nd2_w"], params["nd2_b"] = _linear_params(keys[2 + N_LAYERS], H, H)
    params["gd1_w"], params["gd1_b"] = _linear_params(keys[3 + N_LAYERS], H, H)
    params["gd2_w"], params["gd2_b"] = _linear_params(keys[4 + N_LAYERS], H, 1)
    return params


def pack_params(params):
    """Merge / stack / lane-pad weights for the fused kernel (order matches kernel args)."""
    H, F0, L = HIDDEN_NF, IN_NODE_NF, N_LAYERS
    layers = params["layers"]
    stk = lambda fn: jnp.stack([fn(lp) for lp in layers])

    # merged h-side weight per layer: [W1a | W1b | W3a]  -> one 96-lane matmul
    w_ha = stk(lambda lp: jnp.concatenate(
        [lp["w1"][:H], lp["w1"][H:2 * H], lp["w3"][:H]], axis=1))            # [L, H, 3H]
    w3b = stk(lambda lp: lp["w3"][H:2 * H])                                   # [L, H, H]
    w2 = stk(lambda lp: lp["w2"]); b2 = stk(lambda lp: lp["b2"])              # [L,H,H],[L,1,H]
    w4 = stk(lambda lp: lp["w4"]); b4 = stk(lambda lp: lp["b4"])

    # layer-invariant lane-dense precompute weights (hoisted terms)
    radw = stk(lambda lp: lp["w1"][2 * H:2 * H + 1]).transpose(1, 0, 2).reshape(1, L * H)
    radb = stk(lambda lp: lp["b1"]).transpose(1, 0, 2).reshape(1, L * H)
    w3c = stk(lambda lp: lp["w3"][2 * H:]).transpose(1, 0, 2).reshape(F0, L * H)
    b3 = stk(lambda lp: lp["b3"]).transpose(1, 0, 2).reshape(1, L * H)

    gd2_w_pad = jnp.zeros((H, OUT_PAD), jnp.float32).at[:, :1].set(params["gd2_w"])
    gd2_b_pad = jnp.zeros((1, OUT_PAD), jnp.float32).at[:, :1].set(params["gd2_b"])

    return (params["emb_w"], params["emb_b"],
            w_ha, radw, radb, w2, b2, w3b, w3c, b3, w4, b4,
            params["nd1_w"], params["nd1_b"], params["nd2_w"], params["nd2_b"],
            params["gd1_w"], params["gd1_b"], gd2_w_pad, gd2_b_pad)


# ----------------------------- pure-JAX reference ------------------------------------
def egnn_forward_ref(params, h0, coord, row, col, node_mask, edge_mask):
    h = h0 @ params["emb_w"] + params["emb_b"]
    for lp in params["layers"]:
        hr, hc = h[row], h[col]
        diff = coord[row] - coord[col]
        radial = jnp.sum(diff ** 2, axis=1, keepdims=True)
        e = jnp.concatenate([hr, hc, radial], axis=1)
        e = _silu(e @ lp["w1"] + lp["b1"])
        e = _silu(e @ lp["w2"] + lp["b2"])
        e = e * edge_mask
        agg = jnp.zeros_like(h).at[row].add(e)
        ncat = jnp.concatenate([h, agg, h0], axis=1)
        nmid = _silu(ncat @ lp["w3"] + lp["b3"])
        h = nmid @ lp["w4"] + lp["b4"]
    h = _silu(h @ params["nd1_w"] + params["nd1_b"]) @ params["nd2_w"] + params["nd2_b"]
    h = h * node_mask
    h = h.reshape(-1, N_NODES, HIDDEN_NF).sum(axis=1)
    pred = _silu(h @ params["gd1_w"] + params["gd1_b"]) @ params["gd2_w"] + params["gd2_b"]
    return pred[:, 0]


# ----------------------------- main ---------------------------------------------------
if __name__ == "__main__":
    key = jax.random.PRNGKey(0)
    k_param, k_h, k_pos, k_emask = jax.random.split(key, 4)

    params = init_params(k_param)
    weights = pack_params(params)

    h0 = jax.random.normal(k_h, (N_TOTAL, IN_NODE_NF), jnp.float32)
    positions = jax.random.normal(k_pos, (N_TOTAL, 3), jnp.float32)

    # fully connected edges within each graph (no self loops), graph-major order
    rows, cols = [], []
    for b in range(BATCH):
        for i in range(N_NODES):
            for j in range(N_NODES):
                if i != j:
                    rows.append(b * N_NODES + i)
                    cols.append(b * N_NODES + j)
    row = jnp.array(rows, dtype=jnp.int32)
    col = jnp.array(cols, dtype=jnp.int32)

    topo = build_topology(rows, cols)   # static topology built once on the host

    node_mask = jnp.ones((N_TOTAL, 1), jnp.float32)
    edge_mask = (jax.random.uniform(k_emask, (E_TOTAL, 1)) > 0.1).astype(jnp.float32)

    fwd = jax.jit(egnn_forward_pallas)
    pred = fwd(weights, topo, h0, positions, row, col, node_mask, edge_mask)
    pred = jax.block_until_ready(pred)

    ref = egnn_forward_ref(params, h0, positions, row, col, node_mask, edge_mask)
    assert pred.shape == (BATCH,)
    assert jnp.allclose(pred, ref, rtol=1e-3, atol=1e-3), (pred, ref)

    print("KERNEL_OK")
</pallas_src>

<mosaic_0001>
module attributes {stable_mosaic.version = 11 : i64} {
  func.func @_egnn_graph_kernel(%arg0: i32, %arg1: memref<1x8x8xf32, #tpu.memory_space<vmem>>, %arg2: memref<1x56x1xf32, #tpu.memory_space<vmem>>, %arg3: memref<1x56x8xf32, #tpu.memory_space<vmem>>, %arg4: memref<1x56x8xf32, #tpu.memory_space<vmem>>, %arg5: memref<1x8x56xf32, #tpu.memory_space<vmem>>, %arg6: memref<1x1x8xf32, #tpu.memory_space<vmem>>, %arg7: memref<8x32xf32, #tpu.memory_space<vmem>>, %arg8: memref<1x32xf32, #tpu.memory_space<vmem>>, %arg9: memref<4x32x96xf32, #tpu.memory_space<vmem>>, %arg10: memref<1x128xf32, #tpu.memory_space<vmem>>, %arg11: memref<1x128xf32, #tpu.memory_space<vmem>>, %arg12: memref<4x32x32xf32, #tpu.memory_space<vmem>>, %arg13: memref<4x1x32xf32, #tpu.memory_space<vmem>>, %arg14: memref<4x32x32xf32, #tpu.memory_space<vmem>>, %arg15: memref<8x128xf32, #tpu.memory_space<vmem>>, %arg16: memref<1x128xf32, #tpu.memory_space<vmem>>, %arg17: memref<4x32x32xf32, #tpu.memory_space<vmem>>, %arg18: memref<4x1x32xf32, #tpu.memory_space<vmem>>, %arg19: memref<32x32xf32, #tpu.memory_space<vmem>>, %arg20: memref<1x32xf32, #tpu.memory_space<vmem>>, %arg21: memref<32x32xf32, #tpu.memory_space<vmem>>, %arg22: memref<1x32xf32, #tpu.memory_space<vmem>>, %arg23: memref<32x32xf32, #tpu.memory_space<vmem>>, %arg24: memref<1x32xf32, #tpu.memory_space<vmem>>, %arg25: memref<32x128xf32, #tpu.memory_space<vmem>>, %arg26: memref<1x128xf32, #tpu.memory_space<vmem>>, %arg27: memref<1x1x128xf32, #tpu.memory_space<vmem>>) attributes {dimension_semantics = [#tpu.dimension_semantics<parallel>], iteration_bounds = array<i64: 2>, scalar_prefetch = 0 : i64, scratch_operands = 0 : i64, tpu.core_type = #tpu.core_type<tc>, window_params = [{transform_indices = @transform_0, window_bounds = array<i64: 1, 8, 8>}, {transform_indices = @transform_1, window_bounds = array<i64: 1, 56, 1>}, {transform_indices = @transform_2, window_bounds = array<i64: 1, 56, 8>}, {transform_indices = @transform_3, window_bounds = array<i64: 1, 56, 8>}, {transform_indices = @transform_4, window_bounds = array<i64: 1, 8, 56>}, {transform_indices = @transform_5, window_bounds = array<i64: 1, 1, 8>}, {pipeline_mode = #tpu.pipeline_mode<synchronous>, transform_indices = @transform_6, window_bounds = array<i64: 8, 32>}, {pipeline_mode = #tpu.pipeline_mode<synchronous>, transform_indices = @transform_7, window_bounds = array<i64: 1, 32>}, {pipeline_mode = #tpu.pipeline_mode<synchronous>, transform_indices = @transform_8, window_bounds = array<i64: 4, 32, 96>}, {pipeline_mode = #tpu.pipeline_mode<synchronous>, transform_indices = @transform_9, window_bounds = array<i64: 1, 128>}, {pipeline_mode = #tpu.pipeline_mode<synchronous>, transform_indices = @transform_10, window_bounds = array<i64: 1, 128>}, {pipeline_mode = #tpu.pipeline_mode<synchronous>, transform_indices = @transform_11, window_bounds = array<i64: 4, 32, 32>}, {pipeline_mode = #tpu.pipeline_mode<synchronous>, transform_indices = @transform_12, window_bounds = array<i64: 4, 1, 32>}, {pipeline_mode = #tpu.pipeline_mode<synchronous>, transform_indices = @transform_13, window_bounds = array<i64: 4, 32, 32>}, {pipeline_mode = #tpu.pipeline_mode<synchronous>, transform_indices = @transform_14, window_bounds = array<i64: 8, 128>}, {pipeline_mode = #tpu.pipeline_mode<synchronous>, transform_indices = @transform_15, window_bounds = array<i64: 1, 128>}, {pipeline_mode = #tpu.pipeline_mode<synchronous>, transform_indices = @transform_16, window_bounds = array<i64: 4, 32, 32>}, {pipeline_mode = #tpu.pipeline_mode<synchronous>, transform_indices = @transform_17, window_bounds = array<i64: 4, 1, 32>}, {pipeline_mode = #tpu.pipeline_mode<synchronous>, transform_indices = @transform_18, window_bounds = array<i64: 32, 32>}, {pipeline_mode = #tpu.pipeline_mode<synchronous>, transform_indices = @transform_19, window_bounds = array<i64: 1, 32>}, {pipeline_mode = #tpu.pipeline_mode<synchronous>, transform_indices = @transform_20, window_bounds = array<i64: 32, 32>}, {pipeline_mode = #tpu.pipeline_mode<synchronous>, transform_indices = @transform_21, window_bounds = array<i64: 1, 32>}, {pipeline_mode = #tpu.pipeline_mode<synchronous>, transform_indices = @transform_22, window_bounds = array<i64: 32, 32>}, {pipeline_mode = #tpu.pipeline_mode<synchronous>, transform_indices = @transform_23, window_bounds = array<i64: 1, 32>}, {pipeline_mode = #tpu.pipeline_mode<synchronous>, transform_indices = @transform_24, window_bounds = array<i64: 32, 128>}, {pipeline_mode = #tpu.pipeline_mode<synchronous>, transform_indices = @transform_25, window_bounds = array<i64: 1, 128>}, {transform_indices = @transform_26, window_bounds = array<i64: 1, 1, 128>}]} {
    %c0 = arith.constant 0 : index
    %c0_0 = arith.constant 0 : index
    %c0_1 = arith.constant 0 : index
    %0 = vector.load %arg1[%c0, %c0_0, %c0_1] : memref<1x8x8xf32, #tpu.memory_space<vmem>>, vector<1x8x8xf32>
    %1 = vector.shape_cast %0 : vector<1x8x8xf32> to vector<8x8xf32>
    %c0_2 = arith.constant 0 : index
    %c0_3 = arith.constant 0 : index
    %c0_4 = arith.constant 0 : index
    %2 = vector.load %arg3[%c0_2, %c0_3, %c0_4] : memref<1x56x8xf32, #tpu.memory_space<vmem>>, vector<1x56x8xf32>
    %3 = vector.shape_cast %2 : vector<1x56x8xf32> to vector<56x8xf32>
    %c0_5 = arith.constant 0 : index
    %c0_6 = arith.constant 0 : index
    %c0_7 = arith.constant 0 : index
    %4 = vector.load %arg4[%c0_5, %c0_6, %c0_7] : memref<1x56x8xf32, #tpu.memory_space<vmem>>, vector<1x56x8xf32>
    %5 = vector.shape_cast %4 : vector<1x56x8xf32> to vector<56x8xf32>
    %c0_8 = arith.constant 0 : index
    %c0_9 = arith.constant 0 : index
    %c0_10 = arith.constant 0 : index
    %6 = vector.load %arg5[%c0_8, %c0_9, %c0_10] : memref<1x8x56xf32, #tpu.memory_space<vmem>>, vector<1x8x56xf32>
    %7 = vector.shape_cast %6 : vector<1x8x56xf32> to vector<8x56xf32>
    %c0_11 = arith.constant 0 : index
    %c0_12 = arith.constant 0 : index
    %8 = vector.load %arg7[%c0_11, %c0_12] : memref<8x32xf32, #tpu.memory_space<vmem>>, vector<8x32xf32>
    %cst = arith.constant dense<0.000000e+00> : vector<8x32xf32>
    %9 = tpu.matmul %1, %8, %cst {dimension_numbers = #tpu.dot_dimension_numbers<[1], [0], [0], [1], [0, 0, 1, 1], [], []>} : vector<8x8xf32>, vector<8x32xf32>, vector<8x32xf32> -> vector<8x32xf32>
    %c0_13 = arith.constant 0 : index
    %c0_14 = arith.constant 0 : index
    %10 = vector.load %arg8[%c0_13, %c0_14] : memref<1x32xf32, #tpu.memory_space<vmem>>, vector<1x32xf32>
    %11 = vector.broadcast %10 : vector<1x32xf32> to vector<8x32xf32>
    %12 = arith.addf %9, %11 : vector<8x32xf32>
    %c0_15 = arith.constant 0 : index
    %c0_16 = arith.constant 0 : index
    %c0_17 = arith.constant 0 : index
    %13 = vector.load %arg2[%c0_15, %c0_16, %c0_17] : memref<1x56x1xf32, #tpu.memory_space<vmem>>, vector<1x56x1xf32>
    %14 = vector.shape_cast %13 : vector<1x56x1xf32> to vector<56x1xf32>
    %c0_18 = arith.constant 0 : index
    %c0_19 = arith.constant 0 : index
    %15 = vector.load %arg10[%c0_18, %c0_19] : memref<1x128xf32, #tpu.memory_space<vmem>>, vector<1x128xf32>
    %16 = vector.broadcast %14 : vector<56x1xf32> to vector<56x128xf32>
    %17 = vector.broadcast %15 : vector<1x128xf32> to vector<56x128xf32>
    %18 = arith.mulf %16, %17 : vector<56x128xf32>
    %c0_20 = arith.constant 0 : index
    %c0_21 = arith.constant 0 : index
    %19 = vector.load %arg11[%c0_20, %c0_21] : memref<1x128xf32, #tpu.memory_space<vmem>>, vector<1x128xf32>
    %20 = vector.broadcast %19 : vector<1x128xf32> to vector<56x128xf32>
    %21 = arith.addf %18, %20 : vector<56x128xf32>
    %c0_22 = arith.constant 0 : index
    %c0_23 = arith.constant 0 : index
    %22 = vector.load %arg15[%c0_22, %c0_23] : memref<8x128xf32, #tpu.memory_space<vmem>>, vector<8x128xf32>
    %cst_24 = arith.constant dense<0.000000e+00> : vector<8x128xf32>
    %23 = tpu.matmul %1, %22, %cst_24 {dimension_numbers = #tpu.dot_dimension_numbers<[1], [0], [0], [1], [0, 0, 1, 1], [], []>} : vector<8x8xf32>, vector<8x128xf32>, vector<8x128xf32> -> vector<8x128xf32>
    %c0_25 = arith.constant 0 : index
    %c0_26 = arith.constant 0 : index
    %24 = vector.load %arg16[%c0_25, %c0_26] : memref<1x128xf32, #tpu.memory_space<vmem>>, vector<1x128xf32>
    %25 = vector.broadcast %24 : vector<1x128xf32> to vector<8x128xf32>
    %26 = arith.addf %23, %25 : vector<8x128xf32>
    %c0_27 = arith.constant 0 : index
    %c0_28 = arith.constant 0 : index
    %c0_29 = arith.constant 0 : index
    %27 = vector.load %arg9[%c0_27, %c0_28, %c0_29] : memref<4x32x96xf32, #tpu.memory_space<vmem>>, vector<1x32x96xf32>
    %28 = vector.shape_cast %27 : vector<1x32x96xf32> to vector<32x96xf32>
    %cst_30 = arith.constant dense<0.000000e+00> : vector<8x96xf32>
    %29 = tpu.matmul %12, %28, %cst_30 {dimension_numbers = #tpu.dot_dimension_numbers<[1], [0], [0], [1], [0, 0, 1, 1], [], []>} : vector<8x32xf32>, vector<32x96xf32>, vector<8x96xf32> -> vector<8x96xf32>
    %30 = vector.extract_strided_slice %29 {offsets = [0, 0], sizes = [8, 32], strides = [1, 1]} : vector<8x96xf32> to vector<8x32xf32>
    %cst_31 = arith.constant dense<0.000000e+00> : vector<56x32xf32>
    %31 = tpu.matmul %3, %30, %cst_31 {dimension_numbers = #tpu.dot_dimension_numbers<[1], [0], [0], [1], [0, 0, 1, 1], [], []>} : vector<56x8xf32>, vector<8x32xf32>, vector<56x32xf32> -> vector<56x32xf32>
    %32 = vector.extract_strided_slice %29 {offsets = [0, 32], sizes = [8, 32], strides = [1, 1]} : vector<8x96xf32> to vector<8x32xf32>
    %cst_32 = arith.constant dense<0.000000e+00> : vector<56x32xf32>
    %33 = tpu.matmul %5, %32, %cst_32 {dimension_numbers = #tpu.dot_dimension_numbers<[1], [0], [0], [1], [0, 0, 1, 1], [], []>} : vector<56x8xf32>, vector<8x32xf32>, vector<56x32xf32> -> vector<56x32xf32>
    %34 = arith.addf %31, %33 : vector<56x32xf32>
    %35 = vector.extract_strided_slice %21 {offsets = [0, 0], sizes = [56, 32], strides = [1, 1]} : vector<56x128xf32> to vector<56x32xf32>
    %36 = arith.addf %34, %35 : vector<56x32xf32>
    %37 = arith.negf %36 : vector<56x32xf32>
    %38 = math.exp %37 : vector<56x32xf32>
    %cst_33 = arith.constant 1.000000e+00 : f32
    %39 = vector.broadcast %cst_33 : f32 to vector<56x32xf32>
    %40 = arith.addf %39, %38 : vector<56x32xf32>
    %41 = arith.divf %39, %40 : vector<56x32xf32>
    %42 = arith.mulf %36, %41 : vector<56x32xf32>
    %c0_34 = arith.constant 0 : index
    %c0_35 = arith.constant 0 : index
    %c0_36 = arith.constant 0 : index
    %43 = vector.load %arg12[%c0_34, %c0_35, %c0_36] : memref<4x32x32xf32, #tpu.memory_space<vmem>>, vector<1x32x32xf32>
    %44 = vector.shape_cast %43 : vector<1x32x32xf32> to vector<32x32xf32>
    %cst_37 = arith.constant dense<0.000000e+00> : vector<56x32xf32>
    %45 = tpu.matmul %42, %44, %cst_37 {dimension_numbers = #tpu.dot_dimension_numbers<[1], [0], [0], [1], [0, 0, 1, 1], [], []>} : vector<56x32xf32>, vector<32x32xf32>, vector<56x32xf32> -> vector<56x32xf32>
    %c0_38 = arith.constant 0 : index
    %c0_39 = arith.constant 0 : index
    %c0_40 = arith.constant 0 : index
    %46 = vector.load %arg13[%c0_38, %c0_39, %c0_40] : memref<4x1x32xf32, #tpu.memory_space<vmem>>, vector<1x1x32xf32>
    %47 = vector.shape_cast %46 : vector<1x1x32xf32> to vector<1x32xf32>
    %48 = vector.broadcast %47 : vector<1x32xf32> to vector<56x32xf32>
    %49 = arith.addf %45, %48 : vector<56x32xf32>
    %50 = arith.negf %49 : vector<56x32xf32>
    %51 = math.exp %50 : vector<56x32xf32>
    %cst_41 = arith.constant 1.000000e+00 : f32
    %52 = vector.broadcast %cst_41 : f32 to vector<56x32xf32>
    %53 = arith.addf %52, %51 : vector<56x32xf32>
    %54 = arith.divf %52, %53 : vector<56x32xf32>
    %55 = arith.mulf %49, %54 : vector<56x32xf32>
    %cst_42 = arith.constant dense<0.000000e+00> : vector<8x32xf32>
    %56 = tpu.matmul %7, %55, %cst_42 {dimension_numbers = #tpu.dot_dimension_numbers<[1], [0], [0], [1], [0, 0, 1, 1], [], []>} : vector<8x56xf32>, vector<56x32xf32>, vector<8x32xf32> -> vector<8x32xf32>
    %57 = vector.extract_strided_slice %29 {offsets = [0, 64], sizes = [8, 32], strides = [1, 1]} : vector<8x96xf32> to vector<8x32xf32>
    %c0_43 = arith.constant 0 : index
    %c0_44 = arith.constant 0 : index
    %c0_45 = arith.constant 0 : index
    %58 = vector.load %arg14[%c0_43, %c0_44, %c0_45] : memref<4x32x32xf32, #tpu.memory_space<vmem>>, vector<1x32x32xf32>
    %59 = vector.shape_cast %58 : vector<1x32x32xf32> to vector<32x32xf32>
    %cst_46 = arith.constant dense<0.000000e+00> : vector<8x32xf32>
    %60 = tpu.matmul %56, %59, %cst_46 {dimension_numbers = #tpu.dot_dimension_numbers<[1], [0], [0], [1], [0, 0, 1, 1], [], []>} : vector<8x32xf32>, vector<32x32xf32>, vector<8x32xf32> -> vector<8x32xf32>
    %61 = arith.addf %57, %60 : vector<8x32xf32>
    %62 = vector.extract_strided_slice %26 {offsets = [0, 0], sizes = [8, 32], strides = [1, 1]} : vector<8x128xf32> to vector<8x32xf32>
    %63 = arith.addf %61, %62 : vector<8x32xf32>
    %64 = arith.negf %63 : vector<8x32xf32>
    %65 = math.exp %64 : vector<8x32xf32>
    %cst_47 = arith.constant 1.000000e+00 : f32
    %66 = vector.broadcast %cst_47 : f32 to vector<8x32xf32>
    %67 = arith.addf %66, %65 : vector<8x32xf32>
    %68 = arith.divf %66, %67 : vector<8x32xf32>
    %69 = arith.mulf %63, %68 : vector<8x32xf32>
    %c0_48 = arith.constant 0 : index
    %c0_49 = arith.constant 0 : index
    %c0_50 = arith.constant 0 : index
    %70 = vector.load %arg17[%c0_48, %c0_49, %c0_50] : memref<4x32x32xf32, #tpu.memory_space<vmem>>, vector<1x32x32xf32>
    %71 = vector.shape_cast %70 : vector<1x32x32xf32> to vector<32x32xf32>
    %cst_51 = arith.constant dense<0.000000e+00> : vector<8x32xf32>
    %72 = tpu.matmul %69, %71, %cst_51 {dimension_numbers = #tpu.dot_dimension_numbers<[1], [0], [0], [1], [0, 0, 1, 1], [], []>} : vector<8x32xf32>, vector<32x32xf32>, vector<8x32xf32> -> vector<8x32xf32>
    %c0_52 = arith.constant 0 : index
    %c0_53 = arith.constant 0 : index
    %c0_54 = arith.constant 0 : index
    %73 = vector.load %arg18[%c0_52, %c0_53, %c0_54] : memref<4x1x32xf32, #tpu.memory_space<vmem>>, vector<1x1x32xf32>
    %74 = vector.shape_cast %73 : vector<1x1x32xf32> to vector<1x32xf32>
    %75 = vector.broadcast %74 : vector<1x32xf32> to vector<8x32xf32>
    %76 = arith.addf %72, %75 : vector<8x32xf32>
    %c1 = arith.constant 1 : index
    %c0_55 = arith.constant 0 : index
    %c0_56 = arith.constant 0 : index
    %77 = vector.load %arg9[%c1, %c0_55, %c0_56] : memref<4x32x96xf32, #tpu.memory_space<vmem>>, vector<1x32x96xf32>
    %78 = vector.shape_cast %77 : vector<1x32x96xf32> to vector<32x96xf32>
    %cst_57 = arith.constant dense<0.000000e+00> : vector<8x96xf32>
    %79 = tpu.matmul %76, %78, %cst_57 {dimension_numbers = #tpu.dot_dimension_numbers<[1], [0], [0], [1], [0, 0, 1, 1], [], []>} : vector<8x32xf32>, vector<32x96xf32>, vector<8x96xf32> -> vector<8x96xf32>
    %80 = vector.extract_strided_slice %79 {offsets = [0, 0], sizes = [8, 32], strides = [1, 1]} : vector<8x96xf32> to vector<8x32xf32>
    %cst_58 = arith.constant dense<0.000000e+00> : vector<56x32xf32>
    %81 = tpu.matmul %3, %80, %cst_58 {dimension_numbers = #tpu.dot_dimension_numbers<[1], [0], [0], [1], [0, 0, 1, 1], [], []>} : vector<56x8xf32>, vector<8x32xf32>, vector<56x32xf32> -> vector<56x32xf32>
    %82 = vector.extract_strided_slice %79 {offsets = [0, 32], sizes = [8, 32], strides = [1, 1]} : vector<8x96xf32> to vector<8x32xf32>
    %cst_59 = arith.constant dense<0.000000e+00> : vector<56x32xf32>
    %83 = tpu.matmul %5, %82, %cst_59 {dimension_numbers = #tpu.dot_dimension_numbers<[1], [0], [0], [1], [0, 0, 1, 1], [], []>} : vector<56x8xf32>, vector<8x32xf32>, vector<56x32xf32> -> vector<56x32xf32>
    %84 = arith.addf %81, %83 : vector<56x32xf32>
    %85 = vector.extract_strided_slice %21 {offsets = [0, 32], sizes = [56, 32], strides = [1, 1]} : vector<56x128xf32> to vector<56x32xf32>
    %86 = arith.addf %84, %85 : vector<56x32xf32>
    %87 = arith.negf %86 : vector<56x32xf32>
    %88 = math.exp %87 : vector<56x32xf32>
    %cst_60 = arith.constant 1.000000e+00 : f32
    %89 = vector.broadcast %cst_60 : f32 to vector<56x32xf32>
    %90 = arith.addf %89, %88 : vector<56x32xf32>
    %91 = arith.divf %89, %90 : vector<56x32xf32>
    %92 = arith.mulf %86, %91 : vector<56x32xf32>
    %c1_61 = arith.constant 1 : index
    %c0_62 = arith.constant 0 : index
    %c0_63 = arith.constant 0 : index
    %93 = vector.load %arg12[%c1_61, %c0_62, %c0_63] : memref<4x32x32xf32, #tpu.memory_space<vmem>>, vector<1x32x32xf32>
    %94 = vector.shape_cast %93 : vector<1x32x32xf32> to vector<32x32xf32>
    %cst_64 = arith.constant dense<0.000000e+00> : vector<56x32xf32>
    %95 = tpu.matmul %92, %94, %cst_64 {dimension_numbers = #tpu.dot_dimension_numbers<[1], [0], [0], [1], [0, 0, 1, 1], [], []>} : vector<56x32xf32>, vector<32x32xf32>, vector<56x32xf32> -> vector<56x32xf32>
    %c1_65 = arith.constant 1 : index
    %c0_66 = arith.constant 0 : index
    %c0_67 = arith.constant 0 : index
    %96 = vector.load %arg13[%c1_65, %c0_66, %c0_67] : memref<4x1x32xf32, #tpu.memory_space<vmem>>, vector<1x1x32xf32>
    %97 = vector.shape_cast %96 : vector<1x1x32xf32> to vector<1x32xf32>
    %98 = vector.broadcast %97 : vector<1x32xf32> to vector<56x32xf32>
    %99 = arith.addf %95, %98 : vector<56x32xf32>
    %100 = arith.negf %99 : vector<56x32xf32>
    %101 = math.exp %100 : vector<56x32xf32>
    %cst_68 = arith.constant 1.000000e+00 : f32
    %102 = vector.broadcast %cst_68 : f32 to vector<56x32xf32>
    %103 = arith.addf %102, %101 : vector<56x32xf32>
    %104 = arith.divf %102, %103 : vector<56x32xf32>
    %105 = arith.mulf %99, %104 : vector<56x32xf32>
    %cst_69 = arith.constant dense<0.000000e+00> : vector<8x32xf32>
    %106 = tpu.matmul %7, %105, %cst_69 {dimension_numbers = #tpu.dot_dimension_numbers<[1], [0], [0], [1], [0, 0, 1, 1], [], []>} : vector<8x56xf32>, vector<56x32xf32>, vector<8x32xf32> -> vector<8x32xf32>
    %107 = vector.extract_strided_slice %79 {offsets = [0, 64], sizes = [8, 32], strides = [1, 1]} : vector<8x96xf32> to vector<8x32xf32>
    %c1_70 = arith.constant 1 : index
    %c0_71 = arith.constant 0 : index
    %c0_72 = arith.constant 0 : index
    %108 = vector.load %arg14[%c1_70, %c0_71, %c0_72] : memref<4x32x32xf32, #tpu.memory_space<vmem>>, vector<1x32x32xf32>
    %109 = vector.shape_cast %108 : vector<1x32x32xf32> to vector<32x32xf32>
    %cst_73 = arith.constant dense<0.000000e+00> : vector<8x32xf32>
    %110 = tpu.matmul %106, %109, %cst_73 {dimension_numbers = #tpu.dot_dimension_numbers<[1], [0], [0], [1], [0, 0, 1, 1], [], []>} : vector<8x32xf32>, vector<32x32xf32>, vector<8x32xf32> -> vector<8x32xf32>
    %111 = arith.addf %107, %110 : vector<8x32xf32>
    %112 = vector.extract_strided_slice %26 {offsets = [0, 32], sizes = [8, 32], strides = [1, 1]} : vector<8x128xf32> to vector<8x32xf32>
    %113 = arith.addf %111, %112 : vector<8x32xf32>
    %114 = arith.negf %113 : vector<8x32xf32>
    %115 = math.exp %114 : vector<8x32xf32>
    %cst_74 = arith.constant 1.000000e+00 : f32
    %116 = vector.broadcast %cst_74 : f32 to vector<8x32xf32>
    %117 = arith.addf %116, %115 : vector<8x32xf32>
    %118 = arith.divf %116, %117 : vector<8x32xf32>
    %119 = arith.mulf %113, %118 : vector<8x32xf32>
    %c1_75 = arith.constant 1 : index
    %c0_76 = arith.constant 0 : index
    %c0_77 = arith.constant 0 : index
    %120 = vector.load %arg17[%c1_75, %c0_76, %c0_77] : memref<4x32x32xf32, #tpu.memory_space<vmem>>, vector<1x32x32xf32>
    %121 = vector.shape_cast %120 : vector<1x32x32xf32> to vector<32x32xf32>
    %cst_78 = arith.constant dense<0.000000e+00> : vector<8x32xf32>
    %122 = tpu.matmul %119, %121, %cst_78 {dimension_numbers = #tpu.dot_dimension_numbers<[1], [0], [0], [1], [0, 0, 1, 1], [], []>} : vector<8x32xf32>, vector<32x32xf32>, vector<8x32xf32> -> vector<8x32xf32>
    %c1_79 = arith.constant 1 : index
    %c0_80 = arith.constant 0 : index
    %c0_81 = arith.constant 0 : index
    %123 = vector.load %arg18[%c1_79, %c0_80, %c0_81] : memref<4x1x32xf32, #tpu.memory_space<vmem>>, vector<1x1x32xf32>
    %124 = vector.shape_cast %123 : vector<1x1x32xf32> to vector<1x32xf32>
    %125 = vector.broadcast %124 : vector<1x32xf32> to vector<8x32xf32>
    %126 = arith.addf %122, %125 : vector<8x32xf32>
    %c2 = arith.constant 2 : index
    %c0_82 = arith.constant 0 : index
    %c0_83 = arith.constant 0 : index
    %127 = vector.load %arg9[%c2, %c0_82, %c0_83] : memref<4x32x96xf32, #tpu.memory_space<vmem>>, vector<1x32x96xf32>
    %128 = vector.shape_cast %127 : vector<1x32x96xf32> to vector<32x96xf32>
    %cst_84 = arith.constant dense<0.000000e+00> : vector<8x96xf32>
    %129 = tpu.matmul %126, %128, %cst_84 {dimension_numbers = #tpu.dot_dimension_numbers<[1], [0], [0], [1], [0, 0, 1, 1], [], []>} : vector<8x32xf32>, vector<32x96xf32>, vector<8x96xf32> -> vector<8x96xf32>
    %130 = vector.extract_strided_slice %129 {offsets = [0, 0], sizes = [8, 32], strides = [1, 1]} : vector<8x96xf32> to vector<8x32xf32>
    %cst_85 = arith.constant dense<0.000000e+00> : vector<56x32xf32>
    %131 = tpu.matmul %3, %130, %cst_85 {dimension_numbers = #tpu.dot_dimension_numbers<[1], [0], [0], [1], [0, 0, 1, 1], [], []>} : vector<56x8xf32>, vector<8x32xf32>, vector<56x32xf32> -> vector<56x32xf32>
    %132 = vector.extract_strided_slice %129 {offsets = [0, 32], sizes = [8, 32], strides = [1, 1]} : vector<8x96xf32> to vector<8x32xf32>
    %cst_86 = arith.constant dense<0.000000e+00> : vector<56x32xf32>
    %133 = tpu.matmul %5, %132, %cst_86 {dimension_numbers = #tpu.dot_dimension_numbers<[1], [0], [0], [1], [0, 0, 1, 1], [], []>} : vector<56x8xf32>, vector<8x32xf32>, vector<56x32xf32> -> vector<56x32xf32>
    %134 = arith.addf %131, %133 : vector<56x32xf32>
    %135 = vector.extract_strided_slice %21 {offsets = [0, 64], sizes = [56, 32], strides = [1, 1]} : vector<56x128xf32> to vector<56x32xf32>
    %136 = arith.addf %134, %135 : vector<56x32xf32>
    %137 = arith.negf %136 : vector<56x32xf32>
    %138 = math.exp %137 : vector<56x32xf32>
    %cst_87 = arith.constant 1.000000e+00 : f32
    %139 = vector.broadcast %cst_87 : f32 to vector<56x32xf32>
    %140 = arith.addf %139, %138 : vector<56x32xf32>
    %141 = arith.divf %139, %140 : vector<56x32xf32>
    %142 = arith.mulf %136, %141 : vector<56x32xf32>
    %c2_88 = arith.constant 2 : index
    %c0_89 = arith.constant 0 : index
    %c0_90 = arith.constant 0 : index
    %143 = vector.load %arg12[%c2_88, %c0_89, %c0_90] : memref<4x32x32xf32, #tpu.memory_space<vmem>>, vector<1x32x32xf32>
    %144 = vector.shape_cast %143 : vector<1x32x32xf32> to vector<32x32xf32>
    %cst_91 = arith.constant dense<0.000000e+00> : vector<56x32xf32>
    %145 = tpu.matmul %142, %144, %cst_91 {dimension_numbers = #tpu.dot_dimension_numbers<[1], [0], [0], [1], [0, 0, 1, 1], [], []>} : vector<56x32xf32>, vector<32x32xf32>, vector<56x32xf32> -> vector<56x32xf32>
    %c2_92 = arith.constant 2 : index
    %c0_93 = arith.constant 0 : index
    %c0_94 = arith.constant 0 : index
    %146 = vector.load %arg13[%c2_92, %c0_93, %c0_94] : memref<4x1x32xf32, #tpu.memory_space<vmem>>, vector<1x1x32xf32>
    %147 = vector.shape_cast %146 : vector<1x1x32xf32> to vector<1x32xf32>
    %148 = vector.broadcast %147 : vector<1x32xf32> to vector<56x32xf32>
    %149 = arith.addf %145, %148 : vector<56x32xf32>
    %150 = arith.negf %149 : vector<56x32xf32>
    %151 = math.exp %150 : vector<56x32xf32>
    %cst_95 = arith.constant 1.000000e+00 : f32
    %152 = vector.broadcast %cst_95 : f32 to vector<56x32xf32>
    %153 = arith.addf %152, %151 : vector<56x32xf32>
    %154 = arith.divf %152, %153 : vector<56x32xf32>
    %155 = arith.mulf %149, %154 : vector<56x32xf32>
    %cst_96 = arith.constant dense<0.000000e+00> : vector<8x32xf32>
    %156 = tpu.matmul %7, %155, %cst_96 {dimension_numbers = #tpu.dot_dimension_numbers<[1], [0], [0], [1], [0, 0, 1, 1], [], []>} : vector<8x56xf32>, vector<56x32xf32>, vector<8x32xf32> -> vector<8x32xf32>
    %157 = vector.extract_strided_slice %129 {offsets = [0, 64], sizes = [8, 32], strides = [1, 1]} : vector<8x96xf32> to vector<8x32xf32>
    %c2_97 = arith.constant 2 : index
    %c0_98 = arith.constant 0 : index
    %c0_99 = arith.constant 0 : index
    %158 = vector.load %arg14[%c2_97, %c0_98, %c0_99] : memref<4x32x32xf32, #tpu.memory_space<vmem>>, vector<1x32x32xf32>
    %159 = vector.shape_cast %158 : vector<1x32x32xf32> to vector<32x32xf32>
    %cst_100 = arith.constant dense<0.000000e+00> : vector<8x32xf32>
    %160 = tpu.matmul %156, %159, %cst_100 {dimension_numbers = #tpu.dot_dimension_numbers<[1], [0], [0], [1], [0, 0, 1, 1], [], []>} : vector<8x32xf32>, vector<32x32xf32>, vector<8x32xf32> -> vector<8x32xf32>
    %161 = arith.addf %157, %160 : vector<8x32xf32>
    %162 = vector.extract_strided_slice %26 {offsets = [0, 64], sizes = [8, 32], strides = [1, 1]} : vector<8x128xf32> to vector<8x32xf32>
    %163 = arith.addf %161, %162 : vector<8x32xf32>
    %164 = arith.negf %163 : vector<8x32xf32>
    %165 = math.exp %164 : vector<8x32xf32>
    %cst_101 = arith.constant 1.000000e+00 : f32
    %166 = vector.broadcast %cst_101 : f32 to vector<8x32xf32>
    %167 = arith.addf %166, %165 : vector<8x32xf32>
    %168 = arith.divf %166, %167 : vector<8x32xf32>
    %169 = arith.mulf %163, %168 : vector<8x32xf32>
    %c2_102 = arith.constant 2 : index
    %c0_103 = arith.constant 0 : index
    %c0_104 = arith.constant 0 : index
    %170 = vector.load %arg17[%c2_102, %c0_103, %c0_104] : memref<4x32x32xf32, #tpu.memory_space<vmem>>, vector<1x32x32xf32>
    %171 = vector.shape_cast %170 : vector<1x32x32xf32> to vector<32x32xf32>
    %cst_105 = arith.constant dense<0.000000e+00> : vector<8x32xf32>
    %172 = tpu.matmul %169, %171, %cst_105 {dimension_numbers = #tpu.dot_dimension_numbers<[1], [0], [0], [1], [0, 0, 1, 1], [], []>} : vector<8x32xf32>, vector<32x32xf32>, vector<8x32xf32> -> vector<8x32xf32>
    %c2_106 = arith.constant 2 : index
    %c0_107 = arith.constant 0 : index
    %c0_108 = arith.constant 0 : index
    %173 = vector.load %arg18[%c2_106, %c0_107, %c0_108] : memref<4x1x32xf32, #tpu.memory_space<vmem>>, vector<1x1x32xf32>
    %174 = vector.shape_cast %173 : vector<1x1x32xf32> to vector<1x32xf32>
    %175 = vector.broadcast %174 : vector<1x32xf32> to vector<8x32xf32>
    %176 = arith.addf %172, %175 : vector<8x32xf32>
    %c3 = arith.constant 3 : index
    %c0_109 = arith.constant 0 : index
    %c0_110 = arith.constant 0 : index
    %177 = vector.load %arg9[%c3, %c0_109, %c0_110] : memref<4x32x96xf32, #tpu.memory_space<vmem>>, vector<1x32x96xf32>
    %178 = vector.shape_cast %177 : vector<1x32x96xf32> to vector<32x96xf32>
    %cst_111 = arith.constant dense<0.000000e+00> : vector<8x96xf32>
    %179 = tpu.matmul %176, %178, %cst_111 {dimension_numbers = #tpu.dot_dimension_numbers<[1], [0], [0], [1], [0, 0, 1, 1], [], []>} : vector<8x32xf32>, vector<32x96xf32>, vector<8x96xf32> -> vector<8x96xf32>
    %180 = vector.extract_strided_slice %179 {offsets = [0, 0], sizes = [8, 32], strides = [1, 1]} : vector<8x96xf32> to vector<8x32xf32>
    %cst_112 = arith.constant dense<0.000000e+00> : vector<56x32xf32>
    %181 = tpu.matmul %3, %180, %cst_112 {dimension_numbers = #tpu.dot_dimension_numbers<[1], [0], [0], [1], [0, 0, 1, 1], [], []>} : vector<56x8xf32>, vector<8x32xf32>, vector<56x32xf32> -> vector<56x32xf32>
    %182 = vector.extract_strided_slice %179 {offsets = [0, 32], sizes = [8, 32], strides = [1, 1]} : vector<8x96xf32> to vector<8x32xf32>
    %cst_113 = arith.constant dense<0.000000e+00> : vector<56x32xf32>
    %183 = tpu.matmul %5, %182, %cst_113 {dimension_numbers = #tpu.dot_dimension_numbers<[1], [0], [0], [1], [0, 0, 1, 1], [], []>} : vector<56x8xf32>, vector<8x32xf32>, vector<56x32xf32> -> vector<56x32xf32>
    %184 = arith.addf %181, %183 : vector<56x32xf32>
    %185 = vector.extract_strided_slice %21 {offsets = [0, 96], sizes = [56, 32], strides = [1, 1]} : vector<56x128xf32> to vector<56x32xf32>
    %186 = arith.addf %184, %185 : vector<56x32xf32>
    %187 = arith.negf %186 : vector<56x32xf32>
    %188 = math.exp %187 : vector<56x32xf32>
    %cst_114 = arith.constant 1.000000e+00 : f32
    %189 = vector.broadcast %cst_114 : f32 to vector<56x32xf32>
    %190 = arith.addf %189, %188 : vector<56x32xf32>
    %191 = arith.divf %189, %190 : vector<56x32xf32>
    %192 = arith.mulf %186, %191 : vector<56x32xf32>
    %c3_115 = arith.constant 3 : index
    %c0_116 = arith.constant 0 : index
    %c0_117 = arith.constant 0 : index
    %193 = vector.load %arg12[%c3_115, %c0_116, %c0_117] : memref<4x32x32xf32, #tpu.memory_space<vmem>>, vector<1x32x32xf32>
    %194 = vector.shape_cast %193 : vector<1x32x32xf32> to vector<32x32xf32>
    %cst_118 = arith.constant dense<0.000000e+00> : vector<56x32xf32>
    %195 = tpu.matmul %192, %194, %cst_118 {dimension_numbers = #tpu.dot_dimension_numbers<[1], [0], [0], [1], [0, 0, 1, 1], [], []>} : vector<56x32xf32>, vector<32x32xf32>, vector<56x32xf32> -> vector<56x32xf32>
    %c3_119 = arith.constant 3 : index
    %c0_120 = arith.constant 0 : index
    %c0_121 = arith.constant 0 : index
    %196 = vector.load %arg13[%c3_119, %c0_120, %c0_121] : memref<4x1x32xf32, #tpu.memory_space<vmem>>, vector<1x1x32xf32>
    %197 = vector.shape_cast %196 : vector<1x1x32xf32> to vector<1x32xf32>
    %198 = vector.broadcast %197 : vector<1x32xf32> to vector<56x32xf32>
    %199 = arith.addf %195, %198 : vector<56x32xf32>
    %200 = arith.negf %199 : vector<56x32xf32>
    %201 = math.exp %200 : vector<56x32xf32>
    %cst_122 = arith.constant 1.000000e+00 : f32
    %202 = vector.broadcast %cst_122 : f32 to vector<56x32xf32>
    %203 = arith.addf %202, %201 : vector<56x32xf32>
    %204 = arith.divf %202, %203 : vector<56x32xf32>
    %205 = arith.mulf %199, %204 : vector<56x32xf32>
    %cst_123 = arith.constant dense<0.000000e+00> : vector<8x32xf32>
    %206 = tpu.matmul %7, %205, %cst_123 {dimension_numbers = #tpu.dot_dimension_numbers<[1], [0], [0], [1], [0, 0, 1, 1], [], []>} : vector<8x56xf32>, vector<56x32xf32>, vector<8x32xf32> -> vector<8x32xf32>
    %207 = vector.extract_strided_slice %179 {offsets = [0, 64], sizes = [8, 32], strides = [1, 1]} : vector<8x96xf32> to vector<8x32xf32>
    %c3_124 = arith.constant 3 : index
    %c0_125 = arith.constant 0 : index
    %c0_126 = arith.constant 0 : index
    %208 = vector.load %arg14[%c3_124, %c0_125, %c0_126] : memref<4x32x32xf32, #tpu.memory_space<vmem>>, vector<1x32x32xf32>
    %209 = vector.shape_cast %208 : vector<1x32x32xf32> to vector<32x32xf32>
    %cst_127 = arith.constant dense<0.000000e+00> : vector<8x32xf32>
    %210 = tpu.matmul %206, %209, %cst_127 {dimension_numbers = #tpu.dot_dimension_numbers<[1], [0], [0], [1], [0, 0, 1, 1], [], []>} : vector<8x32xf32>, vector<32x32xf32>, vector<8x32xf32> -> vector<8x32xf32>
    %211 = arith.addf %207, %210 : vector<8x32xf32>
    %212 = vector.extract_strided_slice %26 {offsets = [0, 96], sizes = [8, 32], strides = [1, 1]} : vector<8x128xf32> to vector<8x32xf32>
    %213 = arith.addf %211, %212 : vector<8x32xf32>
    %214 = arith.negf %213 : vector<8x32xf32>
    %215 = math.exp %214 : vector<8x32xf32>
    %cst_128 = arith.constant 1.000000e+00 : f32
    %216 = vector.broadcast %cst_128 : f32 to vector<8x32xf32>
    %217 = arith.addf %216, %215 : vector<8x32xf32>
    %218 = arith.divf %216, %217 : vector<8x32xf32>
    %219 = arith.mulf %213, %218 : vector<8x32xf32>
    %c3_129 = arith.constant 3 : index
    %c0_130 = arith.constant 0 : index
    %c0_131 = arith.constant 0 : index
    %220 = vector.load %arg17[%c3_129, %c0_130, %c0_131] : memref<4x32x32xf32, #tpu.memory_space<vmem>>, vector<1x32x32xf32>
    %221 = vector.shape_cast %220 : vector<1x32x32xf32> to vector<32x32xf32>
    %cst_132 = arith.constant dense<0.000000e+00> : vector<8x32xf32>
    %222 = tpu.matmul %219, %221, %cst_132 {dimension_numbers = #tpu.dot_dimension_numbers<[1], [0], [0], [1], [0, 0, 1, 1], [], []>} : vector<8x32xf32>, vector<32x32xf32>, vector<8x32xf32> -> vector<8x32xf32>
    %c3_133 = arith.constant 3 : index
    %c0_134 = arith.constant 0 : index
    %c0_135 = arith.constant 0 : index
    %223 = vector.load %arg18[%c3_133, %c0_134, %c0_135] : memref<4x1x32xf32, #tpu.memory_space<vmem>>, vector<1x1x32xf32>
    %224 = vector.shape_cast %223 : vector<1x1x32xf32> to vector<1x32xf32>
    %225 = vector.broadcast %224 : vector<1x32xf32> to vector<8x32xf32>
    %226 = arith.addf %222, %225 : vector<8x32xf32>
    %c0_136 = arith.constant 0 : index
    %c0_137 = arith.constant 0 : index
    %227 = vector.load %arg19[%c0_136, %c0_137] : memref<32x32xf32, #tpu.memory_space<vmem>>, vector<32x32xf32>
    %cst_138 = arith.constant dense<0.000000e+00> : vector<8x32xf32>
    %228 = tpu.matmul %226, %227, %cst_138 {dimension_numbers = #tpu.dot_dimension_numbers<[1], [0], [0], [1], [0, 0, 1, 1], [], []>} : vector<8x32xf32>, vector<32x32xf32>, vector<8x32xf32> -> vector<8x32xf32>
    %c0_139 = arith.constant 0 : index
    %c0_140 = arith.constant 0 : index
    %229 = vector.load %arg20[%c0_139, %c0_140] : memref<1x32xf32, #tpu.memory_space<vmem>>, vector<1x32xf32>
    %230 = vector.broadcast %229 : vector<1x32xf32> to vector<8x32xf32>
    %231 = arith.addf %228, %230 : vector<8x32xf32>
    %232 = arith.negf %231 : vector<8x32xf32>
    %233 = math.exp %232 : vector<8x32xf32>
    %cst_141 = arith.constant 1.000000e+00 : f32
    %234 = vector.broadcast %cst_141 : f32 to vector<8x32xf32>
    %235 = arith.addf %234, %233 : vector<8x32xf32>
    %236 = arith.divf %234, %235 : vector<8x32xf32>
    %237 = arith.mulf %231, %236 : vector<8x32xf32>
    %c0_142 = arith.constant 0 : index
    %c0_143 = arith.constant 0 : index
    %238 = vector.load %arg21[%c0_142, %c0_143] : memref<32x32xf32, #tpu.memory_space<vmem>>, vector<32x32xf32>
    %cst_144 = arith.constant dense<0.000000e+00> : vector<8x32xf32>
    %239 = tpu.matmul %237, %238, %cst_144 {dimension_numbers = #tpu.dot_dimension_numbers<[1], [0], [0], [1], [0, 0, 1, 1], [], []>} : vector<8x32xf32>, vector<32x32xf32>, vector<8x32xf32> -> vector<8x32xf32>
    %c0_145 = arith.constant 0 : index
    %c0_146 = arith.constant 0 : index
    %240 = vector.load %arg22[%c0_145, %c0_146] : memref<1x32xf32, #tpu.memory_space<vmem>>, vector<1x32xf32>
    %241 = vector.broadcast %240 : vector<1x32xf32> to vector<8x32xf32>
    %242 = arith.addf %239, %241 : vector<8x32xf32>
    %c0_147 = arith.constant 0 : index
    %c0_148 = arith.constant 0 : index
    %c0_149 = arith.constant 0 : index
    %243 = vector.load %arg6[%c0_147, %c0_148, %c0_149] : memref<1x1x8xf32, #tpu.memory_space<vmem>>, vector<1x1x8xf32>
    %244 = vector.shape_cast %243 : vector<1x1x8xf32> to vector<1x8xf32>
    %cst_150 = arith.constant dense<0.000000e+00> : vector<1x32xf32>
    %245 = tpu.matmul %244, %242, %cst_150 {dimension_numbers = #tpu.dot_dimension_numbers<[1], [0], [0], [1], [0, 0, 1, 1], [], []>} : vector<1x8xf32>, vector<8x32xf32>, vector<1x32xf32> -> vector<1x32xf32>
    %c0_151 = arith.constant 0 : index
    %c0_152 = arith.constant 0 : index
    %246 = vector.load %arg23[%c0_151, %c0_152] : memref<32x32xf32, #tpu.memory_space<vmem>>, vector<32x32xf32>
    %cst_153 = arith.constant dense<0.000000e+00> : vector<1x32xf32>
    %247 = tpu.matmul %245, %246, %cst_153 {dimension_numbers = #tpu.dot_dimension_numbers<[1], [0], [0], [1], [0, 0, 1, 1], [], []>} : vector<1x32xf32>, vector<32x32xf32>, vector<1x32xf32> -> vector<1x32xf32>
    %c0_154 = arith.constant 0 : index
    %c0_155 = arith.constant 0 : index
    %248 = vector.load %arg24[%c0_154, %c0_155] : memref<1x32xf32, #tpu.memory_space<vmem>>, vector<1x32xf32>
    %249 = arith.addf %247, %248 : vector<1x32xf32>
    %250 = arith.negf %249 : vector<1x32xf32>
    %251 = math.exp %250 : vector<1x32xf32>
    %cst_156 = arith.constant 1.000000e+00 : f32
    %252 = vector.broadcast %cst_156 : f32 to vector<1x32xf32>
    %253 = arith.addf %252, %251 : vector<1x32xf32>
    %254 = arith.divf %252, %253 : vector<1x32xf32>
    %255 = arith.mulf %249, %254 : vector<1x32xf32>
    %c0_157 = arith.constant 0 : index
    %c0_158 = arith.constant 0 : index
    %256 = vector.load %arg25[%c0_157, %c0_158] : memref<32x128xf32, #tpu.memory_space<vmem>>, vector<32x128xf32>
    %cst_159 = arith.constant dense<0.000000e+00> : vector<1x128xf32>
    %257 = tpu.matmul %255, %256, %cst_159 {dimension_numbers = #tpu.dot_dimension_numbers<[1], [0], [0], [1], [0, 0, 1, 1], [], []>} : vector<1x32xf32>, vector<32x128xf32>, vector<1x128xf32> -> vector<1x128xf32>
    %c0_160 = arith.constant 0 : index
    %c0_161 = arith.constant 0 : index
    %258 = vector.load %arg26[%c0_160, %c0_161] : memref<1x128xf32, #tpu.memory_space<vmem>>, vector<1x128xf32>
    %259 = arith.addf %257, %258 : vector<1x128xf32>
    %c0_162 = arith.constant 0 : index
    %c0_163 = arith.constant 0 : index
    %c0_164 = arith.constant 0 : index
    %260 = vector.load %arg27[%c0_162, %c0_163, %c0_164] : memref<1x1x128xf32, #tpu.memory_space<vmem>>, vector<1x1x128xf32>
    %261 = vector.shape_cast %260 : vector<1x1x128xf32> to vector<1x128xf32>
    %262 = vector.shape_cast %259 : vector<1x128xf32> to vector<1x1x128xf32>
    tpu.vector_store %arg27[%c0_162, %c0_163, %c0_164], %262 {strides = array<i32>} : memref<1x1x128xf32, #tpu.memory_space<vmem>>, vector<1x1x128xf32>,
    return
  }
  func.func @transform_0(%arg0: i32) -> (i32, i32, i32) {
    %c0_i32 = arith.constant 0 : i32
    %c0_i32_0 = arith.constant 0 : i32
    %c0_i32_1 = arith.constant 0 : i32
    return %arg0, %c0_i32, %c0_i32_0 : i32, i32, i32
  }
  func.func @transform_1(%arg0: i32) -> (i32, i32, i32) {
    %c0_i32 = arith.constant 0 : i32
    %c0_i32_0 = arith.constant 0 : i32
    %c0_i32_1 = arith.constant 0 : i32
    return %arg0, %c0_i32, %c0_i32_0 : i32, i32, i32
  }
  func.func @transform_2(%arg0: i32) -> (i32, i32, i32) {
    %c0_i32 = arith.constant 0 : i32
    %c0_i32_0 = arith.constant 0 : i32
    %c0_i32_1 = arith.constant 0 : i32
    return %arg0, %c0_i32, %c0_i32_0 : i32, i32, i32
  }
  func.func @transform_3(%arg0: i32) -> (i32, i32, i32) {
    %c0_i32 = arith.constant 0 : i32
    %c0_i32_0 = arith.constant 0 : i32
    %c0_i32_1 = arith.constant 0 : i32
    return %arg0, %c0_i32, %c0_i32_0 : i32, i32, i32
  }
  func.func @transform_4(%arg0: i32) -> (i32, i32, i32) {
    %c0_i32 = arith.constant 0 : i32
    %c0_i32_0 = arith.constant 0 : i32
    %c0_i32_1 = arith.constant 0 : i32
    return %arg0, %c0_i32, %c0_i32_0 : i32, i32, i32
  }
  func.func @transform_5(%arg0: i32) -> (i32, i32, i32) {
    %c0_i32 = arith.constant 0 : i32
    %c0_i32_0 = arith.constant 0 : i32
    %c0_i32_1 = arith.constant 0 : i32
    return %arg0, %c0_i32, %c0_i32_0 : i32, i32, i32
  }
  func.func @transform_6(%arg0: i32) -> (i32, i32) {
    %c0_i32 = arith.constant 0 : i32
    %c0_i32_0 = arith.constant 0 : i32
    %c0_i32_1 = arith.constant 0 : i32
    return %c0_i32, %c0_i32_0 : i32, i32
  }
  func.func @transform_7(%arg0: i32) -> (i32, i32) {
    %c0_i32 = arith.constant 0 : i32
    %c0_i32_0 = arith.constant 0 : i32
    %c0_i32_1 = arith.constant 0 : i32
    return %c0_i32, %c0_i32_0 : i32, i32
  }
  func.func @transform_8(%arg0: i32) -> (i32, i32, i32) {
    %c0_i32 = arith.constant 0 : i32
    %c0_i32_0 = arith.constant 0 : i32
    %c0_i32_1 = arith.constant 0 : i32
    %c0_i32_2 = arith.constant 0 : i32
    return %c0_i32, %c0_i32_0, %c0_i32_1 : i32, i32, i32
  }
  func.func @transform_9(%arg0: i32) -> (i32, i32) {
    %c0_i32 = arith.constant 0 : i32
    %c0_i32_0 = arith.constant 0 : i32
    %c0_i32_1 = arith.constant 0 : i32
    return %c0_i32, %c0_i32_0 : i32, i32
  }
  func.func @transform_10(%arg0: i32) -> (i32, i32) {
    %c0_i32 = arith.constant 0 : i32
    %c0_i32_0 = arith.constant 0 : i32
    %c0_i32_1 = arith.constant 0 : i32
    return %c0_i32, %c0_i32_0 : i32, i32
  }
  func.func @transform_11(%arg0: i32) -> (i32, i32, i32) {
    %c0_i32 = arith.constant 0 : i32
    %c0_i32_0 = arith.constant 0 : i32
    %c0_i32_1 = arith.constant 0 : i32
    %c0_i32_2 = arith.constant 0 : i32
    return %c0_i32, %c0_i32_0, %c0_i32_1 : i32, i32, i32
  }
  func.func @transform_12(%arg0: i32) -> (i32, i32, i32) {
    %c0_i32 = arith.constant 0 : i32
    %c0_i32_0 = arith.constant 0 : i32
    %c0_i32_1 = arith.constant 0 : i32
    %c0_i32_2 = arith.constant 0 : i32
    return %c0_i32, %c0_i32_0, %c0_i32_1 : i32, i32, i32
  }
  func.func @transform_13(%arg0: i32) -> (i32, i32, i32) {
    %c0_i32 = arith.constant 0 : i32
    %c0_i32_0 = arith.constant 0 : i32
    %c0_i32_1 = arith.constant 0 : i32
    %c0_i32_2 = arith.constant 0 : i32
    return %c0_i32, %c0_i32_0, %c0_i32_1 : i32, i32, i32
  }
  func.func @transform_14(%arg0: i32) -> (i32, i32) {
    %c0_i32 = arith.constant 0 : i32
    %c0_i32_0 = arith.constant 0 : i32
    %c0_i32_1 = arith.constant 0 : i32
    return %c0_i32, %c0_i32_0 : i32, i32
  }
  func.func @transform_15(%arg0: i32) -> (i32, i32) {
    %c0_i32 = arith.constant 0 : i32
    %c0_i32_0 = arith.constant 0 : i32
    %c0_i32_1 = arith.constant 0 : i32
    return %c0_i32, %c0_i32_0 : i32, i32
  }
  func.func @transform_16(%arg0: i32) -> (i32, i32, i32) {
    %c0_i32 = arith.constant 0 : i32
    %c0_i32_0 = arith.constant 0 : i32
    %c0_i32_1 = arith.constant 0 : i32
    %c0_i32_2 = arith.constant 0 : i32
    return %c0_i32, %c0_i32_0, %c0_i32_1 : i32, i32, i32
  }
  func.func @transform_17(%arg0: i32) -> (i32, i32, i32) {
    %c0_i32 = arith.constant 0 : i32
    %c0_i32_0 = arith.constant 0 : i32
    %c0_i32_1 = arith.constant 0 : i32
    %c0_i32_2 = arith.constant 0 : i32
    return %c0_i32, %c0_i32_0, %c0_i32_1 : i32, i32, i32
  }
  func.func @transform_18(%arg0: i32) -> (i32, i32) {
    %c0_i32 = arith.constant 0 : i32
    %c0_i32_0 = arith.constant 0 : i32
    %c0_i32_1 = arith.constant 0 : i32
    return %c0_i32, %c0_i32_0 : i32, i32
  }
  func.func @transform_19(%arg0: i32) -> (i32, i32) {
    %c0_i32 = arith.constant 0 : i32
    %c0_i32_0 = arith.constant 0 : i32
    %c0_i32_1 = arith.constant 0 : i32
    return %c0_i32, %c0_i32_0 : i32, i32
  }
  func.func @transform_20(%arg0: i32) -> (i32, i32) {
    %c0_i32 = arith.constant 0 : i32
    %c0_i32_0 = arith.constant 0 : i32
    %c0_i32_1 = arith.constant 0 : i32
    return %c0_i32, %c0_i32_0 : i32, i32
  }
  func.func @transform_21(%arg0: i32) -> (i32, i32) {
    %c0_i32 = arith.constant 0 : i32
    %c0_i32_0 = arith.constant 0 : i32
    %c0_i32_1 = arith.constant 0 : i32
    return %c0_i32, %c0_i32_0 : i32, i32
  }
  func.func @transform_22(%arg0: i32) -> (i32, i32) {
    %c0_i32 = arith.constant 0 : i32
    %c0_i32_0 = arith.constant 0 : i32
    %c0_i32_1 = arith.constant 0 : i32
    return %c0_i32, %c0_i32_0 : i32, i32
  }
  func.func @transform_23(%arg0: i32) -> (i32, i32) {
    %c0_i32 = arith.constant 0 : i32
    %c0_i32_0 = arith.constant 0 : i32
    %c0_i32_1 = arith.constant 0 : i32
    return %c0_i32, %c0_i32_0 : i32, i32
  }
  func.func @transform_24(%arg0: i32) -> (i32, i32) {
    %c0_i32 = arith.constant 0 : i32
    %c0_i32_0 = arith.constant 0 : i32
    %c0_i32_1 = arith.constant 0 : i32
    return %c0_i32, %c0_i32_0 : i32, i32
  }
  func.func @transform_25(%arg0: i32) -> (i32, i32) {
    %c0_i32 = arith.constant 0 : i32
    %c0_i32_0 = arith.constant 0 : i32
    %c0_i32_1 = arith.constant 0 : i32
    return %c0_i32, %c0_i32_0 : i32, i32
  }
  func.func @transform_26(%arg0: i32) -> (i32, i32, i32) {
    %c0_i32 = arith.constant 0 : i32
    %c0_i32_0 = arith.constant 0 : i32
    %c0_i32_1 = arith.constant 0 : i32
    return %arg0, %c0_i32, %c0_i32_0 : i32, i32, i32
  }
}

</mosaic_0001>

<bundles_post_ra>
// kernel: mul.7
= control target key start
LH: loop header
LB: loop body
LE: loop exit
PB: predicated region body
PF: predicated region fallthrough
CT: control target
= control target key end

     0   :  { %vm7_vm0 = vcmask 457728   ;;  %s39_s0 = inlined_call_operand.vmem [shape: f32[112], index: 0, kind: input, shape index: {}]   ;;  %s40_s1 = inlined_call_operand.vmem [shape: f32[2,56], index: 1, kind: output, shape index: {}]  }
   0x1   :  { %v4_v0 = vld [vmem:[%s39_s0] sm:$0x1]  ;;  %s22_s0 = smov 72  }
   0x2   :  { %5 = vst [vmem:[#allocation1] sm:$0x1] %v4_v0 }
   0x9   :  { %v9_v1 = vld [vmem:[#allocation1] sm:$0x1]  }
   0xa   :  { %v6_v2 = vld [vmem:[#allocation1] sm:$0x1]   ;;  %10 = vrot.lane.b32.xlu0 %v9_v1, %s22_s0 }
   0xb   :  { %8 = vst.msk [vmem:[#allocation0] sm:$0x1] %vm7_vm0, %v6_v2  }
  0x7c   :  { %v11_v3 = vpop.permute.xlu0 %10  }
  0x7d   :  { %14 = vst.msk [vmem:[#allocation0 + $0x1] sm:$0x1] %vm7_vm0, %v11_v3  }
  0x84   :  { %v18_v4 = vld [vmem:[#allocation0] sm:$0x3] }
  0x85   :  { %20 = vst [vmem:[%s40_s1] sm:$0x3] %v18_v4 }

// kernel: egnn_forward_pallas.1
= control target key start
LH: loop header
LB: loop body
LE: loop exit
PB: predicated region body
PF: predicated region fallthrough
CT: control target
= control target key end

     0   :  { %s6461_s27 = smov 0   ;;  %s7465_s0 = inlined_call_operand.vmem [shape: f32[2,8,8], index: 0, kind: input, shape index: {}]   ;;  %s7466_s1 = inlined_call_operand.vmem [shape: f32[2,56,1], index: 1, kind: input, shape index: {}]   ;;  %s7467_s2 = inlined_call_operand.vmem [shape: f32[2,56,8], index: 2, kind: input, shape index: {}]   ;;  %s7468_s3 = inlined_call_operand.vmem [shape: f32[2,56,8], index: 3, kind: input, shape index: {}]   ;;  %s7469_s4 = inlined_call_operand.vmem [shape: f32[2,8,56], index: 4, kind: input, shape index: {}]   ;;  %s7470_s5 = inlined_call_operand.vmem [shape: f32[2,1,8], index: 5, kind: input, shape index: {}]   ;;  %s7471_s6 = inlined_call_operand.vmem [shape: f32[8,32], index: 6, kind: input, shape index: {}]   ;;  %s7472_s7 = inlined_call_operand.vmem [shape: f32[1,32], index: 7, kind: input, shape index: {}]   ;;  %s7473_s8 = inlined_call_operand.vmem [shape: f32[4,32,96], index: 8, kind: input, shape index: {}]   ;;  %s7474_s9 = inlined_call_operand.vmem [shape: f32[1,128], index: 9, kind: input, shape index: {}]   ;;  %s7475_s10 = inlined_call_operand.vmem [shape: f32[1,128], index: 10, kind: input, shape index: {}]   ;;  %s7476_s11 = inlined_call_operand.vmem [shape: f32[4,32,32], index: 11, kind: input, shape index: {}]   ;;  %s7477_s12 = inlined_call_operand.vmem [shape: f32[4,1,32], index: 12, kind: input, shape index: {}]   ;;  %s7478_s13 = inlined_call_operand.vmem [shape: f32[4,32,32], index: 13, kind: input, shape index: {}]   ;;  %s7479_s14 = inlined_call_operand.vmem [shape: f32[8,128], index: 14, kind: input, shape index: {}]   ;;  %s7480_s15 = inlined_call_operand.vmem [shape: f32[1,128], index: 15, kind: input, shape index: {}]   ;;  %s7481_s16 = inlined_call_operand.vmem [shape: f32[4,32,32], index: 16, kind: input, shape index: {}]   ;;  %s7482_s17 = inlined_call_operand.vmem [shape: f32[4,1,32], index: 17, kind: input, shape index: {}]   ;;  %s7483_s18 = inlined_call_operand.vmem [shape: f32[32,32], index: 18, kind: input, shape index: {}]   ;;  %s7484_s19 = inlined_call_operand.vmem [shape: f32[1,32], index: 19, kind: input, shape index: {}]   ;;  %s7485_s20 = inlined_call_operand.vmem [shape: f32[32,32], index: 20, kind: input, shape index: {}]   ;;  %s7486_s21 = inlined_call_operand.vmem [shape: f32[1,32], index: 21, kind: input, shape index: {}]   ;;  %s7487_s22 = inlined_call_operand.vmem [shape: f32[32,32], index: 22, kind: input, shape index: {}]   ;;  %s7488_s23 = inlined_call_operand.vmem [shape: f32[1,32], index: 23, kind: input, shape index: {}]   ;;  %s7489_s24 = inlined_call_operand.vmem [shape: f32[32,128], index: 24, kind: input, shape index: {}]   ;;  %s7490_s25 = inlined_call_operand.vmem [shape: f32[1,128], index: 25, kind: input, shape index: {}]   ;;  %s7491_s26 = inlined_call_operand.vmem [shape: f32[2,1,128], index: 26, kind: output, shape index: {}]  }
   0x1   :  { %7497 = sst [smem:[#allocation2_spill]] %s7465_s0 }
   0x2   :  { %7498 = sst [smem:[#allocation3_spill]] %s7466_s1 }
   0x3   :  { %7499 = sst [smem:[#allocation4_spill]] %s7467_s2 }
   0x4   :  { %7500 = sst [smem:[#allocation5_spill]] %s7468_s3 }
   0x5   :  { %7501 = sst [smem:[#allocation6_spill]] %s7469_s4 }
   0x6   :  { %7502 = sst [smem:[#allocation7_spill]] %s7470_s5 }
   0x7   :  { %7503 = sst [smem:[#allocation8_spill]] %s7471_s6 }
   0x8   :  { %7504 = sst [smem:[#allocation9_spill]] %s7472_s7 }
   0x9   :  { %7505 = sst [smem:[#allocation10_spill]] %s7473_s8 }
   0xa   :  { %7506 = sst [smem:[#allocation11_spill]] %s7474_s9 }
   0xb   :  { %7507 = sst [smem:[#allocation12_spill]] %s7475_s10 }
   0xc   :  { %7508 = sst [smem:[#allocation13_spill]] %s7479_s14 }
   0xd LB: > { %s4840_s3 = sadd.s32 4294967295, %s6317_s27   ;;  %p4844_p0 = scmp.ge.s32.totalorder %s6317_s27, 1  ;;  %s6317_s27 = sphi %s6461_s27, %s36_s27  }
   0xe   : > { %p758_p1 = scmp.lt.s32.totalorder %s6317_s27, 3 }
  0x10   : > { %p759_p2 = pnand %p4844_p0, %p758_p1 }
  0x11   : > { %s7509_s8 = sld [smem:[#allocation8_spill]] (!%p759_p2)  ;;  %p847_p3 = scmp.lt.s32.totalorder (!%p759_p2), %s4840_s3, 1  ;;  %v6319_v1 = vmov (!%p759_p2), 0.0   ;;  %vm6320_vm0 = vmmov (!%p759_p2), 0   ;;  %v6321_v4 = vmov (!%p759_p2), 0.0|0.0   ;;  %vm900_vm1 = vcmask (!%p759_p2), 64512  }
  0x12   : > { %762 = sbr.rel (%p759_p2) target bundleno = 8333 (0x208d), region = 124  ;;  %5315 = vmatprep.subr.mxu0 (!%p759_p2), %v6319_v1  ;;  %5317 = vmatprep.mubr.msk.f32.mxu0 (!%p759_p2), %vm6320_vm0, %v6319_v1  ;;  %s7510_s0 = sld [smem:[#allocation10_spill]] (!%p759_p2)  ;;  %vm1126_vm2 = vcmask (!%p759_p2), 261120   ;;  %v6323_v21 = vmov (!%p759_p2), 0   ;;  %v4854_v32 = vld [vmem:[%s7480_s15] ss:$0 sm:$0xff] (!%p759_p2) }
  0x13   : > { %5320 = vmatprep.subr.mxu1 (!%p759_p2), %v6319_v1  ;;  %5322 = vmatprep.mubr.msk.f32.mxu1 (!%p759_p2), %vm6320_vm0, %v6319_v1  ;;  %s7511_s6 = sld [smem:[#allocation2_spill]] (!%p759_p2)  ;;  %s7512_s30 = sld [smem:[#allocation9_spill]] (!%p759_p2)  ;;  %v1502_v50 = vld [vmem:[%s7476_s11] sm:$0xff] (!%p759_p2)  ;;  %v1503_v51 = vld [vmem:[%s7476_s11 + $0x8] sm:$0xff] (!%p759_p2)  ;;  %v1504_v55 = vld [vmem:[%s7476_s11 + $0x10] sm:$0xff] (!%p759_p2)  ;;  %vm1683_vm3 = vcmask (!%p759_p2), 457728  }
  0x14   : > { %s7513_s14 = sld [smem:[#allocation13_spill]] (!%p759_p2)  ;;  %s7514_s28 = sld [smem:[#allocation4_spill]] (!%p759_p2)  ;;  %6047 = vset.pattern.permute.xlu1 (!%p759_p2), %v6323_v21  ;;  %6046 = vset.pattern.permute.xlu0 (!%p759_p2), %v6323_v21  ;;  %v5881_v52 = vpack.c.bf16 (!%p759_p2), %v1503_v51, %v1502_v50  ;;  %v1505_v56 = vld [vmem:[%s7476_s11 + $0x18] sm:$0xff] (!%p759_p2) }
  0x15   : > { %s7493_s4 = smov (!%p759_p2), 96   ;;  %s6324_s7 = smov (!%p759_p2), 64   ;;  %v5884_v57 = vpack.c.bf16 (!%p759_p2), %v1505_v56, %v1504_v55 }
  0x16   : > { %s7516_s9 = sld [smem:[#allocation5_spill]] (!%p759_p2)  ;;  %s7517_s10 = sld [smem:[#allocation11_spill]] (!%p759_p2) }
  0x17   : > { %v892_v0 = vld [vmem:[%s7509_s8] sm:$0xff] (!%p759_p2)  ;;  %s7521_s29 = smov (!%p759_p2), 32  }
  0x18   : > { %v1122_v2 = vld [vmem:[%s7510_s0] sm:$0xff] (!%p759_p2)  ;;  %v1123_v3 = vld [vmem:[%s7510_s0 + $0x8] sm:$0xff] (!%p759_p2)  ;;  %5316 = vmatpush3.msra.mxu0 (!%p759_p2), %v892_v0  ;;  %v1124_v7 = vld [vmem:[%s7510_s0 + $0x10] sm:$0xff] (!%p759_p2) }
  0x19   : > { %s7524_s3 = smov (!%p847_p3, %s4840_s3), 1  ;;  %5874 = vmatprep.subr.bf16.mxu0 %v6321_v4  ;;  %v5875_v5 = vpack.c.bf16 %v1123_v3, %v1122_v2  ;;  %v1125_v8 = vld [vmem:[%s7510_s0 + $0x18] sm:$0xff]  ;;  %v4850_v10 = vld [vmem:[%s7512_s30] ss:$0 sm:$0xff]  ;;  %s7515_s30 = sld [smem:[#allocation3_spill]] }
  0x1a   : > { %s4845_s2 = sshll.u32 %s7524_s3, 3  ;;  %v5878_v9 = vpack.c.bf16 %v1125_v8, %v1124_v7  ;;  %v1044_v14 = vld [vmem:[%s7513_s14] sm:$0xff] }
  0x1b   : > { %s850_s1 = scalar_lea.vmem %s7511_s6, %s4845_s2  ;;  %5321 = vmatpush3.msra.mxu1 %v1044_v14  ;;  %s6518_s6 = smul.u32 56, %s7524_s3 }
  0x1c   : > { %v876_v6 = vld [vmem:[%s850_s1] sm:$0xff]  ;;  %5336 = vmatprep.subr.mxu1 %v6319_v1 }
  0x1d   : > { %5318 = vmatmul.mubr.msk.f32.vlgmr.msra.gmra.mrb[0].mxu0 %vm900_vm1, %v876_v6  ;;  %5323 = vmatmul.mubr.msk.f32.vlgmr.msra.gmra.mrb[0].mxu1 %vm900_vm1, %v876_v6  ;;  %s6524_s8 = scalar_lea.vmem %s7514_s28, %s6518_s6  ;;  %v4852_v0 = vld [vmem:[%s7517_s10] ss:$0 sm:$0xff]  ;;  %s7518_s28 = sld [smem:[#allocation12_spill]] }
  0x1e   : > { %5876 = vmatpush3.bf16.msra.mxu0 %v5875_v5  ;;  %5333 = vmatprep.mubr.msk.f32.mxu0 %vm6320_vm0, %v6319_v1  ;;  %v6527_v15 = vld [vmem:[%s6524_s8] sm:$0xff]  ;;  %v6540_v18 = vld [vmem:[%s6524_s8 + $0x8] sm:$0xff]  ;;  %v6547_v19 = vld [vmem:[%s6524_s8 + $0x10] sm:$0xff]  ;;  %s7519_s10 = sld [smem:[#allocation6_spill]] }
  0x1f   : > { %5877 = vmatprep.subr.bf16.mxu0 %v6321_v4  ;;  %5338 = vmatprep.mubr.msk.f32.mxu1 %vm6320_vm0, %v6319_v1  ;;  %v6554_v20 = vld [vmem:[%s6524_s8 + $0x18] sm:$0xff]  ;;  %s855_s5 = scalar_lea.vmem %s7515_s30, %s6518_s6  ;;  %v6565_v24 = vld [vmem:[%s6524_s8 + $0x20] sm:$0xff]  ;;  %v6572_v27 = vld [vmem:[%s6524_s8 + $0x28] sm:$0xff]  ;;  %s6596_s30 = scalar_lea.vmem %s7516_s9, %s6518_s6 }
  0x20   : > { %v975_v22 = vld [vmem:[%s855_s5 + $0x8] sm:$0xff]  ;;  %v974_v23 = vld [vmem:[%s855_s5] sm:$0xff]  ;;  %v976_v25 = vld [vmem:[%s855_s5 + $0x10] sm:$0xff] }
  0x21   : > { %989 = vperm.xlu1 %6047, %v975_v22   ;;  %v978_v26 = vld [vmem:[%s855_s5 + $0x20] sm:$0xff]  ;;  %v977_v28 = vld [vmem:[%s855_s5 + $0x18] sm:$0xff]  ;;  %v980_v29 = vld [vmem:[%s855_s5 + $0x30] sm:$0xff] }
  0x22   : > { %5879 = vmatpush3.bf16.msra.mxu0 %v5878_v9  ;;  %v6579_v30 = vld [vmem:[%s6524_s8 + $0x30] sm:$0xff]  ;;  %v979_v31 = vld [vmem:[%s855_s5 + $0x28] sm:$0xff]  ;;  %v6599_v36 = vld [vmem:[%s6596_s30] sm:$0xff]  ;;  %s7522_s5 = sld [smem:[#allocation7_spill]] }
  0x23   : > { %5359 = vmatprep.subr.mxu0 %v6319_v1  ;;  %v6607_v38 = vld [vmem:[%s6596_s30 + $0x8] sm:$0xff]  ;;  %v6614_v39 = vld [vmem:[%s6596_s30 + $0x10] sm:$0xff]  ;;  %v6621_v40 = vld [vmem:[%s6596_s30 + $0x18] sm:$0xff] }
  0x24   : > { %v6628_v41 = vld [vmem:[%s6596_s30 + $0x20] sm:$0xff]  ;;  %v6635_v42 = vld [vmem:[%s6596_s30 + $0x28] sm:$0xff]  ;;  %v6642_v43 = vld [vmem:[%s6596_s30 + $0x30] sm:$0xff]  ;;  %s6735_s1 = scalar_lea.vmem %s7519_s10, %s4845_s2 }
  0x25   : > { %994 = vperm.xlu1 %6047, %v976_v25   ;;  %v4853_v5 = vld [vmem:[%s7518_s28] ss:$0 sm:$0xff]  ;;  %s7495_s28 = smov 32  }
  0x28   : > { %s872_s10 = scalar_lea.vmem %s7522_s5, %s7524_s3 }
  0x29   : > { %999 = vperm.xlu1 %6047, %v977_v28  }
  0x2d   : > { %1009 = vperm.xlu1 %6047, %v979_v31  }
  0xa0   : > { %v990_v6 = vpop.permute.xlu1 %989 }
  0xa1   : > { %v1024_v7 = vmul.f32 %v4852_v0, %v990_v6 }
  0xf0   : > { %v970_v11 = vpop.f32.mrb[0].mxu0  ;;  %v1118_v33 = vpop.f32.mrb[0].mxu1 }
  0xf1   : > { %v971_v12 = vadd.f32 %v4850_v10, %v970_v11  ;;  %v5319_v13 = vpop.f32.mrb[1].mxu0  ;;  %v6588_v34 = vadd.f32 %v4854_v32, %v1118_v33  ;;  %v5324_v35 = vpop.f32.mrb[1].mxu1 }
  0xf2   : > { %v6672_v13 = vadd.f32 %v4853_v5, %v1024_v7 }
  0xf3   : > { %5334 = vmatmul.mubr.msk.f32.vlgmr.msra.gmra.mrb[2].mxu0 %vm1126_vm2, %v971_v12  ;;  %v995_v12 = vpop.permute.xlu1 %994 }
  0xf4   : > { %5361 = vmatprep.mubr.msk.f32.mxu0 %vm6320_vm0, %v6319_v1  ;;  %v1025_v21 = vmul.f32 %v4852_v0, %v995_v12 }
  0xf6   : > { %v6681_v31 = vadd.f32 %v4853_v5, %v1025_v21 }
  0xf7   : > { %v1000_v28 = vpop.permute.xlu1 %999 }
  0xf8   : > { %v1026_v32 = vmul.f32 %v4852_v0, %v1000_v28 }
 0x1c6   : > { %v6529_v16 = vpop.f32.mrb[2].mxu0 }
 0x1c7   : > { %1201 = vrot.lane.b32.xlu0 %v6529_v16, %s7493_s4  ;;  %v5335_v17 = vpop.f32.mrb[3].mxu0  ;;  %5360 = vmatpush3.msra.mxu0 %v6529_v16  ;;  %s7520_s4 = smov 96  }
 0x1c8   : > { %5362 = vmatmul.mubr.msk.f32.vlgmr.msra.gmra.mrb[4].mxu0 %vm900_vm1, %v6527_v15  ;;  %5886 = vmatprep.subr.bf16.mxu0 %v6321_v4 }
 0x1c9   : > { %5364 = vmatprep.mubr.msk.f32.mxu0 %vm6320_vm0, %v6319_v1 }
 0x1cb   : > { %984 = vperm.xlu0 %6046, %v974_v23  }
 0x1cc   : > { %5365 = vmatmul.mubr.msk.f32.gmra.mrb[6].mxu0 %vm900_vm1, %v6540_v18 }
 0x1cd   : > { %5367 = vmatprep.mubr.msk.f32.mxu0 %vm6320_vm0, %v6319_v1 }
 0x1cf   : > { %1004 = vperm.xlu0 %6046, %v978_v26  }
 0x1d0   : > { %5368 = vmatmul.mubr.msk.f32.gmra.mrb[8].mxu0 %vm900_vm1, %v6547_v19 }
 0x1d1   : > { %5370 = vmatprep.mubr.msk.f32.mxu0 %vm6320_vm0, %v6319_v1 }
 0x1d3   : > { %1014 = vperm.xlu0 %6046, %v980_v29  }
 0x1d4   : > { %5371 = vmatmul.mubr.msk.f32.gmra.mrb[10].mxu0 %vm900_vm1, %v6554_v20 }
 0x1d5   : > { %5373 = vmatprep.mubr.msk.f32.mxu0 %vm6320_vm0, %v6319_v1 }
 0x1d7   : > { %1840 = vrot.lane.b32.xlu0 %v6588_v34, %s6324_s7 }
 0x1d8   : > { %5374 = vmatmul.mubr.msk.f32.gmra.mrb[12].mxu0 %vm900_vm1, %v6565_v24 }
 0x1d9   : > { %5376 = vmatprep.mubr.msk.f32.mxu0 %vm6320_vm0, %v6319_v1 }
 0x1dc   : > { %5377 = vmatmul.mubr.msk.f32.gmra.mrb[14].mxu0 %vm900_vm1, %v6572_v27 }
 0x1dd   : > { %5379 = vmatprep.mubr.msk.f32.mxu0 %vm6320_vm0, %v6319_v1 }
 0x1e0   : > { %5380 = vmatmul.mubr.msk.f32.gmra.mrb[16].mxu0 %vm900_vm1, %v6579_v30 }
 0x1e1   : > { %5425 = vmatprep.mubr.msk.f32.mxu0 %vm6320_vm0, %v6319_v1 }
 0x239   : > { %v1202_v37 = vpop.permute.xlu0 %1201 }
 0x23a   : > { %5337 = vmatpush3.msra.mxu1 %v1202_v37 }
 0x23b   : > { %5339 = vmatmul.mubr.msk.f32.vlgmr.msra.gmra.mrb[2].mxu1 %vm900_vm1, %v6599_v36  ;;  %5880 = vmatprep.subr.bf16.mxu1 %v6321_v4 }
 0x23c   : > { %5341 = vmatprep.mubr.msk.f32.mxu1 %vm6320_vm0, %v6319_v1  ;;  %5882 = vmatpush3.bf16.msra.mxu1 %v5881_v52 }
 0x23d   : > { %5883 = vmatprep.subr.bf16.mxu1 %v6321_v4 }
 0x23f   : > { %5342 = vmatmul.mubr.msk.f32.gmra.mrb[4].mxu1 %vm900_vm1, %v6607_v38 }
 0x240   : > { %5344 = vmatprep.mubr.msk.f32.mxu1 %vm6320_vm0, %v6319_v1  ;;  %5885 = vmatpush3.bf16.msra.mxu1 %v5884_v57 }
 0x241   : > { %5907 = vmatprep.subr.bf16.mxu1 %v6321_v4 }
 0x243   : > { %5345 = vmatmul.mubr.msk.f32.gmra.mrb[6].mxu1 %vm900_vm1, %v6614_v39 }
 0x244   : > { %5347 = vmatprep.mubr.msk.f32.mxu1 %vm6320_vm0, %v6319_v1 }
 0x247   : > { %5348 = vmatmul.mubr.msk.f32.gmra.mrb[8].mxu1 %vm900_vm1, %v6621_v40 }
 0x248   : > { %5350 = vmatprep.mubr.msk.f32.mxu1 %vm6320_vm0, %v6319_v1 }
 0x24a   : > { %v985_v2 = vpop.permute.xlu0 %984 }
 0x24b   : > { %5351 = vmatmul.mubr.msk.f32.gmra.mrb[10].mxu1 %vm900_vm1, %v6628_v41  ;;  %v1023_v3 = vmul.f32 %v4852_v0, %v985_v2 }
 0x24c   : > { %5353 = vmatprep.mubr.msk.f32.mxu1 %vm6320_vm0, %v6319_v1 }
 0x24d   : > { %v6670_v8 = vadd.f32 %v4853_v5, %v1023_v3 }
 0x24f   : > { %5354 = vmatmul.mubr.msk.f32.gmra.mrb[12].mxu1 %vm900_vm1, %v6635_v42 }
 0x250   : > { %5356 = vmatprep.mubr.msk.f32.mxu1 %vm6320_vm0, %v6319_v1 }
 0x253   : > { %5357 = vmatmul.mubr.msk.f32.gmra.mrb[14].mxu1 %vm900_vm1, %v6642_v43 }
 0x254   : > { %5390 = vmatprep.mubr.msk.f32.mxu1 %vm6320_vm0, %v6319_v1 }
 0x29b   : > { %v1412_v44 = vpop.f32.mrb[4].mxu0 }
 0x29c   : > { %v5363_v45 = vpop.f32.mrb[5].mxu0 }
 0x29d   : > { %v1005_v45 = vpop.permute.xlu0 %1004 }
 0x29f   : > { %v1417_v46 = vpop.f32.mrb[6].mxu0 }
 0x2a0   : > { %v5366_v47 = vpop.f32.mrb[7].mxu0 }
 0x2a1   : > { %v1027_v47 = vmul.f32 %v4852_v0, %v1005_v45  ;;  %v1015_v3 = vpop.permute.xlu0 %1014 }
 0x2a3   : > { %v1422_v48 = vpop.f32.mrb[8].mxu0  ;;  %v6691_v57 = vadd.f32 %v4853_v5, %v1027_v47 }
 0x2a4   : > { %v5369_v49 = vpop.f32.mrb[9].mxu0 }
 0x2a5   : > { %v6687_v49 = vadd.f32 %v4853_v5, %v1026_v32 }
 0x2a7   : > { %v1427_v53 = vpop.f32.mrb[10].mxu0 }
 0x2a8   : > { %v5372_v54 = vpop.f32.mrb[11].mxu0 }
 0x2a9   : > { %v1010_v54 = vpop.permute.xlu1 %1009 }
 0x2ab   : > { %v1432_v58 = vpop.f32.mrb[12].mxu0 }
 0x2ac   : > { %v5375_v59 = vpop.f32.mrb[13].mxu0 }
 0x2ad   : > { %v1028_v59 = vmul.f32 %v4852_v0, %v1010_v54 }
 0x2af   : > { %v1437_v60 = vpop.f32.mrb[14].mxu0 }
 0x2b0   : > { %v5378_v61 = vpop.f32.mrb[15].mxu0 }
 0x2b3   : > { %v6662_v62 = vpop.f32.mrb[16].mxu0 }
 0x2b4   : > { %v5381_v63 = vpop.f32.mrb[17].mxu0 }
 0x30e   : > { %v1291_v9 = vpop.f32.mrb[2].mxu1 }
 0x30f   : > { %v1413_v10 = vadd.f32 %v1412_v44, %v1291_v9  ;;  %v5340_v11 = vpop.f32.mrb[3].mxu1 }
 0x310   : > { %v6694_v11 = vadd.f32 %v4853_v5, %v1028_v59 }
 0x311   : > { %v6675_v14 = vadd.f32 %v1413_v10, %v6670_v8  ;;  %v1029_v10 = vmul.f32 %v4852_v0, %v1015_v3 }
 0x312   : > { %v1296_v17 = vpop.f32.mrb[4].mxu1 }
 0x313   : > { %v4871_v22 = vmul.f32 -1.442695, %v6675_v14  ;;  %v1418_v23 = vadd.f32 %v1417_v46, %v1296_v17  ;;  %v5343_v25 = vpop.f32.mrb[5].mxu1  ;;  %v6697_v28 = vadd.f32 %v4853_v5, %v1029_v10 }
 0x315   : > { %6048 = vpow2.f32 %v4871_v22  ;;  %v6679_v26 = vadd.f32 %v1418_v23, %v6672_v13 }
 0x316   : > { %v1301_v29 = vpop.f32.mrb[6].mxu1 }
 0x317   : > { %v4872_v33 = vmul.f32 -1.442695, %v6679_v26  ;;  %v1423_v35 = vadd.f32 %v1422_v48, %v1301_v29  ;;  %v5346_v37 = vpop.f32.mrb[7].mxu1 }
 0x319   : > { %6050 = vpow2.f32 %v4872_v33  ;;  %v6685_v44 = vadd.f32 %v1423_v35, %v6681_v31 }
 0x31a   : > { %v1306_v46 = vpop.f32.mrb[8].mxu1 }
 0x31b   : > { %v4873_v50 = vmul.f32 -1.442695, %v6685_v44  ;;  %v1428_v51 = vadd.f32 %v1427_v53, %v1306_v46  ;;  %v5349_v52 = vpop.f32.mrb[9].mxu1 }
 0x31d   : > { %6052 = vpow2.f32 %v4873_v50  ;;  %v1449_v55 = vadd.f32 %v1428_v51, %v6687_v49 }
 0x31e   : > { %v1311_v56 = vpop.f32.mrb[10].mxu1 }
 0x31f   : > { %v6049_v48 = vpop.eup %6048  ;;  %v4874_v61 = vmul.f32 -1.442695, %v1449_v55  ;;  %v1433_v63 = vadd.f32 %v1432_v58, %v1311_v56  ;;  %v5352_v2 = vpop.f32.mrb[11].mxu1 }
 0x320   : > { %v1474_v6 = vadd.f32 1.0, %v6049_v48 }
 0x321   : > { %6054 = vpow2.f32 %v4874_v61  ;;  %v1450_v7 = vadd.f32 %v1433_v63, %v6691_v57 }
 0x322   : > { %6056 = vrcp.f32 %v1474_v6  ;;  %v1316_v53 = vpop.f32.mrb[12].mxu1 }
 0x323   : > { %v6051_v9 = vpop.eup %6050  ;;  %v4875_v12 = vmul.f32 -1.442695, %v1450_v7  ;;  %v1438_v17 = vadd.f32 %v1437_v60, %v1316_v53  ;;  %v5355_v21 = vpop.f32.mrb[13].mxu1 }
 0x324   : > { %v1475_v22 = vadd.f32 1.0, %v6051_v9 }
 0x325   : > { %6058 = vpow2.f32 %v4875_v12  ;;  %v1451_v23 = vadd.f32 %v1438_v17, %v6694_v11 }
 0x326   : > { %6060 = vrcp.f32 %v1475_v22  ;;  %v1321_v58 = vpop.f32.mrb[14].mxu1 }
 0x327   : > { %v6053_v25 = vpop.eup %6052  ;;  %v4876_v29 = vmul.f32 -1.442695, %v1451_v23  ;;  %v1443_v32 = vadd.f32 %v6662_v62, %v1321_v58  ;;  %v5358_v33 = vpop.f32.mrb[15].mxu1 }
 0x328   : > { %v1476_v35 = vadd.f32 1.0, %v6053_v25 }
 0x329   : > { %6062 = vpow2.f32 %v4876_v29  ;;  %v1452_v0 = vadd.f32 %v1443_v32, %v6697_v28 }
 0x32a   : > { %6064 = vrcp.f32 %v1476_v35 }
 0x32b   : > { %v6055_v60 = vpop.eup %6054  ;;  %v4877_v37 = vmul.f32 -1.442695, %v1452_v0 }
 0x32c   : > { %v6057_v45 = vpop.eup %6056  ;;  %v1477_v46 = vadd.f32 1.0, %v6055_v60 }
 0x32d   : > { %v1495_v47 = vmul.f32 %v6057_v45, %v6675_v14  ;;  %6066 = vpow2.f32 %v4877_v37 }
 0x32e   : > { %6068 = vrcp.f32 %v1477_v46 }
 0x32f   : > { %v6059_v50 = vpop.eup %6058  ;;  %5391 = vmatmul.mubr.msk.f32.vlgmr.msra.gmra.mrb[16].mxu1 %vm1126_vm2, %v1495_v47 }
 0x330   : > { %v6061_v5 = vpop.eup %6060  ;;  %v1478_v51 = vadd.f32 1.0, %v6059_v50  ;;  %5393 = vmatprep.mubr.msk.f32.mxu1 %vm6320_vm0, %v6319_v1 }
 0x331   : > { %v1496_v62 = vmul.f32 %v6061_v5, %v6679_v26 }
 0x332   : > { %6070 = vrcp.f32 %v1478_v51 }
 0x333   : > { %v6063_v52 = vpop.eup %6062  ;;  %5394 = vmatmul.mubr.msk.f32.gmra.mrb[18].mxu1 %vm1126_vm2, %v1496_v62 }
 0x334   : > { %v6065_v54 = vpop.eup %6064  ;;  %v1479_v56 = vadd.f32 1.0, %v6063_v52  ;;  %5396 = vmatprep.mubr.msk.f32.mxu1 %vm6320_vm0, %v6319_v1 }
 0x335   : > { %v1497_v14 = vmul.f32 %v6065_v54, %v6685_v44 }
 0x336   : > { %6072 = vrcp.f32 %v1479_v56 }
 0x337   : > { %v6067_v48 = vpop.eup %6066  ;;  %5397 = vmatmul.mubr.msk.f32.gmra.mrb[20].mxu1 %vm1126_vm2, %v1497_v14 }
 0x338   : > { %v6069_v59 = vpop.eup %6068  ;;  %v1480_v61 = vadd.f32 1.0, %v6067_v48  ;;  %5399 = vmatprep.mubr.msk.f32.mxu1 %vm6320_vm0, %v6319_v1 }
 0x339   : > { %v1498_v26 = vmul.f32 %v6069_v59, %v1449_v55 }
 0x33a   : > { %6074 = vrcp.f32 %v1480_v61 }
 0x33b   : > { %5400 = vmatmul.mubr.msk.f32.gmra.mrb[22].mxu1 %vm1126_vm2, %v1498_v26 }
 0x33c   : > { %v6071_v63 = vpop.eup %6070  ;;  %5402 = vmatprep.mubr.msk.f32.mxu1 %vm6320_vm0, %v6319_v1 }
 0x33d   : > { %v1499_v2 = vmul.f32 %v6071_v63, %v1450_v7  ;;  %v4878_v7 = vld [vmem:[%s7477_s12] ss:$0 sm:$0xff] }
 0x33f   : > { %5403 = vmatmul.mubr.msk.f32.gmra.mrb[24].mxu1 %vm1126_vm2, %v1499_v2 }
 0x340   : > { %v6073_v44 = vpop.eup %6072  ;;  %5405 = vmatprep.mubr.msk.f32.mxu1 %vm6320_vm0, %v6319_v1 }
 0x341   : > { %v1500_v3 = vmul.f32 %v6073_v44, %v1451_v23 }
 0x343   : > { %5406 = vmatmul.mubr.msk.f32.gmra.mrb[26].mxu1 %vm1126_vm2, %v1500_v3 }
 0x344   : > { %v6075_v6 = vpop.eup %6074  ;;  %5408 = vmatprep.mubr.msk.f32.mxu1 %vm6320_vm0, %v6319_v1 }
 0x345   : > { %v1501_v55 = vmul.f32 %v6075_v6, %v1452_v0 }
 0x347   : > { %5409 = vmatmul.mubr.msk.f32.gmra.mrb[28].mxu1 %vm1126_vm2, %v1501_v55 }
 0x348   : > { %5458 = vmatprep.mubr.msk.f32.mxu1 %vm6320_vm0, %v6319_v1 }
 0x402   : > { %v1600_v53 = vpop.f32.mrb[16].mxu1 }
 0x403   : > { %v1601_v9 = vadd.f32 %v4878_v7, %v1600_v53  ;;  %v5392_v10 = vpop.f32.mrb[17].mxu1 }
 0x405   : > { %v4886_v12 = vmul.f32 -1.442695, %v1601_v9 }
 0x406   : > { %v1605_v17 = vpop.f32.mrb[18].mxu1 }
 0x407   : > { %6076 = vpow2.f32 %v4886_v12  ;;  %v1606_v21 = vadd.f32 %v4878_v7, %v1605_v17  ;;  %v5395_v22 = vpop.f32.mrb[19].mxu1 }
 0x409   : > { %v4887_v23 = vmul.f32 -1.442695, %v1606_v21 }
 0x40a   : > { %v1610_v58 = vpop.f32.mrb[20].mxu1 }
 0x40b   : > { %6078 = vpow2.f32 %v4887_v23  ;;  %v1611_v25 = vadd.f32 %v4878_v7, %v1610_v58  ;;  %v5398_v29 = vpop.f32.mrb[21].mxu1 }
 0x40d   : > { %v4888_v32 = vmul.f32 -1.442695, %v1611_v25 }
 0x40e   : > { %v1615_v33 = vpop.f32.mrb[22].mxu1 }
 0x40f   : > { %6080 = vpow2.f32 %v4888_v32  ;;  %v1616_v35 = vadd.f32 %v4878_v7, %v1615_v33  ;;  %v5401_v0 = vpop.f32.mrb[23].mxu1 }
 0x411   : > { %v6077_v60 = vpop.eup %6076  ;;  %v4889_v37 = vmul.f32 -1.442695, %v1616_v35 }
 0x412   : > { %v1655_v45 = vadd.f32 1.0, %v6077_v60  ;;  %v1620_v46 = vpop.f32.mrb[24].mxu1 }
 0x413   : > { %6082 = vpow2.f32 %v4889_v37  ;;  %v1621_v47 = vadd.f32 %v4878_v7, %v1620_v46  ;;  %v5404_v50 = vpop.f32.mrb[25].mxu1 }
 0x414   : > { %6084 = vrcp.f32 %v1655_v45 }
 0x415   : > { %v6079_v5 = vpop.eup %6078  ;;  %v4890_v51 = vmul.f32 -1.442695, %v1621_v47 }
 0x416   : > { %v1656_v62 = vadd.f32 1.0, %v6079_v5  ;;  %v1625_v52 = vpop.f32.mrb[26].mxu1 }
 0x417   : > { %6086 = vpow2.f32 %v4890_v51  ;;  %v1626_v54 = vadd.f32 %v4878_v7, %v1625_v52  ;;  %v5407_v56 = vpop.f32.mrb[27].mxu1  ;;  %v1759_v52 = vld [vmem:[%s7478_s13 + $0x10] sm:$0xff] }
 0x418   : > { %6088 = vrcp.f32 %v1656_v62 }
 0x419   : > { %v6081_v14 = vpop.eup %6080  ;;  %v4891_v48 = vmul.f32 -1.442695, %v1626_v54 }
 0x41a   : > { %v1657_v59 = vadd.f32 1.0, %v6081_v14  ;;  %v1630_v61 = vpop.f32.mrb[28].mxu1 }
 0x41b   : > { %6090 = vpow2.f32 %v4891_v48  ;;  %v1631_v26 = vadd.f32 %v4878_v7, %v1630_v61  ;;  %v5410_v63 = vpop.f32.mrb[29].mxu1 }
 0x41c   : > { %6092 = vrcp.f32 %v1657_v59  ;;  %v1852_v63 = vld [vmem:[%s7481_s16 + $0x8] sm:$0xff] }
 0x41d   : > { %v6083_v2 = vpop.eup %6082  ;;  %v4892_v44 = vmul.f32 -1.442695, %v1631_v26 }
 0x41e   : > { %v1658_v3 = vadd.f32 1.0, %v6083_v2  ;;  %v6085_v6 = vpop.eup %6084  ;;  %v1853_v2 = vld [vmem:[%s7481_s16 + $0x10] sm:$0xff] }
 0x41f   : > { %6094 = vpow2.f32 %v4892_v44  ;;  %v1676_v12 = vmul.f32 %v6085_v6, %v1601_v9 }
 0x420   : > { %6096 = vrcp.f32 %v1658_v3  ;;  %v1854_v3 = vld [vmem:[%s7481_s16 + $0x18] sm:$0xff] }
 0x421   : > { %v6087_v55 = vpop.eup %6086  ;;  %v5905_v6 = vpack.c.bf16 %v1854_v3, %v1853_v2 }
 0x422   : > { %v6089_v53 = vpop.eup %6088  ;;  %v1659_v10 = vadd.f32 1.0, %v6087_v55 }
 0x423   : > { %v1677_v17 = vmul.f32 %v6089_v53, %v1606_v21 }
 0x424   : > { %6098 = vrcp.f32 %v1659_v10  ;;  %v1841_v10 = vpop.permute.xlu0 %1840 }
 0x425   : > { %v6091_v22 = vpop.eup %6090  ;;  %v5887_v23 = vpack.c.bf16 %v1677_v17, %v1676_v12 }
 0x426   : > { %v1660_v58 = vadd.f32 1.0, %v6091_v22  ;;  %v6093_v29 = vpop.eup %6092 }
 0x427   : > { %5888 = vmatpush3.bf16.msra.mxu0 %v5887_v23  ;;  %v1678_v0 = vmul.f32 %v6093_v29, %v1611_v25  ;;  %v1757_v25 = vld [vmem:[%s7478_s13] sm:$0xff] }
 0x428   : > { %6100 = vrcp.f32 %v1660_v58  ;;  %5889 = vmatprep.subr.bf16.mxu0 %v6321_v4 }
 0x429   : > { %v6095_v7 = vpop.eup %6094 }
 0x42a   : > { %v6097_v32 = vpop.eup %6096  ;;  %v1661_v33 = vadd.f32 1.0, %v6095_v7  ;;  %v4898_v7 = vld [vmem:[%s7510_s0 + $0x20] sm:$0xff] }
 0x42b   : > { %v1679_v60 = vmul.f32 %v6097_v32, %v1616_v35  ;;  %v1758_v35 = vld [vmem:[%s7478_s13 + $0x8] sm:$0xff]  ;;  %v4900_v32 = vld [vmem:[%s7510_s0 + $0x30] sm:$0xff] }
 0x42c   : > { %6102 = vrcp.f32 %v1661_v33  ;;  %v5896_v62 = vpack.c.bf16 %v1758_v35, %v1757_v25 }
 0x42d   : > { %v5890_v37 = vpack.c.bf16 %v1679_v60, %v1678_v0  ;;  %v4901_v0 = vld [vmem:[%s7510_s0 + $0x38] sm:$0xff] }
 0x42e   : > { %v6099_v9 = vpop.eup %6098  ;;  %v5911_v60 = vpack.c.bf16 %v4901_v0, %v4900_v32 }
 0x42f   : > { %5891 = vmatpush3.bf16.msra.mxu0 %v5890_v37  ;;  %v1680_v45 = vmul.f32 %v6099_v9, %v1621_v47  ;;  %v6745_v47 = vld [vmem:[%s6735_s1] sm:$0xff] }
 0x430   : > { %5892 = vmatprep.subr.bf16.mxu0 %v6321_v4  ;;  %v4896_v9 = vld [vmem:[%s7482_s17] ss:$0 sm:$0xff] }
 0x432   : > { %v6101_v21 = vpop.eup %6100 }
 0x433   : > { %v1681_v46 = vmul.f32 %v6101_v21, %v1626_v54  ;;  %v1760_v54 = vld [vmem:[%s7478_s13 + $0x18] sm:$0xff] }
 0x434   : > { %v5899_v56 = vpack.c.bf16 %v1760_v54, %v1759_v52 }
 0x435   : > { %v5893_v50 = vpack.c.bf16 %v1681_v46, %v1680_v45 }
 0x436   : > { %v6103_v5 = vpop.eup %6102 }
 0x437   : > { %5894 = vmatpush3.bf16.msra.mxu0 %v5893_v50  ;;  %v1682_v51 = vmul.f32 %v6103_v5, %v1631_v26  ;;  %v1851_v26 = vld [vmem:[%s7481_s16] sm:$0xff] }
 0x438   : > { %5423 = vmatprep.subr.mxu0 %v6319_v1  ;;  %v5902_v44 = vpack.c.bf16 %v1852_v63, %v1851_v26 }
 0x43b   : > { %5424 = vmatpush3.msra.mxu0 %v1682_v51 }
 0x43c   : > { %5426 = vmatmul.mubr.msk.f32.vlgmr.msra.gmra.mrb[18].mxu0 %vm1683_vm3, %v6745_v47  ;;  %5895 = vmatprep.subr.bf16.mxu0 %v6321_v4 }
 0x43d   : > { %5897 = vmatpush3.bf16.msra.mxu0 %v5896_v62  ;;  %5436 = vmatprep.mubr.msk.f32.mxu0 %vm6320_vm0, %v6319_v1 }
 0x43e   : > { %5898 = vmatprep.subr.bf16.mxu0 %v6321_v4 }
 0x441   : > { %5900 = vmatpush3.bf16.msra.mxu0 %v5899_v56 }
 0x442   : > { %5901 = vmatprep.subr.bf16.mxu0 %v6321_v4 }
 0x50f   : > { %v1753_v14 = vpop.f32.mrb[18].mxu0 }
 0x510   : > { %v5427_v48 = vpop.f32.mrb[19].mxu0  ;;  %5437 = vmatmul.mubr.msk.f32.vlgmr.msra.gmra.mrb[20].mxu0 %vm1126_vm2, %v1753_v14 }
 0x511   : > { %5447 = vmatprep.mubr.msk.f32.mxu0 %vm6320_vm0, %v6319_v1  ;;  %5903 = vmatpush3.bf16.msra.mxu0 %v5902_v44 }
 0x512   : > { %5904 = vmatprep.subr.bf16.mxu0 %v6321_v4 }
 0x515   : > { %5906 = vmatpush3.bf16.msra.mxu0 %v5905_v6 }
 0x516   : > { %5461 = vmatprep.subr.mxu0 %v6319_v1 }
 0x5e3   : > { %v1830_v59 = vpop.f32.mrb[20].mxu0 }
 0x5e4   : > { %1835 = vrot.lane.b32.xlu1 %v1830_v59, %s6324_s7  ;;  %v5438_v61 = vpop.f32.mrb[21].mxu0 }
 0x656   : > { %v1836_v55 = vpop.permute.xlu1 %1835 }
 0x657   : > { %v1838_v53 = vadd.f32 %v1836_v55, %v6529_v16  ;;  %v4899_v16 = vld [vmem:[%s7510_s0 + $0x28] sm:$0xff] }
 0x658   : > { %v5908_v33 = vpack.c.bf16 %v4899_v16, %v4898_v7 }
 0x659   : > { %v1843_v12 = vadd.f32 %v1841_v10, %v1838_v53 }
 0x65a   : > { %5909 = vmatpush3.bf16.msra.mxu1 %v5908_v33 }
 0x65b   : > { %v4895_v17 = vmul.f32 -1.442695, %v1843_v12  ;;  %5910 = vmatprep.subr.bf16.mxu1 %v6321_v4 }
 0x65d   : > { %6104 = vpow2.f32 %v4895_v17 }
 0x65e   : > { %5912 = vmatpush3.bf16.msra.mxu1 %v5911_v60 }
 0x65f   : > { %5484 = vmatprep.subr.mxu1 %v6319_v1 }
 0x667   : > { %v6105_v22 = vpop.eup %6104 }
 0x668   : > { %v1847_v23 = vadd.f32 1.0, %v6105_v22 }
 0x66a   : > { %6106 = vrcp.f32 %v1847_v23 }
 0x674   : > { %v6107_v58 = vpop.eup %6106 }
 0x675   : > { %v1850_v29 = vmul.f32 %v6107_v58, %v1843_v12 }
 0x677   : > { %1863 = vrot.lane.b32.xlu1 %v1850_v29, %s6324_s7 }
 0x67b   : > { %2226 = vrot.lane.b32.xlu1 %v6670_v8, %s7520_s4 }
 0x67f   : > { %2230 = vrot.lane.b32.xlu1 %v6681_v31, %s7520_s4 }
 0x683   : > { %2234 = vrot.lane.b32.xlu1 %v6691_v57, %s7520_s4 }
 0x687   : > { %2238 = vrot.lane.b32.xlu1 %v6697_v28, %s7520_s4 }
 0x68b   : > { %2639 = vrot.lane.b32.xlu1 %v6588_v34, %s7495_s28 }
 0x6e9   : > { %v1864_v37 = vpop.permute.xlu1 %1863 }
 0x6ea   : > { %5448 = vmatmul.mubr.msk.f32.vlgmr.msra.gmra.mrb[22].mxu0 %vm1126_vm2, %v1864_v37 }
 0x6eb   : > { %5463 = vmatprep.mubr.msk.f32.mxu0 %vm6320_vm0, %v6319_v1 }
 0x6ed   : > { %v2227_v61 = vpop.permute.xlu1 %2226 }
 0x6f1   : > { %v2231_v22 = vpop.permute.xlu1 %2230 }
 0x7bd   : > { %v1933_v21 = vpop.f32.mrb[22].mxu0 }
 0x7be   : > { %v1934_v45 = vadd.f32 %v4896_v9, %v1933_v21  ;;  %v5449_v46 = vpop.f32.mrb[23].mxu0 }
 0x7c0   : > { %5459 = vmatmul.mubr.msk.f32.vlgmr.msra.gmra.mrb[30].mxu1 %vm1126_vm2, %v1934_v45  ;;  %v2235_v45 = vpop.permute.xlu1 %2234 }
 0x7c1   : > { %5486 = vmatprep.mubr.msk.f32.mxu1 %vm6320_vm0, %v6319_v1 }
 0x893   : > { %v6813_v50 = vpop.f32.mrb[30].mxu1 }
 0x894   : > { %2016 = vrot.lane.b32.xlu0 %v6813_v50, %s7520_s4  ;;  %v5460_v5 = vpop.f32.mrb[31].mxu1  ;;  %5485 = vmatpush3.msra.mxu1 %v6813_v50 }
 0x895   : > { %5487 = vmatmul.mubr.msk.f32.vlgmr.msra.gmra.mrb[32].mxu1 %vm900_vm1, %v6527_v15  ;;  %5919 = vmatprep.subr.bf16.mxu1 %v6321_v4 }
 0x896   : > { %5489 = vmatprep.mubr.msk.f32.mxu1 %vm6320_vm0, %v6319_v1 }
 0x898   : > { %2228 = vrot.lane.b32.xlu0 %v6672_v13, %s7520_s4 }
 0x899   : > { %5490 = vmatmul.mubr.msk.f32.gmra.mrb[34].mxu1 %vm900_vm1, %v6540_v18 }
 0x89a   : > { %5492 = vmatprep.mubr.msk.f32.mxu1 %vm6320_vm0, %v6319_v1 }
 0x89c   : > { %2232 = vrot.lane.b32.xlu0 %v6687_v49, %s7520_s4 }
 0x89d   : > { %5493 = vmatmul.mubr.msk.f32.gmra.mrb[36].mxu1 %vm900_vm1, %v6547_v19 }
 0x89e   : > { %5495 = vmatprep.mubr.msk.f32.mxu1 %vm6320_vm0, %v6319_v1 }
 0x8a0   : > { %2236 = vrot.lane.b32.xlu0 %v6694_v11, %s7520_s4 }
 0x8a1   : > { %5496 = vmatmul.mubr.msk.f32.gmra.mrb[38].mxu1 %vm900_vm1, %v6554_v20 }
 0x8a2   : > { %5498 = vmatprep.mubr.msk.f32.mxu1 %vm6320_vm0, %v6319_v1 }
 0x8a5   : > { %5499 = vmatmul.mubr.msk.f32.gmra.mrb[40].mxu1 %vm900_vm1, %v6565_v24 }
 0x8a6   : > { %5501 = vmatprep.mubr.msk.f32.mxu1 %vm6320_vm0, %v6319_v1 }
 0x8a9   : > { %5502 = vmatmul.mubr.msk.f32.gmra.mrb[42].mxu1 %vm900_vm1, %v6572_v27 }
 0x8aa   : > { %5504 = vmatprep.mubr.msk.f32.mxu1 %vm6320_vm0, %v6319_v1 }
 0x8ad   : > { %5505 = vmatmul.mubr.msk.f32.gmra.mrb[44].mxu1 %vm900_vm1, %v6579_v30 }
 0x8ae   : > { %5550 = vmatprep.mubr.msk.f32.mxu1 %vm6320_vm0, %v6319_v1 }
 0x906   : > { %v2017_v15 = vpop.permute.xlu0 %2016 }
 0x907   : > { %5462 = vmatpush3.msra.mxu0 %v2017_v15 }
 0x908   : > { %5464 = vmatmul.mubr.msk.f32.vlgmr.msra.gmra.mrb[24].mxu0 %vm900_vm1, %v6599_v36  ;;  %5913 = vmatprep.subr.bf16.mxu0 %v6321_v4  ;;  %v4924_v36 = vld [vmem:[%s7476_s11 + $0x20] sm:$0xff] }
 0x909   : > { %5466 = vmatprep.mubr.msk.f32.mxu0 %vm6320_vm0, %v6319_v1 }
 0x90a   : > { %v2229_v6 = vpop.permute.xlu0 %2228 }
 0x90c   : > { %5467 = vmatmul.mubr.msk.f32.gmra.mrb[26].mxu0 %vm900_vm1, %v6607_v38  ;;  %v4925_v38 = vld [vmem:[%s7476_s11 + $0x28] sm:$0xff] }
 0x90d   : > { %5469 = vmatprep.mubr.msk.f32.mxu0 %vm6320_vm0, %v6319_v1 }
 0x90e   : > { %v2233_v32 = vpop.permute.xlu0 %2232 }
 0x910   : > { %5470 = vmatmul.mubr.msk.f32.gmra.mrb[28].mxu0 %vm900_vm1, %v6614_v39  ;;  %v5914_v39 = vpack.c.bf16 %v4925_v38, %v4924_v36 }
 0x911   : > { %5472 = vmatprep.mubr.msk.f32.mxu0 %vm6320_vm0, %v6319_v1 }
 0x912   : > { %5915 = vmatpush3.bf16.msra.mxu0 %v5914_v39 }
 0x913   : > { %5916 = vmatprep.subr.bf16.mxu0 %v6321_v4 }
 0x914   : > { %5473 = vmatmul.mubr.msk.f32.gmra.mrb[30].mxu0 %vm900_vm1, %v6621_v40 }
 0x915   : > { %5475 = vmatprep.mubr.msk.f32.mxu0 %vm6320_vm0, %v6319_v1 }
 0x918   : > { %5476 = vmatmul.mubr.msk.f32.gmra.mrb[32].mxu0 %vm900_vm1, %v6628_v41 }
 0x919   : > { %5478 = vmatprep.mubr.msk.f32.mxu0 %vm6320_vm0, %v6319_v1 }
 0x91c   : > { %5479 = vmatmul.mubr.msk.f32.gmra.mrb[34].mxu0 %vm900_vm1, %v6635_v42  ;;  %v4926_v42 = vld [vmem:[%s7476_s11 + $0x30] sm:$0xff] }
 0x91d   : > { %5481 = vmatprep.mubr.msk.f32.mxu0 %vm6320_vm0, %v6319_v1 }
 0x920   : > { %5482 = vmatmul.mubr.msk.f32.gmra.mrb[36].mxu0 %vm900_vm1, %v6642_v43  ;;  %v4927_v43 = vld [vmem:[%s7476_s11 + $0x38] sm:$0xff] }
 0x921   : > { %5515 = vmatprep.mubr.msk.f32.mxu0 %vm6320_vm0, %v6319_v1  ;;  %v5917_v25 = vpack.c.bf16 %v4927_v43, %v4926_v42  ;;  %v2239_v43 = vpop.permute.xlu1 %2238 }
 0x923   : > { %5918 = vmatpush3.bf16.msra.mxu0 %v5917_v25 }
 0x924   : > { %5940 = vmatprep.subr.bf16.mxu0 %v6321_v4 }
 0x968   : > { %v2185_v18 = vpop.f32.mrb[32].mxu1 }
 0x969   : > { %v5488_v19 = vpop.f32.mrb[33].mxu1 }
 0x96c   : > { %v2190_v20 = vpop.f32.mrb[34].mxu1 }
 0x96d   : > { %v5491_v24 = vpop.f32.mrb[35].mxu1 }
 0x970   : > { %v2195_v27 = vpop.f32.mrb[36].mxu1 }
 0x971   : > { %v5494_v30 = vpop.f32.mrb[37].mxu1 }
 0x974   : > { %v2200_v40 = vpop.f32.mrb[38].mxu1 }
 0x975   : > { %v5497_v41 = vpop.f32.mrb[39].mxu1 }
 0x978   : > { %v2205_v35 = vpop.f32.mrb[40].mxu1 }
 0x979   : > { %v5500_v51 = vpop.f32.mrb[41].mxu1 }
 0x97c   : > { %v2210_v62 = vpop.f32.mrb[42].mxu1 }
 0x97d   : > { %v5503_v52 = vpop.f32.mrb[43].mxu1 }
 0x980   : > { %v2215_v54 = vpop.f32.mrb[44].mxu1 }
 0x981   : > { %v5506_v56 = vpop.f32.mrb[45].mxu1 }
 0x9db   : > { %v2085_v14 = vpop.f32.mrb[24].mxu0 }
 0x9dc   : > { %v2186_v48 = vadd.f32 %v2185_v18, %v2085_v14  ;;  %v5465_v59 = vpop.f32.mrb[25].mxu0 }
 0x9de   : > { %v2247_v26 = vadd.f32 %v2227_v61, %v2186_v48 }
 0x9df   : > { %v2090_v63 = vpop.f32.mrb[26].mxu0 }
 0x9e0   : > { %v4917_v2 = vmul.f32 -1.442695, %v2247_v26  ;;  %v2191_v44 = vadd.f32 %v2190_v20, %v2090_v63  ;;  %v5468_v3 = vpop.f32.mrb[27].mxu0 }
 0x9e2   : > { %6108 = vpow2.f32 %v4917_v2  ;;  %v2248_v55 = vadd.f32 %v2229_v6, %v2191_v44 }
 0x9e3   : > { %v2095_v53 = vpop.f32.mrb[28].mxu0 }
 0x9e4   : > { %v4918_v10 = vmul.f32 -1.442695, %v2248_v55  ;;  %v2196_v12 = vadd.f32 %v2195_v27, %v2095_v53  ;;  %v5471_v17 = vpop.f32.mrb[29].mxu0  ;;  %v2237_v27 = vpop.permute.xlu0 %2236 }
 0x9e6   : > { %6110 = vpow2.f32 %v4918_v10  ;;  %v2249_v23 = vadd.f32 %v2231_v22, %v2196_v12 }
 0x9e7   : > { %v2100_v58 = vpop.f32.mrb[30].mxu0 }
 0x9e8   : > { %v4919_v29 = vmul.f32 -1.442695, %v2249_v23  ;;  %v2201_v7 = vadd.f32 %v2200_v40, %v2100_v58  ;;  %v5474_v16 = vpop.f32.mrb[31].mxu0 }
 0x9ea   : > { %6112 = vpow2.f32 %v4919_v29  ;;  %v2250_v33 = vadd.f32 %v2233_v32, %v2201_v7  ;;  %v4929_v29 = vld [vmem:[%s7477_s12 + $0x1] ss:$0 sm:$0xff] }
 0x9eb   : > { %v2105_v0 = vpop.f32.mrb[32].mxu0 }
 0x9ec   : > { %v6109_v60 = vpop.eup %6108  ;;  %v4920_v37 = vmul.f32 -1.442695, %v2250_v33  ;;  %v2206_v9 = vadd.f32 %v2205_v35, %v2105_v0  ;;  %v5477_v21 = vpop.f32.mrb[33].mxu0 }
 0x9ed   : > { %v2275_v46 = vadd.f32 1.0, %v6109_v60 }
 0x9ee   : > { %6114 = vpow2.f32 %v4920_v37  ;;  %v2251_v5 = vadd.f32 %v2235_v45, %v2206_v9 }
 0x9ef   : > { %6116 = vrcp.f32 %v2275_v46  ;;  %v2110_v15 = vpop.f32.mrb[34].mxu0 }
 0x9f0   : > { %v6111_v18 = vpop.eup %6110  ;;  %v4921_v19 = vmul.f32 -1.442695, %v2251_v5  ;;  %v2211_v20 = vadd.f32 %v2210_v62, %v2110_v15  ;;  %v5480_v24 = vpop.f32.mrb[35].mxu0 }
 0x9f1   : > { %v2276_v30 = vadd.f32 1.0, %v6111_v18 }
 0x9f2   : > { %6118 = vpow2.f32 %v4921_v19  ;;  %v2252_v36 = vadd.f32 %v2237_v27, %v2211_v20 }
 0x9f3   : > { %6120 = vrcp.f32 %v2276_v30  ;;  %v2115_v38 = vpop.f32.mrb[36].mxu0 }
 0x9f4   : > { %v6113_v39 = vpop.eup %6112  ;;  %v4922_v40 = vmul.f32 -1.442695, %v2252_v36  ;;  %v2216_v41 = vadd.f32 %v2215_v54, %v2115_v38  ;;  %v5483_v42 = vpop.f32.mrb[37].mxu0 }
 0x9f5   : > { %v2277_v25 = vadd.f32 1.0, %v6113_v39 }
 0x9f6   : > { %6122 = vpow2.f32 %v4922_v40  ;;  %v2253_v35 = vadd.f32 %v2239_v43, %v2216_v41 }
 0x9f7   : > { %6124 = vrcp.f32 %v2277_v25 }
 0x9f8   : > { %v6115_v51 = vpop.eup %6114  ;;  %v4923_v52 = vmul.f32 -1.442695, %v2253_v35 }
 0x9f9   : > { %v6117_v56 = vpop.eup %6116  ;;  %v2278_v62 = vadd.f32 1.0, %v6115_v51 }
 0x9fa   : > { %v2296_v14 = vmul.f32 %v6117_v56, %v2247_v26  ;;  %6126 = vpow2.f32 %v4923_v52 }
 0x9fb   : > { %6128 = vrcp.f32 %v2278_v62 }
 0x9fc   : > { %v6119_v48 = vpop.eup %6118  ;;  %5516 = vmatmul.mubr.msk.f32.vlgmr.msra.gmra.mrb[38].mxu0 %vm1126_vm2, %v2296_v14 }
 0x9fd   : > { %v6121_v59 = vpop.eup %6120  ;;  %v2279_v61 = vadd.f32 1.0, %v6119_v48  ;;  %5518 = vmatprep.mubr.msk.f32.mxu0 %vm6320_vm0, %v6319_v1 }
 0x9fe   : > { %v2297_v54 = vmul.f32 %v6121_v59, %v2248_v55 }
 0x9ff   : > { %6130 = vrcp.f32 %v2279_v61 }
 0xa00   : > { %v6123_v63 = vpop.eup %6122  ;;  %5519 = vmatmul.mubr.msk.f32.gmra.mrb[40].mxu0 %vm1126_vm2, %v2297_v54 }
 0xa01   : > { %v6125_v2 = vpop.eup %6124  ;;  %v2280_v44 = vadd.f32 1.0, %v6123_v63  ;;  %5521 = vmatprep.mubr.msk.f32.mxu0 %vm6320_vm0, %v6319_v1 }
 0xa02   : > { %v2298_v26 = vmul.f32 %v6125_v2, %v2249_v23 }
 0xa03   : > { %6132 = vrcp.f32 %v2280_v44 }
 0xa04   : > { %v6127_v3 = vpop.eup %6126  ;;  %5522 = vmatmul.mubr.msk.f32.gmra.mrb[42].mxu0 %vm1126_vm2, %v2298_v26 }
 0xa05   : > { %v6129_v6 = vpop.eup %6128  ;;  %v2281_v53 = vadd.f32 1.0, %v6127_v3  ;;  %5524 = vmatprep.mubr.msk.f32.mxu0 %vm6320_vm0, %v6319_v1 }
 0xa06   : > { %v2299_v55 = vmul.f32 %v6129_v6, %v2250_v33 }
 0xa07   : > { %6134 = vrcp.f32 %v2281_v53 }
 0xa08   : > { %5525 = vmatmul.mubr.msk.f32.gmra.mrb[44].mxu0 %vm1126_vm2, %v2299_v55 }
 0xa09   : > { %v6131_v10 = vpop.eup %6130  ;;  %5527 = vmatprep.mubr.msk.f32.mxu0 %vm6320_vm0, %v6319_v1 }
 0xa0a   : > { %v2300_v12 = vmul.f32 %v6131_v10, %v2251_v5 }
 0xa0c   : > { %5528 = vmatmul.mubr.msk.f32.gmra.mrb[46].mxu0 %vm1126_vm2, %v2300_v12 }
 0xa0d   : > { %v6133_v17 = vpop.eup %6132  ;;  %5530 = vmatprep.mubr.msk.f32.mxu0 %vm6320_vm0, %v6319_v1 }
 0xa0e   : > { %v2301_v22 = vmul.f32 %v6133_v17, %v2252_v36 }
 0xa10   : > { %5531 = vmatmul.mubr.msk.f32.gmra.mrb[48].mxu0 %vm1126_vm2, %v2301_v22 }
 0xa11   : > { %v6135_v23 = vpop.eup %6134  ;;  %5533 = vmatprep.mubr.msk.f32.mxu0 %vm6320_vm0, %v6319_v1 }
 0xa12   : > { %v2302_v58 = vmul.f32 %v6135_v23, %v2253_v35 }
 0xa14   : > { %5534 = vmatmul.mubr.msk.f32.gmra.mrb[50].mxu0 %vm1126_vm2, %v2302_v58 }
 0xa15   : > { %5583 = vmatprep.mubr.msk.f32.mxu0 %vm6320_vm0, %v6319_v1 }
 0xacf   : > { %v2403_v7 = vpop.f32.mrb[38].mxu0 }
 0xad0   : > { %v2404_v16 = vadd.f32 %v4929_v29, %v2403_v7  ;;  %v5517_v32 = vpop.f32.mrb[39].mxu0 }
 0xad2   : > { %v4937_v33 = vmul.f32 -1.442695, %v2404_v16 }
 0xad3   : > { %v2408_v0 = vpop.f32.mrb[40].mxu0 }
 0xad4   : > { %6136 = vpow2.f32 %v4937_v33  ;;  %v2409_v60 = vadd.f32 %v4929_v29, %v2408_v0  ;;  %v5520_v37 = vpop.f32.mrb[41].mxu0 }
 0xad5   : > { %v4945_v37 = vld [vmem:[%s7478_s13 + $0x20] sm:$0xff] }
 0xad6   : > { %v4938_v9 = vmul.f32 -1.442695, %v2409_v60 }
 0xad7   : > { %v2413_v21 = vpop.f32.mrb[42].mxu0 }
 0xad8   : > { %6138 = vpow2.f32 %v4938_v9  ;;  %v2414_v45 = vadd.f32 %v4929_v29, %v2413_v21  ;;  %v5523_v46 = vpop.f32.mrb[43].mxu0  ;;  %v4946_v9 = vld [vmem:[%s7478_s13 + $0x28] sm:$0xff] }
 0xad9   : > { %v4947_v46 = vld [vmem:[%s7478_s13 + $0x30] sm:$0xff] }
 0xada   : > { %v4939_v5 = vmul.f32 -1.442695, %v2414_v45 }
 0xadb   : > { %v2418_v15 = vpop.f32.mrb[44].mxu0 }
 0xadc   : > { %6140 = vpow2.f32 %v4939_v5  ;;  %v2419_v18 = vadd.f32 %v4929_v29, %v2418_v15  ;;  %v5526_v19 = vpop.f32.mrb[45].mxu0  ;;  %v4948_v5 = vld [vmem:[%s7478_s13 + $0x38] sm:$0xff] }
 0xadd   : > { %v5932_v15 = vpack.c.bf16 %v4948_v5, %v4947_v46 }
 0xade   : > { %v6137_v20 = vpop.eup %6136  ;;  %v4940_v24 = vmul.f32 -1.442695, %v2419_v18 }
 0xadf   : > { %v2458_v27 = vadd.f32 1.0, %v6137_v20  ;;  %v2423_v30 = vpop.f32.mrb[46].mxu0 }
 0xae0   : > { %6142 = vpow2.f32 %v4940_v24  ;;  %v2424_v36 = vadd.f32 %v4929_v29, %v2423_v30  ;;  %v5529_v38 = vpop.f32.mrb[47].mxu0  ;;  %v4951_v24 = vld [vmem:[%s7481_s16 + $0x20] sm:$0xff]  ;;  %v4953_v30 = vld [vmem:[%s7481_s16 + $0x30] sm:$0xff] }
 0xae1   : > { %6144 = vrcp.f32 %v2458_v27  ;;  %v4952_v27 = vld [vmem:[%s7481_s16 + $0x28] sm:$0xff]  ;;  %v4954_v38 = vld [vmem:[%s7481_s16 + $0x38] sm:$0xff] }
 0xae2   : > { %v6139_v39 = vpop.eup %6138  ;;  %v4941_v40 = vmul.f32 -1.442695, %v2424_v36 }
 0xae3   : > { %v2459_v41 = vadd.f32 1.0, %v6139_v39  ;;  %v2428_v42 = vpop.f32.mrb[48].mxu0  ;;  %v5938_v39 = vpack.c.bf16 %v4954_v38, %v4953_v30 }
 0xae4   : > { %6146 = vpow2.f32 %v4941_v40  ;;  %v2429_v43 = vadd.f32 %v4929_v29, %v2428_v42  ;;  %v5532_v25 = vpop.f32.mrb[49].mxu0  ;;  %v2640_v42 = vpop.permute.xlu1 %2639 }
 0xae5   : > { %6148 = vrcp.f32 %v2459_v41 }
 0xae6   : > { %v6141_v35 = vpop.eup %6140  ;;  %v4942_v51 = vmul.f32 -1.442695, %v2429_v43 }
 0xae7   : > { %v2460_v52 = vadd.f32 1.0, %v6141_v35  ;;  %v2433_v56 = vpop.f32.mrb[50].mxu0 }
 0xae8   : > { %6150 = vpow2.f32 %v4942_v51  ;;  %v2434_v62 = vadd.f32 %v4929_v29, %v2433_v56  ;;  %v5535_v14 = vpop.f32.mrb[51].mxu0 }
 0xae9   : > { %6152 = vrcp.f32 %v2460_v52  ;;  %v4959_v14 = vld [vmem:[%s7510_s0 + $0x48] sm:$0xff] }
 0xaea   : > { %v6143_v48 = vpop.eup %6142  ;;  %v4943_v59 = vmul.f32 -1.442695, %v2434_v62 }
 0xaeb   : > { %v2461_v61 = vadd.f32 1.0, %v6143_v48  ;;  %v6145_v54 = vpop.eup %6144 }
 0xaec   : > { %6154 = vpow2.f32 %v4943_v59  ;;  %v2479_v26 = vmul.f32 %v6145_v54, %v2404_v16  ;;  %v4961_v59 = vld [vmem:[%s7510_s0 + $0x58] sm:$0xff] }
 0xaed   : > { %6156 = vrcp.f32 %v2461_v61 }
 0xaee   : > { %v6147_v63 = vpop.eup %6146 }
 0xaef   : > { %v6149_v2 = vpop.eup %6148  ;;  %v2462_v44 = vadd.f32 1.0, %v6147_v63  ;;  %v4956_v63 = vld [vmem:[%s7482_s17 + $0x1] ss:$0 sm:$0xff] }
 0xaf0   : > { %v2480_v3 = vmul.f32 %v6149_v2, %v2409_v60 }
 0xaf1   : > { %6158 = vrcp.f32 %v2462_v44 }
 0xaf2   : > { %v6151_v6 = vpop.eup %6150  ;;  %v5920_v53 = vpack.c.bf16 %v2480_v3, %v2479_v26 }
 0xaf3   : > { %v2463_v55 = vadd.f32 1.0, %v6151_v6  ;;  %v6153_v10 = vpop.eup %6152 }
 0xaf4   : > { %5921 = vmatpush3.bf16.msra.mxu1 %v5920_v53  ;;  %v2481_v23 = vmul.f32 %v6153_v10, %v2414_v45  ;;  %v5929_v45 = vpack.c.bf16 %v4946_v9, %v4945_v37  ;;  %v6999_v53 = vld [vmem:[%s6524_s8] sm:$0xff]  ;;  %v7018_v10 = vld [vmem:[%s6524_s8 + $0x10] sm:$0xff] }
 0xaf5   : > { %6160 = vrcp.f32 %v2463_v55  ;;  %5922 = vmatprep.subr.bf16.mxu1 %v6321_v4  ;;  %v7009_v55 = vld [vmem:[%s6524_s8 + $0x8] sm:$0xff] }
 0xaf6   : > { %v6155_v12 = vpop.eup %6154 }
 0xaf7   : > { %v6157_v17 = vpop.eup %6156  ;;  %v2464_v22 = vadd.f32 1.0, %v6155_v12  ;;  %v7027_v12 = vld [vmem:[%s6524_s8 + $0x18] sm:$0xff] }
 0xaf8   : > { %v2482_v58 = vmul.f32 %v6157_v17, %v2419_v18  ;;  %v7034_v17 = vld [vmem:[%s6524_s8 + $0x20] sm:$0xff] }
 0xaf9   : > { %6162 = vrcp.f32 %v2464_v22  ;;  %v7041_v22 = vld [vmem:[%s6524_s8 + $0x28] sm:$0xff] }
 0xafa   : > { %v5923_v29 = vpack.c.bf16 %v2482_v58, %v2481_v23  ;;  %v7048_v23 = vld [vmem:[%s6524_s8 + $0x30] sm:$0xff] }
 0xafb   : > { %v6159_v7 = vpop.eup %6158 }
 0xafc   : > { %5924 = vmatpush3.bf16.msra.mxu1 %v5923_v29  ;;  %v2483_v32 = vmul.f32 %v6159_v7, %v2424_v36  ;;  %v5935_v36 = vpack.c.bf16 %v4952_v27, %v4951_v24  ;;  %v7055_v29 = vld [vmem:[%s6596_s30] sm:$0xff]  ;;  %v7063_v7 = vld [vmem:[%s6596_s30 + $0x8] sm:$0xff]  ;;  %v4986_v24 = vld [vmem:[%s7476_s11 + $0x50] sm:$0xff] }
 0xafd   : > { %5925 = vmatprep.subr.bf16.mxu1 %v6321_v4  ;;  %v4987_v27 = vld [vmem:[%s7476_s11 + $0x58] sm:$0xff] }
 0xafe   : > { %v5950_v30 = vpack.c.bf16 %v4987_v27, %v4986_v24 }
 0xaff   : > { %v6161_v16 = vpop.eup %6160 }
 0xb00   : > { %v2484_v33 = vmul.f32 %v6161_v16, %v2429_v43  ;;  %v7070_v16 = vld [vmem:[%s6596_s30 + $0x10] sm:$0xff] }
 0xb02   : > { %v5926_v0 = vpack.c.bf16 %v2484_v33, %v2483_v32  ;;  %v7077_v32 = vld [vmem:[%s6596_s30 + $0x18] sm:$0xff]  ;;  %v7084_v33 = vld [vmem:[%s6596_s30 + $0x20] sm:$0xff] }
 0xb03   : > { %v6163_v60 = vpop.eup %6162 }
 0xb04   : > { %5927 = vmatpush3.bf16.msra.mxu1 %v5926_v0  ;;  %v2485_v21 = vmul.f32 %v6163_v60, %v2434_v62  ;;  %v4958_v62 = vld [vmem:[%s7510_s0 + $0x40] sm:$0xff]  ;;  %v7091_v0 = vld [vmem:[%s6596_s30 + $0x28] sm:$0xff]  ;;  %v7098_v60 = vld [vmem:[%s6596_s30 + $0x30] sm:$0xff]  ;;  %s875_s30 = scalar_lea.vmem %s7491_s26, %s7524_s3 }
 0xb05   : > { %5548 = vmatprep.subr.mxu1 %v6319_v1  ;;  %v5941_v48 = vpack.c.bf16 %v4959_v14, %v4958_v62 }
 0xb07   : > { %5942 = vmatpush3.bf16.msra.mxu0 %v5941_v48 }
 0xb08   : > { %5549 = vmatpush3.msra.mxu1 %v2485_v21  ;;  %5943 = vmatprep.subr.bf16.mxu0 %v6321_v4 }
 0xb09   : > { %5551 = vmatmul.mubr.msk.f32.vlgmr.msra.gmra.mrb[46].mxu1 %vm1683_vm3, %v6745_v47  ;;  %5928 = vmatprep.subr.bf16.mxu1 %v6321_v4 }
 0xb0a   : > { %5930 = vmatpush3.bf16.msra.mxu1 %v5929_v45  ;;  %5561 = vmatprep.mubr.msk.f32.mxu1 %vm6320_vm0, %v6319_v1 }
 0xb0b   : > { %5931 = vmatprep.subr.bf16.mxu1 %v6321_v4 }
 0xb0e   : > { %5933 = vmatpush3.bf16.msra.mxu1 %v5932_v15  ;;  %v4984_v15 = vld [vmem:[%s7476_s11 + $0x40] sm:$0xff] }
 0xb0f   : > { %5934 = vmatprep.subr.bf16.mxu1 %v6321_v4 }
 0xbdc   : > { %v2552_v18 = vpop.f32.mrb[46].mxu1 }
 0xbdd   : > { %v5552_v19 = vpop.f32.mrb[47].mxu1  ;;  %5562 = vmatmul.mubr.msk.f32.vlgmr.msra.gmra.mrb[48].mxu1 %vm1126_vm2, %v2552_v18  ;;  %v4985_v18 = vld [vmem:[%s7476_s11 + $0x48] sm:$0xff] }
 0xbde   : > { %5572 = vmatprep.mubr.msk.f32.mxu1 %vm6320_vm0, %v6319_v1  ;;  %5936 = vmatpush3.bf16.msra.mxu1 %v5935_v36  ;;  %v5947_v19 = vpack.c.bf16 %v4985_v18, %v4984_v15 }
 0xbdf   : > { %5937 = vmatprep.subr.bf16.mxu1 %v6321_v4 }
 0xbe2   : > { %5939 = vmatpush3.bf16.msra.mxu1 %v5938_v39 }
 0xbe3   : > { %5586 = vmatprep.subr.mxu1 %v6319_v1 }
 0xcb0   : > { %v2630_v47 = vpop.f32.mrb[48].mxu1 }
 0xcb1   : > { %2635 = vrot.lane.b32.xlu0 %v2630_v47, %s6324_s7  ;;  %v5563_v20 = vpop.f32.mrb[49].mxu1 }
 0xd23   : > { %v2636_v40 = vpop.permute.xlu0 %2635 }
 0xd24   : > { %v2638_v41 = vadd.f32 %v2636_v40, %v6813_v50  ;;  %v4960_v50 = vld [vmem:[%s7510_s0 + $0x50] sm:$0xff] }
 0xd25   : > { %v5944_v61 = vpack.c.bf16 %v4961_v59, %v4960_v50 }
 0xd26   : > { %v2642_v43 = vadd.f32 %v2640_v42, %v2638_v41 }
 0xd27   : > { %5945 = vmatpush3.bf16.msra.mxu0 %v5944_v61 }
 0xd28   : > { %v4950_v25 = vmul.f32 -1.442695, %v2642_v43  ;;  %5609 = vmatprep.subr.mxu0 %v6319_v1 }
 0xd2a   : > { %6164 = vpow2.f32 %v4950_v25 }
 0xd34   : > { %v6165_v35 = vpop.eup %6164 }
 0xd35   : > { %v2646_v51 = vadd.f32 1.0, %v6165_v35 }
 0xd37   : > { %6166 = vrcp.f32 %v2646_v51 }
 0xd41   : > { %v6167_v52 = vpop.eup %6166 }
 0xd42   : > { %v2649_v56 = vmul.f32 %v6167_v52, %v2642_v43 }
 0xd44   : > { %2664 = vrot.lane.b32.xlu0 %v2649_v56, %s6324_s7 }
 0xd48   : > { %3020 = vrot.lane.b32.xlu0 %v6670_v8, %s6324_s7 }
 0xd4c   : > { %3024 = vrot.lane.b32.xlu0 %v6681_v31, %s6324_s7 }
 0xd50   : > { %3028 = vrot.lane.b32.xlu0 %v6691_v57, %s6324_s7 }
 0xd54   : > { %3032 = vrot.lane.b32.xlu0 %v6697_v28, %s6324_s7 }
 0xdb6   : > { %v2665_v54 = vpop.permute.xlu0 %2664 }
 0xdb7   : > { %5573 = vmatmul.mubr.msk.f32.vlgmr.msra.gmra.mrb[50].mxu1 %vm1126_vm2, %v2665_v54 }
 0xdb8   : > { %5588 = vmatprep.mubr.msk.f32.mxu1 %vm6320_vm0, %v6319_v1 }
 0xdba   : > { %v3021_v51 = vpop.permute.xlu0 %3020 }
 0xe8a   : > { %v2734_v2 = vpop.f32.mrb[50].mxu1 }
 0xe8b   : > { %v2735_v44 = vadd.f32 %v4956_v63, %v2734_v2  ;;  %v5574_v26 = vpop.f32.mrb[51].mxu1 }
 0xe8d   : > { %5584 = vmatmul.mubr.msk.f32.vlgmr.msra.gmra.mrb[52].mxu0 %vm1126_vm2, %v2735_v44  ;;  %v3025_v44 = vpop.permute.xlu0 %3024 }
 0xe8e   : > { %5611 = vmatprep.mubr.msk.f32.mxu0 %vm6320_vm0, %v6319_v1 }
 0xe91   : > { %v3029_v24 = vpop.permute.xlu0 %3028 }
 0xf60   : > { %v6993_v3 = vpop.f32.mrb[52].mxu0 }
 0xf61   : > { %2817 = vrot.lane.b32.xlu1 %v6993_v3, %s7520_s4  ;;  %v5585_v6 = vpop.f32.mrb[53].mxu0  ;;  %5610 = vmatpush3.msra.mxu0 %v6993_v3 }
 0xf62   : > { %5612 = vmatmul.mubr.msk.f32.vlgmr.msra.gmra.mrb[54].mxu0 %vm900_vm1, %v6999_v53  ;;  %5952 = vmatprep.subr.bf16.mxu0 %v6321_v4 }
 0xf63   : > { %5614 = vmatprep.mubr.msk.f32.mxu0 %vm6320_vm0, %v6319_v1 }
 0xf65   : > { %3022 = vrot.lane.b32.xlu1 %v6672_v13, %s6324_s7 }
 0xf66   : > { %5615 = vmatmul.mubr.msk.f32.gmra.mrb[56].mxu0 %vm900_vm1, %v7009_v55 }
 0xf67   : > { %5617 = vmatprep.mubr.msk.f32.mxu0 %vm6320_vm0, %v6319_v1 }
 0xf69   : > { %3026 = vrot.lane.b32.xlu1 %v6687_v49, %s6324_s7 }
 0xf6a   : > { %5618 = vmatmul.mubr.msk.f32.gmra.mrb[58].mxu0 %vm900_vm1, %v7018_v10 }
 0xf6b   : > { %5620 = vmatprep.mubr.msk.f32.mxu0 %vm6320_vm0, %v6319_v1 }
 0xf6d   : > { %3030 = vrot.lane.b32.xlu1 %v6694_v11, %s6324_s7 }
 0xf6e   : > { %5621 = vmatmul.mubr.msk.f32.gmra.mrb[60].mxu0 %vm900_vm1, %v7027_v12 }
 0xf6f   : > { %5623 = vmatprep.mubr.msk.f32.mxu0 %vm6320_vm0, %v6319_v1 }
 0xf72   : > { %5624 = vmatmul.mubr.msk.f32.gmra.mrb[62].mxu0 %vm900_vm1, %v7034_v17 }
 0xf73   : > { %5626 = vmatprep.mubr.msk.f32.mxu0 %vm6320_vm0, %v6319_v1 }
 0xf76   : > { %5627 = vmatmul.mubr.msk.f32.gmra.mrb[64].mxu0 %vm900_vm1, %v7041_v22 }
 0xf77   : > { %5629 = vmatprep.mubr.msk.f32.mxu0 %vm6320_vm0, %v6319_v1 }
 0xf7a   : > { %5630 = vmatmul.mubr.msk.f32.gmra.mrb[66].mxu0 %vm900_vm1, %v7048_v23 }
 0xf7b   : > { %5675 = vmatprep.mubr.msk.f32.mxu0 %vm6320_vm0, %v6319_v1 }
 0xfd3   : > { %v2818_v58 = vpop.permute.xlu1 %2817 }
 0xfd4   : > { %5587 = vmatpush3.msra.mxu1 %v2818_v58 }
 0xfd5   : > { %5589 = vmatmul.mubr.msk.f32.vlgmr.msra.gmra.mrb[52].mxu1 %vm900_vm1, %v7055_v29  ;;  %5946 = vmatprep.subr.bf16.mxu1 %v6321_v4 }
 0xfd6   : > { %5591 = vmatprep.mubr.msk.f32.mxu1 %vm6320_vm0, %v6319_v1  ;;  %5948 = vmatpush3.bf16.msra.mxu1 %v5947_v19 }
 0xfd7   : > { %5949 = vmatprep.subr.bf16.mxu1 %v6321_v4  ;;  %v3023_v48 = vpop.permute.xlu1 %3022 }
 0xfd9   : > { %5592 = vmatmul.mubr.msk.f32.gmra.mrb[54].mxu1 %vm900_vm1, %v7063_v7 }
 0xfda   : > { %5594 = vmatprep.mubr.msk.f32.mxu1 %vm6320_vm0, %v6319_v1  ;;  %5951 = vmatpush3.bf16.msra.mxu1 %v5950_v30 }
 0xfdb   : > { %5973 = vmatprep.subr.bf16.mxu1 %v6321_v4 }
 0xfdd   : > { %5595 = vmatmul.mubr.msk.f32.gmra.mrb[56].mxu1 %vm900_vm1, %v7070_v16 }
 0xfde   : > { %5597 = vmatprep.mubr.msk.f32.mxu1 %vm6320_vm0, %v6319_v1 }
 0xfe1   : > { %5598 = vmatmul.mubr.msk.f32.gmra.mrb[58].mxu1 %vm900_vm1, %v7077_v32 }
 0xfe2   : > { %5600 = vmatprep.mubr.msk.f32.mxu1 %vm6320_vm0, %v6319_v1 }
 0xfe5   : > { %5601 = vmatmul.mubr.msk.f32.gmra.mrb[60].mxu1 %vm900_vm1, %v7084_v33 }
 0xfe6   : > { %5603 = vmatprep.mubr.msk.f32.mxu1 %vm6320_vm0, %v6319_v1 }
 0xfe9   : > { %5604 = vmatmul.mubr.msk.f32.gmra.mrb[62].mxu1 %vm900_vm1, %v7091_v0 }
 0xfea   : > { %5606 = vmatprep.mubr.msk.f32.mxu1 %vm6320_vm0, %v6319_v1 }
 0xfed   : > { %5607 = vmatmul.mubr.msk.f32.gmra.mrb[64].mxu1 %vm900_vm1, %v7098_v60 }
 0xfee   : > { %5640 = vmatprep.mubr.msk.f32.mxu1 %vm6320_vm0, %v6319_v1 }
0x1035   : > { %v2986_v37 = vpop.f32.mrb[54].mxu0 }
0x1036   : > { %v5613_v9 = vpop.f32.mrb[55].mxu0 }
0x1039   : > { %v2991_v21 = vpop.f32.mrb[56].mxu0 }
0x103a   : > { %v5616_v45 = vpop.f32.mrb[57].mxu0 }
0x103b   : > { %v3027_v45 = vpop.permute.xlu1 %3026 }
0x103d   : > { %v2996_v46 = vpop.f32.mrb[58].mxu0 }
0x103e   : > { %v5619_v5 = vpop.f32.mrb[59].mxu0 }
0x1041   : > { %v3001_v47 = vpop.f32.mrb[60].mxu0 }
0x1042   : > { %v5622_v20 = vpop.f32.mrb[61].mxu0 }
0x1045   : > { %v3006_v36 = vpop.f32.mrb[62].mxu0 }
0x1046   : > { %v5625_v38 = vpop.f32.mrb[63].mxu0 }
0x1049   : > { %v3011_v39 = vpop.f32.mrb[64].mxu0 }
0x104a   : > { %v5628_v40 = vpop.f32.mrb[65].mxu0 }
0x104d   : > { %v3016_v41 = vpop.f32.mrb[66].mxu0 }
0x104e   : > { %v5631_v42 = vpop.f32.mrb[67].mxu0 }
0x10a8   : > { %v2886_v43 = vpop.f32.mrb[52].mxu1 }
0x10a9   : > { %v2987_v25 = vadd.f32 %v2986_v37, %v2886_v43  ;;  %v5590_v35 = vpop.f32.mrb[53].mxu1 }
0x10ab   : > { %v3041_v52 = vadd.f32 %v3021_v51, %v2987_v25 }
0x10ac   : > { %v2891_v56 = vpop.f32.mrb[54].mxu1 }
0x10ad   : > { %v4977_v62 = vmul.f32 -1.442695, %v3041_v52  ;;  %v2992_v14 = vadd.f32 %v2991_v21, %v2891_v56  ;;  %v5593_v50 = vpop.f32.mrb[55].mxu1 }
0x10ae   : > { %v3033_v50 = vpop.permute.xlu0 %3032 }
0x10af   : > { %6168 = vpow2.f32 %v4977_v62  ;;  %v3042_v59 = vadd.f32 %v3023_v48, %v2992_v14 }
0x10b0   : > { %v2896_v61 = vpop.f32.mrb[56].mxu1 }
0x10b1   : > { %v4978_v54 = vmul.f32 -1.442695, %v3042_v59  ;;  %v2997_v63 = vadd.f32 %v2996_v46, %v2896_v61  ;;  %v5596_v2 = vpop.f32.mrb[57].mxu1 }
0x10b3   : > { %6170 = vpow2.f32 %v4978_v54  ;;  %v3043_v26 = vadd.f32 %v3025_v44, %v2997_v63 }
0x10b4   : > { %v2901_v6 = vpop.f32.mrb[58].mxu1 }
0x10b5   : > { %v4979_v58 = vmul.f32 -1.442695, %v3043_v26  ;;  %v3002_v37 = vadd.f32 %v3001_v47, %v2901_v6  ;;  %v5599_v9 = vpop.f32.mrb[59].mxu1  ;;  %v3031_v47 = vpop.permute.xlu1 %3030 }
0x10b7   : > { %6172 = vpow2.f32 %v4979_v58  ;;  %v3044_v5 = vadd.f32 %v3027_v45, %v3002_v37 }
0x10b8   : > { %v2906_v15 = vpop.f32.mrb[60].mxu1 }
0x10b9   : > { %v6169_v21 = vpop.eup %6168  ;;  %v4980_v18 = vmul.f32 -1.442695, %v3044_v5  ;;  %v3007_v19 = vadd.f32 %v3006_v36, %v2906_v15  ;;  %v5602_v20 = vpop.f32.mrb[61].mxu1 }
0x10ba   : > { %v3069_v27 = vadd.f32 1.0, %v6169_v21 }
0x10bb   : > { %6174 = vpow2.f32 %v4980_v18  ;;  %v3045_v46 = vadd.f32 %v3029_v24, %v3007_v19 }
0x10bc   : > { %6176 = vrcp.f32 %v3069_v27  ;;  %v2911_v30 = vpop.f32.mrb[62].mxu1 }
0x10bd   : > { %v6171_v38 = vpop.eup %6170  ;;  %v4981_v40 = vmul.f32 -1.442695, %v3045_v46  ;;  %v3012_v42 = vadd.f32 %v3011_v39, %v2911_v30  ;;  %v5605_v43 = vpop.f32.mrb[63].mxu1 }
0x10be   : > { %v3070_v25 = vadd.f32 1.0, %v6171_v38 }
0x10bf   : > { %6178 = vpow2.f32 %v4981_v40  ;;  %v3046_v35 = vadd.f32 %v3031_v47, %v3012_v42 }
0x10c0   : > { %6180 = vrcp.f32 %v3070_v25  ;;  %v2916_v51 = vpop.f32.mrb[64].mxu1 }
0x10c1   : > { %v6173_v56 = vpop.eup %6172  ;;  %v4982_v62 = vmul.f32 -1.442695, %v3046_v35  ;;  %v3017_v36 = vadd.f32 %v3016_v41, %v2916_v51  ;;  %v5608_v14 = vpop.f32.mrb[65].mxu1 }
0x10c2   : > { %v3071_v48 = vadd.f32 1.0, %v6173_v56 }
0x10c3   : > { %6182 = vpow2.f32 %v4982_v62  ;;  %v3047_v61 = vadd.f32 %v3033_v50, %v3017_v36 }
0x10c4   : > { %6184 = vrcp.f32 %v3071_v48 }
0x10c5   : > { %v6175_v54 = vpop.eup %6174  ;;  %v4983_v63 = vmul.f32 -1.442695, %v3047_v61 }
0x10c6   : > { %v6177_v2 = vpop.eup %6176  ;;  %v3072_v39 = vadd.f32 1.0, %v6175_v54 }
0x10c7   : > { %v3090_v44 = vmul.f32 %v6177_v2, %v3041_v52  ;;  %6186 = vpow2.f32 %v4983_v63 }
0x10c8   : > { %6188 = vrcp.f32 %v3072_v39 }
0x10c9   : > { %v6179_v6 = vpop.eup %6178  ;;  %5641 = vmatmul.mubr.msk.f32.vlgmr.msra.gmra.mrb[66].mxu1 %vm1126_vm2, %v3090_v44 }
0x10ca   : > { %v6181_v58 = vpop.eup %6180  ;;  %v3073_v37 = vadd.f32 1.0, %v6179_v6  ;;  %5643 = vmatprep.mubr.msk.f32.mxu1 %vm6320_vm0, %v6319_v1 }
0x10cb   : > { %v3091_v41 = vmul.f32 %v6181_v58, %v3042_v59 }
0x10cc   : > { %6190 = vrcp.f32 %v3073_v37 }
0x10cd   : > { %v6183_v9 = vpop.eup %6182  ;;  %5644 = vmatmul.mubr.msk.f32.gmra.mrb[68].mxu1 %vm1126_vm2, %v3091_v41 }
0x10ce   : > { %v6185_v45 = vpop.eup %6184  ;;  %v3074_v15 = vadd.f32 1.0, %v6183_v9  ;;  %5646 = vmatprep.mubr.msk.f32.mxu1 %vm6320_vm0, %v6319_v1 }
0x10cf   : > { %v3092_v52 = vmul.f32 %v6185_v45, %v3043_v26 }
0x10d0   : > { %6192 = vrcp.f32 %v3074_v15 }
0x10d1   : > { %v6187_v21 = vpop.eup %6186  ;;  %5647 = vmatmul.mubr.msk.f32.gmra.mrb[70].mxu1 %vm1126_vm2, %v3092_v52 }
0x10d2   : > { %v6189_v18 = vpop.eup %6188  ;;  %v3075_v19 = vadd.f32 1.0, %v6187_v21  ;;  %5649 = vmatprep.mubr.msk.f32.mxu1 %vm6320_vm0, %v6319_v1 }
0x10d3   : > { %v3093_v59 = vmul.f32 %v6189_v18, %v3044_v5 }
0x10d4   : > { %6194 = vrcp.f32 %v3075_v19 }
0x10d5   : > { %5650 = vmatmul.mubr.msk.f32.gmra.mrb[72].mxu1 %vm1126_vm2, %v3093_v59 }
0x10d6   : > { %v6191_v20 = vpop.eup %6190  ;;  %5652 = vmatprep.mubr.msk.f32.mxu1 %vm6320_vm0, %v6319_v1 }
0x10d7   : > { %v3094_v24 = vmul.f32 %v6191_v20, %v3045_v46  ;;  %v4989_v46 = vld [vmem:[%s7477_s12 + $0x2] ss:$0 sm:$0xff] }
0x10d9   : > { %5653 = vmatmul.mubr.msk.f32.gmra.mrb[74].mxu1 %vm1126_vm2, %v3094_v24 }
0x10da   : > { %v6193_v26 = vpop.eup %6192  ;;  %5655 = vmatprep.mubr.msk.f32.mxu1 %vm6320_vm0, %v6319_v1 }
0x10db   : > { %v3095_v27 = vmul.f32 %v6193_v26, %v3046_v35 }
0x10dd   : > { %5656 = vmatmul.mubr.msk.f32.gmra.mrb[76].mxu1 %vm1126_vm2, %v3095_v27 }
0x10de   : > { %v6195_v30 = vpop.eup %6194  ;;  %5658 = vmatprep.mubr.msk.f32.mxu1 %vm6320_vm0, %v6319_v1 }
0x10df   : > { %v3096_v5 = vmul.f32 %v6195_v30, %v3047_v61 }
0x10e1   : > { %5659 = vmatmul.mubr.msk.f32.gmra.mrb[78].mxu1 %vm1126_vm2, %v3096_v5 }
0x10e2   : > { %5708 = vmatprep.mubr.msk.f32.mxu1 %vm6320_vm0, %v6319_v1 }
0x119c   : > { %v3197_v38 = vpop.f32.mrb[66].mxu1 }
0x119d   : > { %v3198_v40 = vadd.f32 %v4989_v46, %v3197_v38  ;;  %v5642_v42 = vpop.f32.mrb[67].mxu1 }
0x119f   : > { %v4997_v43 = vmul.f32 -1.442695, %v3198_v40 }
0x11a0   : > { %v3202_v47 = vpop.f32.mrb[68].mxu1 }
0x11a1   : > { %6196 = vpow2.f32 %v4997_v43  ;;  %v3203_v25 = vadd.f32 %v4989_v46, %v3202_v47  ;;  %v5645_v35 = vpop.f32.mrb[69].mxu1 }
0x11a3   : > { %v4998_v51 = vmul.f32 -1.442695, %v3203_v25 }
0x11a4   : > { %v3207_v56 = vpop.f32.mrb[70].mxu1 }
0x11a5   : > { %6198 = vpow2.f32 %v4998_v51  ;;  %v3208_v62 = vadd.f32 %v4989_v46, %v3207_v56  ;;  %v5648_v36 = vpop.f32.mrb[71].mxu1 }
0x11a7   : > { %v4999_v14 = vmul.f32 -1.442695, %v3208_v62 }
0x11a8   : > { %v3212_v50 = vpop.f32.mrb[72].mxu1 }
0x11a9   : > { %6200 = vpow2.f32 %v4999_v14  ;;  %v3213_v48 = vadd.f32 %v4989_v46, %v3212_v50  ;;  %v5651_v61 = vpop.f32.mrb[73].mxu1 }
0x11ab   : > { %v6197_v54 = vpop.eup %6196  ;;  %v5000_v63 = vmul.f32 -1.442695, %v3213_v48 }
0x11ac   : > { %v3252_v2 = vadd.f32 1.0, %v6197_v54  ;;  %v3217_v39 = vpop.f32.mrb[74].mxu1 }
0x11ad   : > { %6202 = vpow2.f32 %v5000_v63  ;;  %v3218_v44 = vadd.f32 %v4989_v46, %v3217_v39  ;;  %v5654_v6 = vpop.f32.mrb[75].mxu1 }
0x11ae   : > { %6204 = vrcp.f32 %v3252_v2 }
0x11af   : > { %v6199_v58 = vpop.eup %6198  ;;  %v5001_v37 = vmul.f32 -1.442695, %v3218_v44 }
0x11b0   : > { %v3253_v41 = vadd.f32 1.0, %v6199_v58  ;;  %v3222_v9 = vpop.f32.mrb[76].mxu1 }
0x11b1   : > { %6206 = vpow2.f32 %v5001_v37  ;;  %v3223_v45 = vadd.f32 %v4989_v46, %v3222_v9  ;;  %v5657_v15 = vpop.f32.mrb[77].mxu1  ;;  %v5005_v37 = vld [vmem:[%s7478_s13 + $0x40] sm:$0xff]  ;;  %v5008_v9 = vld [vmem:[%s7478_s13 + $0x58] sm:$0xff] }
0x11b2   : > { %6208 = vrcp.f32 %v3253_v41 }
0x11b3   : > { %v6201_v52 = vpop.eup %6200  ;;  %v5002_v21 = vmul.f32 -1.442695, %v3223_v45 }
0x11b4   : > { %v3254_v18 = vadd.f32 1.0, %v6201_v52  ;;  %v3227_v19 = vpop.f32.mrb[78].mxu1 }
0x11b5   : > { %6210 = vpow2.f32 %v5002_v21  ;;  %v3228_v59 = vadd.f32 %v4989_v46, %v3227_v19  ;;  %v5660_v20 = vpop.f32.mrb[79].mxu1 }
0x11b6   : > { %6212 = vrcp.f32 %v3254_v18  ;;  %v5012_v20 = vld [vmem:[%s7481_s16 + $0x48] sm:$0xff] }
0x11b7   : > { %v6203_v24 = vpop.eup %6202  ;;  %v5003_v26 = vmul.f32 -1.442695, %v3228_v59 }
0x11b8   : > { %v3255_v27 = vadd.f32 1.0, %v6203_v24  ;;  %v6205_v30 = vpop.eup %6204  ;;  %v5013_v24 = vld [vmem:[%s7481_s16 + $0x50] sm:$0xff] }
0x11b9   : > { %6214 = vpow2.f32 %v5003_v26  ;;  %v3273_v43 = vmul.f32 %v6205_v30, %v3198_v40 }
0x11ba   : > { %6216 = vrcp.f32 %v3255_v27  ;;  %v5014_v27 = vld [vmem:[%s7481_s16 + $0x58] sm:$0xff] }
0x11bb   : > { %v6207_v5 = vpop.eup %6206  ;;  %v5971_v30 = vpack.c.bf16 %v5014_v27, %v5013_v24 }
0x11bc   : > { %v6209_v38 = vpop.eup %6208  ;;  %v3256_v42 = vadd.f32 1.0, %v6207_v5 }
0x11bd   : > { %v3274_v47 = vmul.f32 %v6209_v38, %v3203_v25 }
0x11be   : > { %6218 = vrcp.f32 %v3256_v42 }
0x11bf   : > { %v6211_v35 = vpop.eup %6210  ;;  %v5953_v51 = vpack.c.bf16 %v3274_v47, %v3273_v43 }
0x11c0   : > { %v3257_v56 = vadd.f32 1.0, %v6211_v35  ;;  %v6213_v36 = vpop.eup %6212 }
0x11c1   : > { %5954 = vmatpush3.bf16.msra.mxu0 %v5953_v51  ;;  %v3275_v61 = vmul.f32 %v6213_v36, %v3208_v62  ;;  %v5006_v62 = vld [vmem:[%s7478_s13 + $0x48] sm:$0xff]  ;;  %v5018_v36 = vld [vmem:[%s7510_s0 + $0x60] sm:$0xff] }
0x11c2   : > { %6220 = vrcp.f32 %v3257_v56  ;;  %5955 = vmatprep.subr.bf16.mxu0 %v6321_v4  ;;  %v5962_v41 = vpack.c.bf16 %v5006_v62, %v5005_v37 }
0x11c3   : > { %v6215_v46 = vpop.eup %6214 }
0x11c4   : > { %v6217_v14 = vpop.eup %6216  ;;  %v3258_v50 = vadd.f32 1.0, %v6215_v46  ;;  %v5020_v46 = vld [vmem:[%s7510_s0 + $0x70] sm:$0xff] }
0x11c5   : > { %v3276_v54 = vmul.f32 %v6217_v14, %v3213_v48 }
0x11c6   : > { %6222 = vrcp.f32 %v3258_v50  ;;  %v5021_v50 = vld [vmem:[%s7510_s0 + $0x78] sm:$0xff] }
0x11c7   : > { %v5956_v63 = vpack.c.bf16 %v3276_v54, %v3275_v61 }
0x11c8   : > { %v6219_v2 = vpop.eup %6218 }
0x11c9   : > { %5957 = vmatpush3.bf16.msra.mxu0 %v5956_v63  ;;  %v3277_v25 = vmul.f32 %v6219_v2, %v3218_v44  ;;  %v5007_v44 = vld [vmem:[%s7478_s13 + $0x50] sm:$0xff] }
0x11ca   : > { %5958 = vmatprep.subr.bf16.mxu0 %v6321_v4  ;;  %v5965_v15 = vpack.c.bf16 %v5008_v9, %v5007_v44 }
0x11cc   : > { %v6221_v40 = vpop.eup %6220 }
0x11cd   : > { %v3278_v39 = vmul.f32 %v6221_v40, %v3223_v45  ;;  %v7158_v45 = vld [vmem:[%s6735_s1] sm:$0xff] }
0x11cf   : > { %v5959_v6 = vpack.c.bf16 %v3278_v39, %v3277_v25 }
0x11d0   : > { %v6223_v58 = vpop.eup %6222 }
0x11d1   : > { %5960 = vmatpush3.bf16.msra.mxu0 %v5959_v6  ;;  %v3279_v48 = vmul.f32 %v6223_v58, %v3228_v59  ;;  %v5011_v59 = vld [vmem:[%s7481_s16 + $0x40] sm:$0xff] }
0x11d2   : > { %5673 = vmatprep.subr.mxu0 %v6319_v1  ;;  %v5968_v26 = vpack.c.bf16 %v5012_v20, %v5011_v59 }
0x11d5   : > { %5674 = vmatpush3.msra.mxu0 %v3279_v48 }
0x11d6   : > { %5676 = vmatmul.mubr.msk.f32.vlgmr.msra.gmra.mrb[68].mxu0 %vm1683_vm3, %v7158_v45  ;;  %5961 = vmatprep.subr.bf16.mxu0 %v6321_v4 }
0x11d7   : > { %5963 = vmatpush3.bf16.msra.mxu0 %v5962_v41  ;;  %5686 = vmatprep.mubr.msk.f32.mxu0 %vm6320_vm0, %v6319_v1 }
0x11d8   : > { %5964 = vmatprep.subr.bf16.mxu0 %v6321_v4 }
0x11db   : > { %5966 = vmatpush3.bf16.msra.mxu0 %v5965_v15 }
0x11dc   : > { %5967 = vmatprep.subr.bf16.mxu0 %v6321_v4 }
0x12a9   : > { %v3346_v52 = vpop.f32.mrb[68].mxu0 }
0x12aa   : > { %v5677_v21 = vpop.f32.mrb[69].mxu0  ;;  %5687 = vmatmul.mubr.msk.f32.vlgmr.msra.gmra.mrb[70].mxu0 %vm1126_vm2, %v3346_v52 }
0x12ab   : > { %5697 = vmatprep.mubr.msk.f32.mxu0 %vm6320_vm0, %v6319_v1  ;;  %5969 = vmatpush3.bf16.msra.mxu0 %v5968_v26 }
0x12ac   : > { %5970 = vmatprep.subr.bf16.mxu0 %v6321_v4 }
0x12af   : > { %5972 = vmatpush3.bf16.msra.mxu0 %v5971_v30 }
0x12b0   : > { %5711 = vmatprep.subr.mxu0 %v6319_v1 }
0x137d   : > { %v3424_v18 = vpop.f32.mrb[70].mxu0 }
0x137e   : > { %3429 = vrot.lane.b32.xlu1 %v3424_v18, %s6324_s7  ;;  %v5688_v19 = vpop.f32.mrb[71].mxu0 }
0x13f0   : > { %v3430_v5 = vpop.permute.xlu1 %3429 }
0x13f1   : > { %v3432_v38 = vadd.f32 %v3430_v5, %v6993_v3  ;;  %v5019_v3 = vld [vmem:[%s7510_s0 + $0x68] sm:$0xff] }
0x13f2   : > { %v5974_v14 = vpack.c.bf16 %v5019_v3, %v5018_v36 }
0x13f3   : > { %v3433_v42 = vadd.f32 %v3432_v38, %v6588_v34 }
0x13f4   : > { %5975 = vmatpush3.bf16.msra.mxu1 %v5974_v14 }
0x13f5   : > { %v5010_v43 = vmul.f32 -1.442695, %v3433_v42  ;;  %5976 = vmatprep.subr.bf16.mxu1 %v6321_v4 }
0x13f7   : > { %6224 = vpow2.f32 %v5010_v43 }
0x1401   : > { %v6225_v47 = vpop.eup %6224 }
0x1402   : > { %v3437_v35 = vadd.f32 1.0, %v6225_v47 }
0x1404   : > { %6226 = vrcp.f32 %v3437_v35 }
0x140e   : > { %v6227_v51 = vpop.eup %6226 }
0x140f   : > { %v3440_v56 = vmul.f32 %v6227_v51, %v3433_v42 }
0x1411   : > { %3455 = vrot.lane.b32.xlu0 %v3440_v56, %s6324_s7 }
0x1415   : > { %3811 = vrot.lane.b32.xlu0 %v6670_v8, %s7521_s29  ;;  %v5977_v8 = vpack.c.bf16 %v5021_v50, %v5020_v46 }
0x1417   : > { %5978 = vmatpush3.bf16.msra.mxu1 %v5977_v8 }
0x1418   : > { %5734 = vmatprep.subr.mxu1 %v6319_v1 }
0x1419   : > { %3815 = vrot.lane.b32.xlu0 %v6681_v31, %s7521_s29  ;;  %v5016_v31 = vld [vmem:[%s7482_s17 + $0x2] ss:$0 sm:$0xff] }
0x141d   : > { %3819 = vrot.lane.b32.xlu0 %v6691_v57, %s7521_s29 }
0x1421   : > { %3823 = vrot.lane.b32.xlu0 %v6697_v28, %s7521_s29 }
0x1425   : > { %4224 = vrot.lane.b32.xlu0 %v6588_v34, %s7520_s4 }
0x1483   : > { %v3456_v61 = vpop.permute.xlu0 %3455 }
0x1484   : > { %5698 = vmatmul.mubr.msk.f32.vlgmr.msra.gmra.mrb[72].mxu0 %vm1126_vm2, %v3456_v61 }
0x1485   : > { %5713 = vmatprep.mubr.msk.f32.mxu0 %vm6320_vm0, %v6319_v1 }
0x1487   : > { %v3812_v62 = vpop.permute.xlu0 %3811 }
0x148b   : > { %v3816_v24 = vpop.permute.xlu0 %3815 }
0x148f   : > { %v3820_v3 = vpop.permute.xlu0 %3819 }
0x1557   : > { %v3525_v57 = vpop.f32.mrb[72].mxu0 }
0x1558   : > { %v3526_v54 = vadd.f32 %v5016_v31, %v3525_v57  ;;  %v5699_v63 = vpop.f32.mrb[73].mxu0 }
0x155a   : > { %5709 = vmatmul.mubr.msk.f32.vlgmr.msra.gmra.mrb[80].mxu1 %vm1126_vm2, %v3526_v54 }
0x155b   : > { %5736 = vmatprep.mubr.msk.f32.mxu1 %vm6320_vm0, %v6319_v1 }
0x162d   : > { %v7221_v28 = vpop.f32.mrb[80].mxu1 }
0x162e   : > { %3608 = vrot.lane.b32.xlu1 %v7221_v28, %s7520_s4  ;;  %v5710_v34 = vpop.f32.mrb[81].mxu1  ;;  %5735 = vmatpush3.msra.mxu1 %v7221_v28 }
0x162f   : > { %5737 = vmatmul.mubr.msk.f32.vlgmr.msra.gmra.mrb[82].mxu1 %vm900_vm1, %v6999_v53  ;;  %5985 = vmatprep.subr.bf16.mxu1 %v6321_v4 }
0x1630   : > { %5739 = vmatprep.mubr.msk.f32.mxu1 %vm6320_vm0, %v6319_v1 }
0x1632   : > { %3813 = vrot.lane.b32.xlu1 %v6672_v13, %s7521_s29 }
0x1633   : > { %5740 = vmatmul.mubr.msk.f32.gmra.mrb[84].mxu1 %vm900_vm1, %v7009_v55 }
0x1634   : > { %5742 = vmatprep.mubr.msk.f32.mxu1 %vm6320_vm0, %v6319_v1 }
0x1636   : > { %3817 = vrot.lane.b32.xlu1 %v6687_v49, %s7521_s29 }
0x1637   : > { %5743 = vmatmul.mubr.msk.f32.gmra.mrb[86].mxu1 %vm900_vm1, %v7018_v10 }
0x1638   : > { %5745 = vmatprep.mubr.msk.f32.mxu1 %vm6320_vm0, %v6319_v1 }
0x163a   : > { %3821 = vrot.lane.b32.xlu1 %v6694_v11, %s7521_s29 }
0x163b   : > { %5746 = vmatmul.mubr.msk.f32.gmra.mrb[88].mxu1 %vm900_vm1, %v7027_v12 }
0x163c   : > { %5748 = vmatprep.mubr.msk.f32.mxu1 %vm6320_vm0, %v6319_v1 }
0x163f   : > { %5749 = vmatmul.mubr.msk.f32.gmra.mrb[90].mxu1 %vm900_vm1, %v7034_v17  ;;  %v5044_v17 = vld [vmem:[%s7476_s11 + $0x60] sm:$0xff] }
0x1640   : > { %5751 = vmatprep.mubr.msk.f32.mxu1 %vm6320_vm0, %v6319_v1 }
0x1643   : > { %5752 = vmatmul.mubr.msk.f32.gmra.mrb[92].mxu1 %vm900_vm1, %v7041_v22  ;;  %v5045_v22 = vld [vmem:[%s7476_s11 + $0x68] sm:$0xff] }
0x1644   : > { %5754 = vmatprep.mubr.msk.f32.mxu1 %vm6320_vm0, %v6319_v1 }
0x1647   : > { %5755 = vmatmul.mubr.msk.f32.gmra.mrb[94].mxu1 %vm900_vm1, %v7048_v23  ;;  %v5980_v23 = vpack.c.bf16 %v5045_v22, %v5044_v17 }
0x1648   : > { %5800 = vmatprep.mubr.msk.f32.mxu1 %vm6320_vm0, %v6319_v1 }
0x16a0   : > { %v3609_v13 = vpop.permute.xlu1 %3608 }
0x16a1   : > { %5712 = vmatpush3.msra.mxu0 %v3609_v13 }
0x16a2   : > { %5714 = vmatmul.mubr.msk.f32.vlgmr.msra.gmra.mrb[74].mxu0 %vm900_vm1, %v7055_v29  ;;  %5979 = vmatprep.subr.bf16.mxu0 %v6321_v4 }
0x16a3   : > { %5716 = vmatprep.mubr.msk.f32.mxu0 %vm6320_vm0, %v6319_v1  ;;  %5981 = vmatpush3.bf16.msra.mxu0 %v5980_v23 }
0x16a4   : > { %5982 = vmatprep.subr.bf16.mxu0 %v6321_v4  ;;  %v3814_v52 = vpop.permute.xlu1 %3813 }
0x16a6   : > { %5717 = vmatmul.mubr.msk.f32.gmra.mrb[76].mxu0 %vm900_vm1, %v7063_v7 }
0x16a7   : > { %5719 = vmatprep.mubr.msk.f32.mxu0 %vm6320_vm0, %v6319_v1 }
0x16a8   : > { %v3818_v42 = vpop.permute.xlu1 %3817 }
0x16aa   : > { %5720 = vmatmul.mubr.msk.f32.gmra.mrb[78].mxu0 %vm900_vm1, %v7070_v16  ;;  %v5046_v16 = vld [vmem:[%s7476_s11 + $0x70] sm:$0xff] }
0x16ab   : > { %5722 = vmatprep.mubr.msk.f32.mxu0 %vm6320_vm0, %v6319_v1 }
0x16ac   : > { %v3822_v54 = vpop.permute.xlu1 %3821 }
0x16ae   : > { %5723 = vmatmul.mubr.msk.f32.gmra.mrb[80].mxu0 %vm900_vm1, %v7077_v32  ;;  %v5047_v32 = vld [vmem:[%s7476_s11 + $0x78] sm:$0xff] }
0x16af   : > { %5725 = vmatprep.mubr.msk.f32.mxu0 %vm6320_vm0, %v6319_v1 }
0x16b2   : > { %5726 = vmatmul.mubr.msk.f32.gmra.mrb[82].mxu0 %vm900_vm1, %v7084_v33  ;;  %v5983_v33 = vpack.c.bf16 %v5047_v32, %v5046_v16 }
0x16b3   : > { %5728 = vmatprep.mubr.msk.f32.mxu0 %vm6320_vm0, %v6319_v1 }
0x16b4   : > { %5984 = vmatpush3.bf16.msra.mxu0 %v5983_v33 }
0x16b5   : > { %6006 = vmatprep.subr.bf16.mxu0 %v6321_v4 }
0x16b6   : > { %5729 = vmatmul.mubr.msk.f32.gmra.mrb[84].mxu0 %vm900_vm1, %v7091_v0 }
0x16b7   : > { %5731 = vmatprep.mubr.msk.f32.mxu0 %vm6320_vm0, %v6319_v1 }
0x16ba   : > { %5732 = vmatmul.mubr.msk.f32.gmra.mrb[86].mxu0 %vm900_vm1, %v7098_v60 }
0x16bb   : > { %5765 = vmatprep.mubr.msk.f32.mxu0 %vm6320_vm0, %v6319_v1 }
0x1702   : > { %v3777_v49 = vpop.f32.mrb[82].mxu1 }
0x1703   : > { %v5738_v11 = vpop.f32.mrb[83].mxu1 }
0x1706   : > { %v3782_v53 = vpop.f32.mrb[84].mxu1 }
0x1707   : > { %v5741_v55 = vpop.f32.mrb[85].mxu1 }
0x170a   : > { %v3787_v10 = vpop.f32.mrb[86].mxu1 }
0x170b   : > { %v5744_v12 = vpop.f32.mrb[87].mxu1 }
0x170e   : > { %v3792_v29 = vpop.f32.mrb[88].mxu1 }
0x170f   : > { %v5747_v7 = vpop.f32.mrb[89].mxu1 }
0x1712   : > { %v3797_v0 = vpop.f32.mrb[90].mxu1 }
0x1713   : > { %v5750_v60 = vpop.f32.mrb[91].mxu1 }
0x1716   : > { %v3802_v2 = vpop.f32.mrb[92].mxu1 }
0x1717   : > { %v5753_v40 = vpop.f32.mrb[93].mxu1 }
0x171a   : > { %v3807_v25 = vpop.f32.mrb[94].mxu1 }
0x171b   : > { %v5756_v39 = vpop.f32.mrb[95].mxu1 }
0x1775   : > { %v3677_v6 = vpop.f32.mrb[74].mxu0 }
0x1776   : > { %v3778_v58 = vadd.f32 %v3777_v49, %v3677_v6  ;;  %v5715_v37 = vpop.f32.mrb[75].mxu0 }
0x1778   : > { %v3832_v48 = vadd.f32 %v3812_v62, %v3778_v58 }
0x1779   : > { %v3682_v41 = vpop.f32.mrb[76].mxu0 }
0x177a   : > { %v5037_v44 = vmul.f32 -1.442695, %v3832_v48  ;;  %v3783_v9 = vadd.f32 %v3782_v53, %v3682_v41  ;;  %v5718_v15 = vpop.f32.mrb[77].mxu0 }
0x177c   : > { %6228 = vpow2.f32 %v5037_v44  ;;  %v3833_v21 = vadd.f32 %v3814_v52, %v3783_v9 }
0x177d   : > { %v3687_v18 = vpop.f32.mrb[78].mxu0 }
0x177e   : > { %v5038_v19 = vmul.f32 -1.442695, %v3833_v21  ;;  %v3788_v59 = vadd.f32 %v3787_v10, %v3687_v18  ;;  %v5721_v20 = vpop.f32.mrb[79].mxu0  ;;  %v3824_v10 = vpop.permute.xlu0 %3823 }
0x1780   : > { %6230 = vpow2.f32 %v5038_v19  ;;  %v3834_v26 = vadd.f32 %v3816_v24, %v3788_v59 }
0x1781   : > { %v3692_v27 = vpop.f32.mrb[80].mxu0 }
0x1782   : > { %v5039_v30 = vmul.f32 -1.442695, %v3834_v26  ;;  %v3793_v5 = vadd.f32 %v3792_v29, %v3692_v27  ;;  %v5724_v38 = vpop.f32.mrb[81].mxu0 }
0x1784   : > { %6232 = vpow2.f32 %v5039_v30  ;;  %v3835_v43 = vadd.f32 %v3818_v42, %v3793_v5 }
0x1785   : > { %v3697_v47 = vpop.f32.mrb[82].mxu0 }
0x1786   : > { %v6229_v35 = vpop.eup %6228  ;;  %v5040_v51 = vmul.f32 -1.442695, %v3835_v43  ;;  %v3798_v56 = vadd.f32 %v3797_v0, %v3697_v47  ;;  %v5727_v36 = vpop.f32.mrb[83].mxu0 }
0x1787   : > { %v3860_v46 = vadd.f32 1.0, %v6229_v35 }
0x1788   : > { %6234 = vpow2.f32 %v5040_v51  ;;  %v3836_v14 = vadd.f32 %v3820_v3, %v3798_v56 }
0x1789   : > { %6236 = vrcp.f32 %v3860_v46  ;;  %v3702_v50 = vpop.f32.mrb[84].mxu0 }
0x178a   : > { %v6231_v8 = vpop.eup %6230  ;;  %v5041_v61 = vmul.f32 -1.442695, %v3836_v14  ;;  %v3803_v31 = vadd.f32 %v3802_v2, %v3702_v50  ;;  %v5730_v57 = vpop.f32.mrb[85].mxu0 }
0x178b   : > { %v3861_v63 = vadd.f32 1.0, %v6231_v8 }
0x178c   : > { %6238 = vpow2.f32 %v5041_v61  ;;  %v3837_v34 = vadd.f32 %v3822_v54, %v3803_v31 }
0x178d   : > { %6240 = vrcp.f32 %v3861_v63  ;;  %v3707_v13 = vpop.f32.mrb[86].mxu0 }
0x178e   : > { %v6233_v49 = vpop.eup %6232  ;;  %v5042_v11 = vmul.f32 -1.442695, %v3837_v34  ;;  %v3808_v53 = vadd.f32 %v3807_v25, %v3707_v13  ;;  %v5733_v55 = vpop.f32.mrb[87].mxu0 }
0x178f   : > { %v3862_v12 = vadd.f32 1.0, %v6233_v49 }
0x1790   : > { %6242 = vpow2.f32 %v5042_v11  ;;  %v3838_v17 = vadd.f32 %v3824_v10, %v3808_v53 }
0x1791   : > { %6244 = vrcp.f32 %v3862_v12 }
0x1792   : > { %v6235_v22 = vpop.eup %6234  ;;  %v5043_v23 = vmul.f32 -1.442695, %v3838_v17 }
0x1793   : > { %v6237_v29 = vpop.eup %6236  ;;  %v3863_v7 = vadd.f32 1.0, %v6235_v22 }
0x1794   : > { %v3881_v16 = vmul.f32 %v6237_v29, %v3832_v48  ;;  %6246 = vpow2.f32 %v5043_v23 }
0x1795   : > { %6248 = vrcp.f32 %v3863_v7 }
0x1796   : > { %v6239_v32 = vpop.eup %6238  ;;  %5766 = vmatmul.mubr.msk.f32.vlgmr.msra.gmra.mrb[88].mxu0 %vm1126_vm2, %v3881_v16 }
0x1797   : > { %v6241_v33 = vpop.eup %6240  ;;  %v3864_v0 = vadd.f32 1.0, %v6239_v32  ;;  %5768 = vmatprep.mubr.msk.f32.mxu0 %vm6320_vm0, %v6319_v1 }
0x1798   : > { %v3882_v60 = vmul.f32 %v6241_v33, %v3833_v21  ;;  %v5049_v21 = vld [vmem:[%s7477_s12 + $0x3] ss:$0 sm:$0xff] }
0x1799   : > { %6250 = vrcp.f32 %v3864_v0 }
0x179a   : > { %v6243_v2 = vpop.eup %6242  ;;  %5769 = vmatmul.mubr.msk.f32.gmra.mrb[90].mxu0 %vm1126_vm2, %v3882_v60 }
0x179b   : > { %v6245_v40 = vpop.eup %6244  ;;  %v3865_v25 = vadd.f32 1.0, %v6243_v2  ;;  %5771 = vmatprep.mubr.msk.f32.mxu0 %vm6320_vm0, %v6319_v1 }
0x179c   : > { %v3883_v39 = vmul.f32 %v6245_v40, %v3834_v26 }
0x179d   : > { %6252 = vrcp.f32 %v3865_v25 }
0x179e   : > { %v6247_v6 = vpop.eup %6246  ;;  %5772 = vmatmul.mubr.msk.f32.gmra.mrb[92].mxu0 %vm1126_vm2, %v3883_v39 }
0x179f   : > { %v6249_v58 = vpop.eup %6248  ;;  %v3866_v37 = vadd.f32 1.0, %v6247_v6  ;;  %5774 = vmatprep.mubr.msk.f32.mxu0 %vm6320_vm0, %v6319_v1 }
0x17a0   : > { %v3884_v62 = vmul.f32 %v6249_v58, %v3835_v43 }
0x17a1   : > { %6254 = vrcp.f32 %v3866_v37 }
0x17a2   : > { %5775 = vmatmul.mubr.msk.f32.gmra.mrb[94].mxu0 %vm1126_vm2, %v3884_v62 }
0x17a3   : > { %v6251_v48 = vpop.eup %6250  ;;  %5777 = vmatprep.mubr.msk.f32.mxu0 %vm6320_vm0, %v6319_v1 }
0x17a4   : > { %v3885_v41 = vmul.f32 %v6251_v48, %v3836_v14 }
0x17a6   : > { %5778 = vmatmul.mubr.msk.f32.gmra.mrb[96].mxu0 %vm1126_vm2, %v3885_v41 }
0x17a7   : > { %v6253_v44 = vpop.eup %6252  ;;  %5780 = vmatprep.mubr.msk.f32.mxu0 %vm6320_vm0, %v6319_v1 }
0x17a8   : > { %v3886_v9 = vmul.f32 %v6253_v44, %v3837_v34 }
0x17aa   : > { %5781 = vmatmul.mubr.msk.f32.gmra.mrb[98].mxu0 %vm1126_vm2, %v3886_v9 }
0x17ab   : > { %v6255_v15 = vpop.eup %6254  ;;  %5783 = vmatprep.mubr.msk.f32.mxu0 %vm6320_vm0, %v6319_v1 }
0x17ac   : > { %v3887_v52 = vmul.f32 %v6255_v15, %v3838_v17 }
0x17ae   : > { %5784 = vmatmul.mubr.msk.f32.gmra.mrb[100].mxu0 %vm1126_vm2, %v3887_v52  ;;  %v5065_v52 = vld [vmem:[%s7478_s13 + $0x60] sm:$0xff] }
0x17af   : > { %5833 = vmatprep.mubr.msk.f32.mxu0 %vm6320_vm0, %v6319_v1 }
0x1869   : > { %v3988_v18 = vpop.f32.mrb[88].mxu0 }
0x186a   : > { %v3989_v19 = vadd.f32 %v5049_v21, %v3988_v18  ;;  %v5767_v59 = vpop.f32.mrb[89].mxu0 }
0x186b   : > { %v5067_v59 = vld [vmem:[%s7478_s13 + $0x70] sm:$0xff] }
0x186c   : > { %v5057_v20 = vmul.f32 -1.442695, %v3989_v19 }
0x186d   : > { %v3993_v24 = vpop.f32.mrb[90].mxu0 }
0x186e   : > { %6256 = vpow2.f32 %v5057_v20  ;;  %v3994_v26 = vadd.f32 %v5049_v21, %v3993_v24  ;;  %v5770_v27 = vpop.f32.mrb[91].mxu0  ;;  %v5068_v20 = vld [vmem:[%s7478_s13 + $0x78] sm:$0xff] }
0x186f   : > { %v5998_v24 = vpack.c.bf16 %v5068_v20, %v5067_v59  ;;  %v4658_v59 = vld [vmem:[%s7489_s24 + $0x8] sm:$0xff] }
0x1870   : > { %v5058_v30 = vmul.f32 -1.442695, %v3994_v26 }
0x1871   : > { %v3998_v5 = vpop.f32.mrb[92].mxu0 }
0x1872   : > { %6258 = vpow2.f32 %v5058_v30  ;;  %v3999_v38 = vadd.f32 %v5049_v21, %v3998_v5  ;;  %v5773_v42 = vpop.f32.mrb[93].mxu0  ;;  %v5071_v5 = vld [vmem:[%s7481_s16 + $0x60] sm:$0xff] }
0x1873   : > { %v5073_v42 = vld [vmem:[%s7481_s16 + $0x70] sm:$0xff] }
0x1874   : > { %v5059_v43 = vmul.f32 -1.442695, %v3999_v38 }
0x1875   : > { %v4003_v47 = vpop.f32.mrb[94].mxu0 }
0x1876   : > { %6260 = vpow2.f32 %v5059_v43  ;;  %v4004_v35 = vadd.f32 %v5049_v21, %v4003_v47  ;;  %v5776_v51 = vpop.f32.mrb[95].mxu0  ;;  %v5074_v47 = vld [vmem:[%s7481_s16 + $0x78] sm:$0xff] }
0x1878   : > { %v6257_v56 = vpop.eup %6256  ;;  %v5060_v36 = vmul.f32 -1.442695, %v4004_v35 }
0x1879   : > { %v4043_v3 = vadd.f32 1.0, %v6257_v56  ;;  %v4008_v46 = vpop.f32.mrb[96].mxu0 }
0x187a   : > { %6262 = vpow2.f32 %v5060_v36  ;;  %v4009_v14 = vadd.f32 %v5049_v21, %v4008_v46  ;;  %v5779_v50 = vpop.f32.mrb[97].mxu0  ;;  %v4225_v36 = vpop.permute.xlu0 %4224 }
0x187b   : > { %6264 = vrcp.f32 %v4043_v3 }
0x187c   : > { %v6259_v8 = vpop.eup %6258  ;;  %v5061_v61 = vmul.f32 -1.442695, %v4009_v14 }
0x187d   : > { %v4044_v31 = vadd.f32 1.0, %v6259_v8  ;;  %v4013_v57 = vpop.f32.mrb[98].mxu0  ;;  %v4323_v8 = vld [vmem:[%s7483_s18] sm:$0xff] }
0x187e   : > { %6266 = vpow2.f32 %v5061_v61  ;;  %v4014_v54 = vadd.f32 %v5049_v21, %v4013_v57  ;;  %v5782_v63 = vpop.f32.mrb[99].mxu0  ;;  %v4324_v61 = vld [vmem:[%s7483_s18 + $0x8] sm:$0xff]  ;;  %v4326_v57 = vld [vmem:[%s7483_s18 + $0x18] sm:$0xff] }
0x187f   : > { %6268 = vrcp.f32 %v4044_v31  ;;  %v4325_v31 = vld [vmem:[%s7483_s18 + $0x10] sm:$0xff] }
0x1880   : > { %v6261_v34 = vpop.eup %6260  ;;  %v5062_v13 = vmul.f32 -1.442695, %v4014_v54 }
0x1881   : > { %v4045_v49 = vadd.f32 1.0, %v6261_v34  ;;  %v4018_v11 = vpop.f32.mrb[100].mxu0 }
0x1882   : > { %6270 = vpow2.f32 %v5062_v13  ;;  %v4019_v53 = vadd.f32 %v5049_v21, %v4018_v11  ;;  %v5785_v55 = vpop.f32.mrb[101].mxu0  ;;  %v5066_v21 = vld [vmem:[%s7478_s13 + $0x68] sm:$0xff] }
0x1883   : > { %6272 = vrcp.f32 %v4045_v49  ;;  %v5076_v49 = vld [vmem:[%s7482_s17 + $0x3] ss:$0 sm:$0xff] }
0x1884   : > { %v6263_v10 = vpop.eup %6262  ;;  %v5063_v12 = vmul.f32 -1.442695, %v4019_v53 }
0x1885   : > { %v4046_v17 = vadd.f32 1.0, %v6263_v10  ;;  %v6265_v22 = vpop.eup %6264  ;;  %v4414_v10 = vld [vmem:[%s7485_s20] sm:$0xff] }
0x1886   : > { %6274 = vpow2.f32 %v5063_v12  ;;  %v4064_v16 = vmul.f32 %v6265_v22, %v3989_v19  ;;  %v5995_v19 = vpack.c.bf16 %v5066_v21, %v5065_v52  ;;  %v4415_v12 = vld [vmem:[%s7485_s20 + $0x8] sm:$0xff]  ;;  %v4416_v22 = vld [vmem:[%s7485_s20 + $0x10] sm:$0xff]  ;;  %v4498_v52 = vld [vmem:[%s872_s10] sm:$0x1] }
0x1887   : > { %6276 = vrcp.f32 %v4046_v17  ;;  %v6013_v17 = vpack.c.bf16 %v4415_v12, %v4414_v10 }
0x1888   : > { %v6267_v23 = vpop.eup %6266 }
0x1889   : > { %v6269_v29 = vpop.eup %6268  ;;  %v4047_v7 = vadd.f32 1.0, %v6267_v23  ;;  %v4417_v23 = vld [vmem:[%s7485_s20 + $0x18] sm:$0xff] }
0x188a   : > { %v4065_v32 = vmul.f32 %v6269_v29, %v3994_v26  ;;  %v6016_v29 = vpack.c.bf16 %v4417_v23, %v4416_v22 }
0x188b   : > { %6278 = vrcp.f32 %v4047_v7  ;;  %v5078_v7 = vld [vmem:[%s7484_s19] ss:$0 sm:$0xff] }
0x188c   : > { %v6271_v33 = vpop.eup %6270  ;;  %v5986_v0 = vpack.c.bf16 %v4065_v32, %v4064_v16 }
0x188d   : > { %v4048_v60 = vadd.f32 1.0, %v6271_v33  ;;  %v6273_v2 = vpop.eup %6272 }
0x188e   : > { %5987 = vmatpush3.bf16.msra.mxu1 %v5986_v0  ;;  %v4066_v6 = vmul.f32 %v6273_v2, %v3999_v38  ;;  %v5072_v38 = vld [vmem:[%s7481_s16 + $0x68] sm:$0xff] }
0x188f   : > { %6280 = vrcp.f32 %v4048_v60  ;;  %5988 = vmatprep.subr.bf16.mxu1 %v6321_v4  ;;  %v6001_v43 = vpack.c.bf16 %v5072_v38, %v5071_v5 }
0x1890   : > { %v6275_v40 = vpop.eup %6274 }
0x1891   : > { %v6277_v25 = vpop.eup %6276  ;;  %v4049_v39 = vadd.f32 1.0, %v6275_v40 }
0x1892   : > { %v4067_v58 = vmul.f32 %v6277_v25, %v4004_v35  ;;  %v6004_v35 = vpack.c.bf16 %v5074_v47, %v5073_v42 }
0x1893   : > { %6282 = vrcp.f32 %v4049_v39  ;;  %v4572_v39 = vld [vmem:[%s7487_s22] sm:$0xff] }
0x1894   : > { %v5989_v37 = vpack.c.bf16 %v4067_v58, %v4066_v6  ;;  %v4573_v6 = vld [vmem:[%s7487_s22 + $0x8] sm:$0xff]  ;;  %v4574_v58 = vld [vmem:[%s7487_s22 + $0x10] sm:$0xff] }
0x1895   : > { %v6279_v62 = vpop.eup %6278 }
0x1896   : > { %5990 = vmatpush3.bf16.msra.mxu1 %v5989_v37  ;;  %v4068_v41 = vmul.f32 %v6279_v62, %v4009_v14  ;;  %v6019_v37 = vpack.c.bf16 %v4573_v6, %v4572_v39  ;;  %v4575_v62 = vld [vmem:[%s7487_s22 + $0x18] sm:$0xff] }
0x1897   : > { %5991 = vmatprep.subr.bf16.mxu1 %v6321_v4 }
0x1899   : > { %v6281_v48 = vpop.eup %6280 }
0x189a   : > { %v4069_v44 = vmul.f32 %v6281_v48, %v4014_v54  ;;  %v6010_v54 = vpack.c.bf16 %v4326_v57, %v4325_v31  ;;  %v6022_v48 = vpack.c.bf16 %v4575_v62, %v4574_v58 }
0x189c   : > { %v5992_v9 = vpack.c.bf16 %v4069_v44, %v4068_v41  ;;  %v5081_v41 = vld [vmem:[%s7486_s21] ss:$0 sm:$0xff] }
0x189d   : > { %v6283_v15 = vpop.eup %6282 }
0x189e   : > { %5993 = vmatpush3.bf16.msra.mxu1 %v5992_v9  ;;  %v4070_v18 = vmul.f32 %v6283_v15, %v4019_v53 }
0x189f   : > { %5798 = vmatprep.subr.mxu1 %v6319_v1 }
0x18a2   : > { %5799 = vmatpush3.msra.mxu1 %v4070_v18 }
0x18a3   : > { %5801 = vmatmul.mubr.msk.f32.vlgmr.msra.gmra.mrb[96].mxu1 %vm1683_vm3, %v7158_v45  ;;  %5994 = vmatprep.subr.bf16.mxu1 %v6321_v4 }
0x18a4   : > { %5996 = vmatpush3.bf16.msra.mxu1 %v5995_v19  ;;  %5811 = vmatprep.mubr.msk.f32.mxu1 %vm6320_vm0, %v6319_v1  ;;  %v4657_v19 = vld [vmem:[%s7489_s24] sm:$0xff] }
0x18a5   : > { %5997 = vmatprep.subr.bf16.mxu1 %v6321_v4  ;;  %v6025_v20 = vpack.c.bf16 %v4658_v59, %v4657_v19 }
0x18a8   : > { %5999 = vmatpush3.bf16.msra.mxu1 %v5998_v24  ;;  %v4660_v24 = vld [vmem:[%s7489_s24 + $0x18] sm:$0xff] }
0x18a9   : > { %6000 = vmatprep.subr.bf16.mxu1 %v6321_v4 }
0x1976   : > { %v4137_v26 = vpop.f32.mrb[96].mxu1 }
0x1977   : > { %5812 = vmatmul.mubr.msk.f32.vlgmr.msra.gmra.mrb[98].mxu1 %vm1126_vm2, %v4137_v26  ;;  %v5802_v27 = vpop.f32.mrb[97].mxu1 }
0x1978   : > { %5822 = vmatprep.mubr.msk.f32.mxu1 %vm6320_vm0, %v6319_v1  ;;  %6002 = vmatpush3.bf16.msra.mxu1 %v6001_v43  ;;  %v4576_v27 = vld [vmem:[%s7488_s23] sm:$0x1] }
0x1979   : > { %6003 = vmatprep.subr.bf16.mxu1 %v6321_v4 }
0x197c   : > { %6005 = vmatpush3.bf16.msra.mxu1 %v6004_v35  ;;  %v4661_v35 = vld [vmem:[%s7490_s25] sm:$0x1] }
0x197d   : > { %6012 = vmatprep.subr.bf16.mxu1 %v6321_v4 }
0x1a4a   : > { %v4215_v45 = vpop.f32.mrb[98].mxu1 }
0x1a4b   : > { %4220 = vrot.lane.b32.xlu1 %v4215_v45, %s6324_s7  ;;  %v5813_v30 = vpop.f32.mrb[99].mxu1 }
0x1abd   : > { %v4221_v51 = vpop.permute.xlu1 %4220 }
0x1abe   : > { %v4223_v56 = vadd.f32 %v4221_v51, %v7221_v28  ;;  %v6007_v28 = vpack.c.bf16 %v4324_v61, %v4323_v8 }
0x1ac0   : > { %v4227_v3 = vadd.f32 %v4225_v36, %v4223_v56  ;;  %6008 = vmatpush3.bf16.msra.mxu0 %v6007_v28 }
0x1ac1   : > { %6009 = vmatprep.subr.bf16.mxu0 %v6321_v4 }
0x1ac2   : > { %v5070_v46 = vmul.f32 -1.442695, %v4227_v3 }
0x1ac4   : > { %6284 = vpow2.f32 %v5070_v46  ;;  %6011 = vmatpush3.bf16.msra.mxu0 %v6010_v54 }
0x1ac5   : > { %5847 = vmatprep.subr.mxu0 %v6319_v1 }
0x1ace   : > { %v6285_v14 = vpop.eup %6284 }
0x1acf   : > { %v4231_v50 = vadd.f32 1.0, %v6285_v14 }
0x1ad1   : > { %6286 = vrcp.f32 %v4231_v50 }
0x1adb   : > { %v6287_v63 = vpop.eup %6286 }
0x1adc   : > { %v4234_v34 = vmul.f32 %v6287_v63, %v4227_v3 }
0x1ade   : > { %4249 = vrot.lane.b32.xlu1 %v4234_v34, %s6324_s7 }
0x1b50   : > { %v4250_v13 = vpop.permute.xlu1 %4249 }
0x1b51   : > { %5823 = vmatmul.mubr.msk.f32.vlgmr.msra.gmra.mrb[100].mxu1 %vm1126_vm2, %v4250_v13 }
0x1b52   : > { %5844 = vmatprep.mubr.msk.f32.mxu1 %vm6320_vm0, %v6319_v1  ;;  %6014 = vmatpush3.bf16.msra.mxu1 %v6013_v17 }
0x1b53   : > { %6015 = vmatprep.subr.bf16.mxu1 %v6321_v4 }
0x1b56   : > { %6017 = vmatpush3.bf16.msra.mxu1 %v6016_v29 }
0x1b57   : > { %6018 = vmatprep.subr.bf16.mxu1 %v6321_v4 }
0x1c24   : > { %v4319_v11 = vpop.f32.mrb[100].mxu1 }
0x1c25   : > { %v4320_v53 = vadd.f32 %v5076_v49, %v4319_v11  ;;  %v5824_v55 = vpop.f32.mrb[101].mxu1 }
0x1c27   : > { %5834 = vmatmul.mubr.msk.f32.vlgmr.msra.gmra.mrb[102].mxu0 %vm1126_vm2, %v4320_v53 }
0x1c28   : > { %5849 = vmatprep.mubr.msk.f32.mxu0 %vm6320_vm0, %v6319_v1 }
0x1cfa   : > { %v4403_v16 = vpop.f32.mrb[102].mxu0 }
0x1cfb   : > { %v4404_v32 = vadd.f32 %v5078_v7, %v4403_v16  ;;  %v5835_v33 = vpop.f32.mrb[103].mxu0 }
0x1cfd   : > { %v5080_v0 = vmul.f32 -1.442695, %v4404_v32 }
0x1cff   : > { %6288 = vpow2.f32 %v5080_v0 }
0x1d09   : > { %v6289_v60 = vpop.eup %6288 }
0x1d0a   : > { %v4410_v2 = vadd.f32 1.0, %v6289_v60 }
0x1d0c   : > { %6290 = vrcp.f32 %v4410_v2 }
0x1d16   : > { %v6291_v40 = vpop.eup %6290 }
0x1d17   : > { %v4413_v25 = vmul.f32 %v6291_v40, %v4404_v32 }
0x1d19   : > { %5845 = vmatmul.mubr.msk.f32.vlgmr.msra.gmra.mrb[102].mxu1 %vm1126_vm2, %v4413_v25 }
0x1d1a   : > { %5860 = vmatprep.mubr.msk.f32.mxu1 %vm6320_vm0, %v6319_v1  ;;  %6020 = vmatpush3.bf16.msra.mxu1 %v6019_v37 }
0x1d1b   : > { %6021 = vmatprep.subr.bf16.mxu1 %v6321_v4 }
0x1d1e   : > { %6023 = vmatpush3.bf16.msra.mxu1 %v6022_v48 }
0x1dec   : > { %v4494_v44 = vpop.f32.mrb[102].mxu1 }
0x1ded   : > { %v4495_v9 = vadd.f32 %v5081_v41, %v4494_v44  ;;  %v5846_v15 = vpop.f32.mrb[103].mxu1 }
0x1def   : > { %5848 = vmatpush3.msra.mxu0 %v4495_v9 }
0x1df0   : > { %5850 = vmatmul.mubr.msk.f32.vlgmr.msra.gmra.mrb[104].mxu0 %vm900_vm1, %v4498_v52  ;;  %6024 = vmatprep.subr.bf16.mxu0 %v6321_v4 }
0x1df1   : > { %5871 = vmatprep.mubr.msk.f32.mxu0 %vm6320_vm0, %v6319_v1  ;;  %6026 = vmatpush3.bf16.msra.mxu0 %v6025_v20  ;;  %v4659_v1 = vld [vmem:[%s7489_s24 + $0x10] sm:$0xff] }
0x1df2   : > { %6027 = vmatprep.subr.bf16.mxu0 %v6321_v4  ;;  %v6028_v26 = vpack.c.bf16 %v4660_v24, %v4659_v1 }
0x1df5   : > { %6029 = vmatpush3.bf16.msra.mxu0 %v6028_v26 }
0x1ec3   : > { %v4568_v21 = vpop.f32.mrb[104].mxu0 }
0x1ec4   : > { %5861 = vmatmul.mubr.msk.f32.vlgmr.msra.gmra.mrb[104].mxu1 %vm1126_vm2, %v4568_v21  ;;  %v5851_v18 = vpop.f32.mrb[105].mxu0 }
0x1f97   : > { %v4646_v45 = vpop.f32.mrb[104].mxu1 }
0x1f98   : > { %v4647_v30 = vadd.f32 %v4646_v45, %v4576_v27  ;;  %v5862_v5 = vpop.f32.mrb[105].mxu1 }
0x1f9a   : > { %v5085_v38 = vmul.f32 -1.442695, %v4647_v30 }
0x1f9c   : > { %6292 = vpow2.f32 %v5085_v38 }
0x1fa6   : > { %v6293_v4 = vpop.eup %6292 }
0x1fa7   : > { %v4653_v42 = vadd.f32 1.0, %v6293_v4 }
0x1fa9   : > { %6294 = vrcp.f32 %v4653_v42 }
0x1fb3   : > { %v6295_v43 = vpop.eup %6294 }
0x1fb4   : > { %v4656_v47 = vmul.f32 %v6295_v43, %v4647_v30 }
0x1fb6   : > { %5872 = vmatmul.mubr.msk.f32.vlgmr.msra.gmra.mrb[106].mxu0 %vm1126_vm2, %v4656_v47 }
0x2089   : > { %v4731_v51 = vpop.f32.mrb[106].mxu0 }
0x208a   : > { %v4732_v56 = vadd.f32 %v4731_v51, %v4661_v35  ;;  %v5873_v36 = vpop.f32.mrb[107].mxu0 }
0x208c   : > { %4735 = vst [vmem:[%s875_s30] sm:$0x1] %v4732_v56 }
0x208d PF: > { %s36_s27 = sadd.s32 1, %s6317_s27  }
0x208e   : > { %p33_p4 = scmp.ge.s32.totalorder %s36_s27, 4  }
0x2090   :  { %35 = sbr.rel (!%p33_p4) target bundleno = 13 (0xd), region = 187 }

</bundles_post_ra>
